<compile_context>
chip_gen: v5e
topology: v5e:2x2
jax: 0.10.0
libtpu: 0.0.40
codegen_flags: <defaults>
</compile_context>

<pallas_src>
import numpy as np
import jax
import jax.numpy as jnp
from jax.experimental import pallas as pl
from jax.experimental.pallas import tpu as pltpu

IMG = 28


def _round_up(a, b):
    return ((a + b - 1) // b) * b


# ----------------------------------------------------------------------------
# Host-side glue: build the (IMG, IMG) separable zoom matrix and K = A ⊗ A.
# ----------------------------------------------------------------------------
def _bilinear_rows(out_size, in_size, src_offset, total_in):
    """Rows of a bilinear-resize matrix mapping `in_size` samples (starting at
    `src_offset` inside a length-`total_in` axis) to `out_size` samples."""
    A = np.zeros((out_size, total_in), dtype=np.float32)
    scale = in_size / out_size
    for i in range(out_size):
        src = (i + 0.5) * scale - 0.5
        src = min(max(src, 0.0), in_size - 1)
        i0 = int(np.floor(src))
        i1 = min(i0 + 1, in_size - 1)
        w1 = src - i0
        w0 = 1.0 - w1
        A[i, src_offset + i0] += w0
        A[i, src_offset + i1] += w1
    return A


def build_zoom_matrix(scale, img=IMG):
    if scale > 1.0:
        # CentreCrop(crop_ratio = 1/scale) followed by Resize(img).
        crop_ratio = 1.0 / scale
        crop_size = int(img * crop_ratio)
        offset = (img - crop_size) // 2
        A = _bilinear_rows(img, crop_size, offset, img)            # (img, img)
    else:
        # Resize(int(img*scale)), pasted centred into a zero canvas.
        resize_to = int(img * scale)
        lt = (img - resize_to) // 2
        A = np.zeros((img, img), dtype=np.float32)
        A[lt:lt + resize_to, :] = _bilinear_rows(resize_to, img, 0, img)
    return A


# ----------------------------------------------------------------------------
# Block sizing: generation-aware max block, >= 2 grid steps for v7x megacore.
# ----------------------------------------------------------------------------
def _max_block_rows():
    try:
        kind = jax.devices()[0].device_kind.lower()
    except Exception:
        return 512
    # v5e/v6e: 128 MiB VMEM per TensorCore -> bigger blocks amortize the
    # ~0.35 us/step pipeline overhead.  v7x: only 64 MiB per TC -> stay small.
    if "v5" in kind or "v6" in kind:
        return 1024
    if "v7" in kind:
        return 256
    return 512


def _pick_nblk(n, nblk_max):
    if n <= 8:
        return n                       # tiny batch: whole array, one step
    # At least two grid steps so the "parallel" axis shards across both v7x
    # TensorCores; block rows kept a multiple of 8 for the (8, 128) rule.
    return min(nblk_max, _round_up((n + 1) // 2, 8))


# ----------------------------------------------------------------------------
# Pallas kernel: one lane-dense bf16 MXU matmul per block of images.
#   out_flat_block (nblk, P_pad) = x_flat_block (nblk, P_pad) @ K_T (P_pad, P_pad)
# ----------------------------------------------------------------------------
def _zoom_kernel(kt_ref, x_ref, o_ref):
    # bf16 operands (both!) -> single-pass MXU; f32 accumulation preserved.
    o_ref[...] = jnp.dot(
        x_ref[...].astype(jnp.bfloat16),
        kt_ref[...],
        preferred_element_type=jnp.float32,
    ).astype(o_ref.dtype)


def random_zoom(x, scale):
    """x: (B, C, H, W), H == W == 28.  Returns zoomed (B, C, H, W)."""
    B, C, H, W = x.shape
    assert H == IMG and W == IMG, "module semantics assume 28x28 images"
    N = B * C
    P = H * W                                                      # 784
    P_pad = _round_up(P, 128)                                      # 896 = 7*128

    # Fold both branches into A, then into K = A ⊗ A, transposed and
    # zero-padded to (P_pad, P_pad), stored in bf16.
    A = build_zoom_matrix(float(scale), H)                         # (28, 28)
    K_T_np = np.zeros((P_pad, P_pad), dtype=np.float32)
    K_T_np[:P, :P] = np.kron(A, A).T
    K_T = jnp.asarray(K_T_np, dtype=jnp.bfloat16)

    nblk = _pick_nblk(N, _max_block_rows())
    N_pad = _round_up(N, nblk)
    grid = (N_pad // nblk,)

    # Lane-dense, evenly divisible operand: pad rows to N_pad, lanes to P_pad.
    x_flat = jnp.pad(x.reshape(N, P), ((0, N_pad - N), (0, P_pad - P)))

    itemsize = jnp.dtype(x.dtype).itemsize
    cost = pl.CostEstimate(
        flops=2 * N_pad * P_pad * P_pad,
        bytes_accessed=(N_pad * P_pad * itemsize          # x in
                        + P_pad * P_pad * 2               # K_T (bf16)
                        + N_pad * P_pad * itemsize),      # out
        transcendentals=0,
    )

    def _call(single_buffer_kt):
        if single_buffer_kt:
            # Constant index_map -> only one DMA; single buffer frees ~1.6 MB.
            kt_spec = pl.BlockSpec((P_pad, P_pad), lambda i: (0, 0),
                                   pipeline_mode=pl.Buffered(1))
        else:
            kt_spec = pl.BlockSpec((P_pad, P_pad), lambda i: (0, 0))
        return pl.pallas_call(
            _zoom_kernel,
            out_shape=jax.ShapeDtypeStruct((N_pad, P_pad), x.dtype),
            grid=grid,
            in_specs=[
                kt_spec,                                          # K.T, resident
                pl.BlockSpec((nblk, P_pad), lambda i: (i, 0)),    # image block
            ],
            out_specs=pl.BlockSpec((nblk, P_pad), lambda i: (i, 0)),
            compiler_params=pltpu.CompilerParams(
                dimension_semantics=("parallel",),
                # bf16 K_T + f32 blocks (<=1024 rows) stay well under 32 MiB,
                # which also fits v7x's 64 MiB per-TC physical VMEM.
                vmem_limit_bytes=32 * 1024 * 1024,
            ),
            cost_estimate=cost,
        )(K_T, x_flat)

    try:
        out = _call(True)
    except Exception:
        # Fallback if this JAX build rejects single-buffering via Buffered(1).
        out = _call(False)

    return out[:N, :P].reshape(B, C, H, W)


if __name__ == "__main__":
    # Deterministic "random" scale, mirroring np.random.uniform in forward().
    np.random.seed(0)
    zoom_min, zoom_max = 0.7, 1.3
    scale = float(np.random.uniform(zoom_min, zoom_max))

    key = jax.random.PRNGKey(0)
    x = jax.random.normal(key, (2, 4, IMG, IMG), dtype=jnp.float32)

    out = random_zoom(x, scale)
    jax.block_until_ready(out)
    assert out.shape == x.shape and out.dtype == x.dtype

    # Pure-JAX reference:  out[b, c] = A @ x[b, c] @ A.T  (f32).
    def reference(x, s):
        A = jnp.asarray(build_zoom_matrix(s, IMG))
        return jnp.einsum("ik,bckl,jl->bcij", A, x, A)

    # bf16 MXU operands -> loosened tolerance vs. the f32 reference
    # (deliberate trade-off; fine for data augmentation).
    np.testing.assert_allclose(np.asarray(out), np.asarray(reference(x, scale)),
                               rtol=5e-2, atol=5e-2)

    # Also exercise the scale <= 1 branch (resize-down + paste into canvas).
    out_small = random_zoom(x, 0.85)
    jax.block_until_ready(out_small)
    np.testing.assert_allclose(np.asarray(out_small),
                               np.asarray(reference(x, 0.85)),
                               rtol=5e-2, atol=5e-2)

    print("KERNEL_OK")
</pallas_src>

<mosaic_0001>
module attributes {stable_mosaic.version = 11 : i64} {
  func.func @_zoom_kernel(%arg0: i32, %arg1: memref<896x896xbf16, #tpu.memory_space<vmem>>, %arg2: memref<8x896xf32, #tpu.memory_space<vmem>>, %arg3: memref<8x896xf32, #tpu.memory_space<vmem>>) attributes {dimension_semantics = [#tpu.dimension_semantics<parallel>], iteration_bounds = array<i64: 1>, scalar_prefetch = 0 : i64, scratch_operands = 0 : i64, tpu.core_type = #tpu.core_type<tc>, window_params = [{pipeline_mode = #tpu.pipeline_mode<synchronous>, transform_indices = @transform_0, window_bounds = array<i64: 896, 896>}, {transform_indices = @transform_1, window_bounds = array<i64: 8, 896>}, {transform_indices = @transform_2, window_bounds = array<i64: 8, 896>}]} {
    %c0 = arith.constant 0 : index
    %c0_0 = arith.constant 0 : index
    %0 = vector.load %arg2[%c0, %c0_0] : memref<8x896xf32, #tpu.memory_space<vmem>>, vector<8x896xf32>
    %1 = arith.truncf %0 : vector<8x896xf32> to vector<8x896xbf16>
    %c0_1 = arith.constant 0 : index
    %c0_2 = arith.constant 0 : index
    %2 = vector.load %arg1[%c0_1, %c0_2] : memref<896x896xbf16, #tpu.memory_space<vmem>>, vector<896x896xbf16>
    %cst = arith.constant dense<0.000000e+00> : vector<8x896xf32>
    %3 = tpu.matmul %1, %2, %cst {dimension_numbers = #tpu.dot_dimension_numbers<[1], [0], [0], [1], [0, 0, 1, 1], [], []>} : vector<8x896xbf16>, vector<896x896xbf16>, vector<8x896xf32> -> vector<8x896xf32>
    %c0_3 = arith.constant 0 : index
    %c0_4 = arith.constant 0 : index
    %4 = vector.load %arg3[%c0_3, %c0_4] : memref<8x896xf32, #tpu.memory_space<vmem>>, vector<8x896xf32>
    tpu.vector_store %arg3[%c0_3, %c0_4], %3 {strides = array<i32>} : memref<8x896xf32, #tpu.memory_space<vmem>>, vector<8x896xf32>,
    return
  }
  func.func @transform_0(%arg0: i32) -> (i32, i32) {
    %c0_i32 = arith.constant 0 : i32
    %c0_i32_0 = arith.constant 0 : i32
    %c0_i32_1 = arith.constant 0 : i32
    return %c0_i32, %c0_i32_0 : i32, i32
  }
  func.func @transform_1(%arg0: i32) -> (i32, i32) {
    %c0_i32 = arith.constant 0 : i32
    %c0_i32_0 = arith.constant 0 : i32
    return %arg0, %c0_i32 : i32, i32
  }
  func.func @transform_2(%arg0: i32) -> (i32, i32) {
    %c0_i32 = arith.constant 0 : i32
    %c0_i32_0 = arith.constant 0 : i32
    return %arg0, %c0_i32 : i32, i32
  }
}

module attributes {stable_mosaic.version = 11 : i64} {
  func.func @_zoom_kernel(%arg0: i32, %arg1: memref<896x896xbf16, #tpu.memory_space<vmem>>, %arg2: memref<8x896xf32, #tpu.memory_space<vmem>>, %arg3: memref<8x896xf32, #tpu.memory_space<vmem>>) attributes {dimension_semantics = [#tpu.dimension_semantics<parallel>], iteration_bounds = array<i64: 1>, scalar_prefetch = 0 : i64, scratch_operands = 0 : i64, tpu.core_type = #tpu.core_type<tc>, window_params = [{pipeline_mode = #tpu.pipeline_mode<synchronous>, transform_indices = @transform_0, window_bounds = array<i64: 896, 896>}, {transform_indices = @transform_1, window_bounds = array<i64: 8, 896>}, {transform_indices = @transform_2, window_bounds = array<i64: 8, 896>}]} {
    %c0 = arith.constant 0 : index
    %c0_0 = arith.constant 0 : index
    %0 = vector.load %arg2[%c0, %c0_0] : memref<8x896xf32, #tpu.memory_space<vmem>>, vector<8x896xf32>
    %1 = arith.truncf %0 : vector<8x896xf32> to vector<8x896xbf16>
    %c0_1 = arith.constant 0 : index
    %c0_2 = arith.constant 0 : index
    %2 = vector.load %arg1[%c0_1, %c0_2] : memref<896x896xbf16, #tpu.memory_space<vmem>>, vector<896x896xbf16>
    %cst = arith.constant dense<0.000000e+00> : vector<8x896xf32>
    %3 = tpu.matmul %1, %2, %cst {dimension_numbers = #tpu.dot_dimension_numbers<[1], [0], [0], [1], [0, 0, 1, 1], [], []>} : vector<8x896xbf16>, vector<896x896xbf16>, vector<8x896xf32> -> vector<8x896xf32>
    %c0_3 = arith.constant 0 : index
    %c0_4 = arith.constant 0 : index
    %4 = vector.load %arg3[%c0_3, %c0_4] : memref<8x896xf32, #tpu.memory_space<vmem>>, vector<8x896xf32>
    tpu.vector_store %arg3[%c0_3, %c0_4], %3 {strides = array<i32>} : memref<8x896xf32, #tpu.memory_space<vmem>>, vector<8x896xf32>,
    return
  }
  func.func @transform_0(%arg0: i32) -> (i32, i32) {
    %c0_i32 = arith.constant 0 : i32
    %c0_i32_0 = arith.constant 0 : i32
    %c0_i32_1 = arith.constant 0 : i32
    return %c0_i32, %c0_i32_0 : i32, i32
  }
  func.func @transform_1(%arg0: i32) -> (i32, i32) {
    %c0_i32 = arith.constant 0 : i32
    %c0_i32_0 = arith.constant 0 : i32
    return %arg0, %c0_i32 : i32, i32
  }
  func.func @transform_2(%arg0: i32) -> (i32, i32) {
    %c0_i32 = arith.constant 0 : i32
    %c0_i32_0 = arith.constant 0 : i32
    return %arg0, %c0_i32 : i32, i32
  }
}

</mosaic_0001>

<bundles_post_ra>
// kernel: tpu_custom_call.1
= control target key start
LH: loop header
LB: loop body
LE: loop exit
PB: predicated region body
PF: predicated region fallthrough
CT: control target
= control target key end

     0   :  { %7 = vsyncpa [#allocation3], 0  ;;  %s5365_s0 = inlined_call_operand.hbm [shape: bf16[896,896], index: 0, kind: input, shape index: {}]   ;;  %s5366_s1 = inlined_call_operand.hbm [shape: f32[8,896], index: 1, kind: input, shape index: {}]   ;;  %s5367_s2 = inlined_call_operand.hbm [shape: f32[8,896], index: 2, kind: output, shape index: {}]  }
   0x1   :  { %8 = vsyncpa [#allocation6], 0 }
   0x2   :  { %9 = vsyncpa [#allocation4], 0  ;;  %s14_s11 = sshll.u32 %s5365_s0, 4  ;;  %s5225_s12 = smov [#allocation2]   ;;  %s15_s11 = int_to_ptr.hbm [resolvable:$true] %s14_s11 }
   0x3   :  { %s16_s13 = sshll.u32 %s5225_s12, 4  ;;  %s28_s16 = sshll.u32 %s5366_s1, 4  ;;  %s17_s13 = int_to_ptr.vmem [resolvable:$true] %s16_s13  ;;  %s29_s16 = int_to_ptr.hbm [resolvable:$true] %s28_s16 }
   0x4   :  { %s5226_s17 = smov 448   ;;  %s5227_s18 = smov 28  }
   0x5   :  { %22 = dma.hbm_to_vmem [thread:$0]  %s15_s11, 50176, %s17_s13, [#allocation3], %s5226_s17, %s5226_s17, %s5227_s18  }
   0x6   :  { %s5228_s19 = smov [#allocation5]  }
   0x7   :  { %s30_s20 = sshll.u32 %s5228_s19, 4  ;;  %s31_s20 = int_to_ptr.vmem [resolvable:$true] %s30_s20 }
   0x8   :  { %33 = dma.hbm_to_vmem [thread:$0]  %s29_s16, 896, %s31_s20, [#allocation6]  }
   0x9   :  { %5219 = dma.done.wait [#allocation3], 50176  }
   0xa   :  { %5220 = vsyncadd [#allocation3], 4294917120 }
   0xb   :  { %5221 = dma.done.wait [#allocation6], 896  }
   0xc   :  { %5222 = vsyncadd [#allocation6], 4294966400  ;;  %v3380_v0 = vld [vmem:[#allocation2 + $0x188] sm:$0xf]  ;;  %v4802_v1 = vld [vmem:[#allocation2 + $0x1a0] sm:$0xf0] }
   0xd   :  { %v3828_v2 = vld [vmem:[#allocation2 + $0x508] sm:$0xf]  ;;  %v3381_v3 = vor.u32 %v4802_v1, %v3380_v0  ;;  %v4914_v4 = vld [vmem:[#allocation2 + $0x520] sm:$0xf0]  ;;  %v3352_v5 = vld [vmem:[#allocation2 + $0x150] sm:$0xf] }
   0xe   :  { %v4795_v6 = vld [vmem:[#allocation2 + $0x168] sm:$0xf0]  ;;  %v3829_v7 = vor.u32 %v4914_v4, %v3828_v2  ;;  %v3604_v8 = vld [vmem:[#allocation2 + $0x348] sm:$0xf]  ;;  %v4858_v9 = vld [vmem:[#allocation2 + $0x360] sm:$0xf0] }
   0xf   :  { %v3800_v10 = vld [vmem:[#allocation2 + $0x4d0] sm:$0xf]  ;;  %2520 = vmatpush.bf16.msra.mxu0 %v3381_v3  ;;  %v3353_v11 = vor.u32 %v4795_v6, %v3352_v5  ;;  %v3605_v12 = vor.u32 %v4858_v9, %v3604_v8  ;;  %v4907_v13 = vld [vmem:[#allocation2 + $0x4e8] sm:$0xf0]  ;;  %v3324_v14 = vld [vmem:[#allocation2 + $0x118] sm:$0xf] }
  0x10   :  { %2546 = vmatpush.bf16.msra.mxu2 %v3829_v7  ;;  %v3801_v15 = vor.u32 %v4907_v13, %v3800_v10  ;;  %v4788_v16 = vld [vmem:[#allocation2 + $0x130] sm:$0xf0]  ;;  %v3576_v17 = vld [vmem:[#allocation2 + $0x310] sm:$0xf]  ;;  %v4851_v18 = vld [vmem:[#allocation2 + $0x328] sm:$0xf0] }
  0x11   :  { %2533 = vmatpush.bf16.msra.mxu1 %v3605_v12  ;;  %v3577_v19 = vor.u32 %v4851_v18, %v3576_v17  ;;  %v3772_v20 = vld [vmem:[#allocation2 + $0x498] sm:$0xf]  ;;  %v4900_v21 = vld [vmem:[#allocation2 + $0x4b0] sm:$0xf0]  ;;  %v4052_v22 = vld [vmem:[#allocation2 + $0x6c8] sm:$0xf]  ;;  %v3325_v25 = vor.u32 %v4788_v16, %v3324_v14 }
  0x12   :  { %v4970_v23 = vld [vmem:[#allocation2 + $0x6e0] sm:$0xf0]  ;;  %v3548_v24 = vld [vmem:[#allocation2 + $0x2d8] sm:$0xf]  ;;  %v4844_v27 = vld [vmem:[#allocation2 + $0x2f0] sm:$0xf0]  ;;  %v3773_v28 = vor.u32 %v4900_v21, %v3772_v20 }
  0x13   :  { %2521 = vmatpush.bf16.msra.mxu0 %v3353_v11  ;;  %v4053_v26 = vor.u32 %v4970_v23, %v4052_v22  ;;  %v3296_v29 = vld [vmem:[#allocation2 + $0xe0] sm:$0xf]  ;;  %v4781_v30 = vld [vmem:[#allocation2 + $0xf8] sm:$0xf0]  ;;  %v4024_v31 = vld [vmem:[#allocation2 + $0x690] sm:$0xf]  ;;  %v3549_v32 = vor.u32 %v4844_v27, %v3548_v24 }
  0x14   :  { %2547 = vmatpush.bf16.msra.mxu2 %v3801_v15  ;;  %v3744_v33 = vld [vmem:[#allocation2 + $0x460] sm:$0xf]  ;;  %v4893_v34 = vld [vmem:[#allocation2 + $0x478] sm:$0xf0]  ;;  %v4963_v35 = vld [vmem:[#allocation2 + $0x6a8] sm:$0xf0]  ;;  %v3297_v39 = vor.u32 %v4781_v30, %v3296_v29 }
  0x15   :  { %2534 = vmatpush.bf16.msra.mxu1 %v3577_v19  ;;  %2559 = vmatpush.bf16.msra.mxu3 %v4053_v26  ;;  %v4025_v36 = vor.u32 %v4963_v35, %v4024_v31  ;;  %v3520_v37 = vld [vmem:[#allocation2 + $0x2a0] sm:$0xf]  ;;  %v4837_v38 = vld [vmem:[#allocation2 + $0x2b8] sm:$0xf0]  ;;  %v3996_v40 = vld [vmem:[#allocation2 + $0x658] sm:$0xf]  ;;  %v3745_v42 = vor.u32 %v4893_v34, %v3744_v33 }
  0x16   :  { %v4956_v41 = vld [vmem:[#allocation2 + $0x670] sm:$0xf0]  ;;  %v3268_v43 = vld [vmem:[#allocation2 + $0xa8] sm:$0xf]  ;;  %v4774_v44 = vld [vmem:[#allocation2 + $0xc0] sm:$0xf0]  ;;  %v3521_v45 = vor.u32 %v4837_v38, %v3520_v37 }
  0x17   :  { %2522 = vmatpush.bf16.msra.mxu0 %v3325_v25  ;;  %v3716_v46 = vld [vmem:[#allocation2 + $0x428] sm:$0xf]  ;;  %v4886_v47 = vld [vmem:[#allocation2 + $0x440] sm:$0xf0]  ;;  %v3997_v48 = vor.u32 %v4956_v41, %v3996_v40  ;;  %v3968_v51 = vld [vmem:[#allocation2 + $0x620] sm:$0xf]  ;;  %v3269_v53 = vor.u32 %v4774_v44, %v3268_v43 }
  0x18   :  { %2548 = vmatpush.bf16.msra.mxu2 %v3773_v28  ;;  %v3492_v49 = vld [vmem:[#allocation2 + $0x268] sm:$0xf]  ;;  %v4830_v50 = vld [vmem:[#allocation2 + $0x280] sm:$0xf0]  ;;  %v4949_v52 = vld [vmem:[#allocation2 + $0x638] sm:$0xf0]  ;;  %v3717_v54 = vor.u32 %v4886_v47, %v3716_v46 }
  0x19   :  { %2535 = vmatpush.bf16.msra.mxu1 %v3549_v32  ;;  %2560 = vmatpush.bf16.msra.mxu3 %v4025_v36  ;;  %v3240_v55 = vld [vmem:[#allocation2 + $0x70] sm:$0xf]  ;;  %v4767_v56 = vld [vmem:[#allocation2 + $0x88] sm:$0xf0]  ;;  %v3493_v57 = vor.u32 %v4830_v50, %v3492_v49  ;;  %v3969_v60 = vor.u32 %v4949_v52, %v3968_v51  ;;  %v3940_v63 = vld [vmem:[#allocation2 + $0x5e8] sm:$0xf] }
  0x1a   :  { %v3688_v58 = vld [vmem:[#allocation2 + $0x3f0] sm:$0xf]  ;;  %v4879_v59 = vld [vmem:[#allocation2 + $0x408] sm:$0xf0]  ;;  %v4942_v0 = vld [vmem:[#allocation2 + $0x600] sm:$0xf0]  ;;  %v3241_v1 = vor.u32 %v4767_v56, %v3240_v55 }
  0x1b   :  { %2523 = vmatpush.bf16.msra.mxu0 %v3297_v39  ;;  %v3464_v61 = vld [vmem:[#allocation2 + $0x230] sm:$0xf]  ;;  %v4823_v62 = vld [vmem:[#allocation2 + $0x248] sm:$0xf0]  ;;  %v3689_v2 = vor.u32 %v4879_v59, %v3688_v58  ;;  %v3212_v3 = vld [vmem:[#allocation2 + $0x38] sm:$0xf]  ;;  %v3941_v8 = vor.u32 %v4942_v0, %v3940_v63 }
  0x1c   :  { %2549 = vmatpush.bf16.msra.mxu2 %v3745_v42  ;;  %v4760_v4 = vld [vmem:[#allocation2 + $0x50] sm:$0xf0]  ;;  %v3465_v5 = vor.u32 %v4823_v62, %v3464_v61  ;;  %v3660_v6 = vld [vmem:[#allocation2 + $0x3b8] sm:$0xf]  ;;  %v3912_v11 = vld [vmem:[#allocation2 + $0x5b0] sm:$0xf] }
  0x1d   :  { %2536 = vmatpush.bf16.msra.mxu1 %v3521_v45  ;;  %2561 = vmatpush.bf16.msra.mxu3 %v3997_v48  ;;  %v4872_v7 = vld [vmem:[#allocation2 + $0x3d0] sm:$0xf0]  ;;  %v3436_v9 = vld [vmem:[#allocation2 + $0x1f8] sm:$0xf]  ;;  %v4935_v12 = vld [vmem:[#allocation2 + $0x5c8] sm:$0xf0]  ;;  %v3213_v13 = vor.u32 %v4760_v4, %v3212_v3 }
  0x1e   :  { %v4816_v10 = vld [vmem:[#allocation2 + $0x210] sm:$0xf0]  ;;  %v3184_v14 = vld [vmem:[#allocation2] sm:$0xf]  ;;  %v4753_v15 = vld [vmem:[#allocation2 + $0x18] sm:$0xf0]  ;;  %v3661_v16 = vor.u32 %v4872_v7, %v3660_v6  ;;  %v3913_v24 = vor.u32 %v4935_v12, %v3912_v11 }
  0x1f   :  { %2524 = vmatpush.bf16.msra.mxu0 %v3269_v53  ;;  %v4276_v17 = vld [vmem:[#allocation2 + $0x888] sm:$0xf]  ;;  %v5026_v18 = vld [vmem:[#allocation2 + $0x8a0] sm:$0xf0]  ;;  %v3632_v19 = vld [vmem:[#allocation2 + $0x380] sm:$0xf]  ;;  %v3437_v20 = vor.u32 %v4816_v10, %v3436_v9  ;;  %v3185_v28 = vor.u32 %v4753_v15, %v3184_v14 }
  0x20   :  { %2550 = vmatpush.bf16.msra.mxu2 %v3717_v54  ;;  %v4865_v21 = vld [vmem:[#allocation2 + $0x398] sm:$0xf0]  ;;  %v4724_v22 = vld [vmem:[#allocation2 + $0xc08] sm:$0xf]  ;;  %v5138_v23 = vld [vmem:[#allocation2 + $0xc20] sm:$0xf0]  ;;  %v4277_v32 = vor.u32 %v5026_v18, %v4276_v17 }
  0x21   :  { %2537 = vmatpush.bf16.msra.mxu1 %v3493_v57  ;;  %2562 = vmatpush.bf16.msra.mxu3 %v3969_v60  ;;  %v3408_v25 = vld [vmem:[#allocation2 + $0x1c0] sm:$0xf]  ;;  %v4809_v26 = vld [vmem:[#allocation2 + $0x1d8] sm:$0xf0]  ;;  %v4500_v27 = vld [vmem:[#allocation2 + $0xa48] sm:$0xf]  ;;  %v3633_v33 = vor.u32 %v4865_v21, %v3632_v19  ;;  %v4725_v34 = vor.u32 %v5138_v23, %v4724_v22 }
  0x22   :  { %v5082_v29 = vld [vmem:[#allocation2 + $0xa60] sm:$0xf0]  ;;  %v3884_v30 = vld [vmem:[#allocation2 + $0x578] sm:$0xf]  ;;  %v4928_v31 = vld [vmem:[#allocation2 + $0x590] sm:$0xf0]  ;;  %v3409_v37 = vor.u32 %v4809_v26, %v3408_v25 }
  0x23   :  { %2525 = vmatpush.bf16.msra.mxu0 %v3241_v1  ;;  %v4248_v35 = vld [vmem:[#allocation2 + $0x850] sm:$0xf]  ;;  %v5019_v36 = vld [vmem:[#allocation2 + $0x868] sm:$0xf0]  ;;  %v4501_v39 = vor.u32 %v5082_v29, %v4500_v27  ;;  %v3885_v41 = vor.u32 %v4928_v31, %v3884_v30  ;;  %v3856_v45 = vld [vmem:[#allocation2 + $0x540] sm:$0xf] }
  0x24   :  { %2551 = vmatpush.bf16.msra.mxu2 %v3689_v2  ;;  %v4696_v38 = vld [vmem:[#allocation2 + $0xbd0] sm:$0xf]  ;;  %v5131_v40 = vld [vmem:[#allocation2 + $0xbe8] sm:$0xf0]  ;;  %v4921_v46 = vld [vmem:[#allocation2 + $0x558] sm:$0xf0]  ;;  %v4249_v48 = vor.u32 %v5019_v36, %v4248_v35 }
  0x25   :  { %2538 = vmatpush.bf16.msra.mxu1 %v3465_v5  ;;  %2563 = vmatpush.bf16.msra.mxu3 %v3941_v8  ;;  %v4472_v42 = vld [vmem:[#allocation2 + $0xa10] sm:$0xf]  ;;  %v5075_v44 = vld [vmem:[#allocation2 + $0xa28] sm:$0xf0]  ;;  %v3382_v50 = vld [vmem:[#allocation2 + $0x1a4] sm:$0xf0]  ;;  %v4697_v52 = vor.u32 %v5131_v40, %v4696_v38  ;;  %v3857_v60 = vor.u32 %v4921_v46, %v3856_v45 }
  0x26   :  { %v44_v43 = vld [vmem:[#allocation5 + $0x10] sm:$0xff]  ;;  %v4799_v49 = vld [vmem:[#allocation2 + $0x18c] sm:$0xf]  ;;  %v42_v51 = vld [vmem:[#allocation5] sm:$0xff]  ;;  %v4473_v57 = vor.u32 %v5075_v44, %v4472_v42  ;;  %s5229_s0 = smov [#allocation7]   ;;  %s3171_s23 = sshll.u32 %s5367_s2, 4  ;;  %s3172_s23 = int_to_ptr.hbm [resolvable:$true] %s3171_s23 }
  0x27   :  { %2526 = vmatpush.bf16.msra.mxu0 %v3213_v13  ;;  %v5251_v47 = vpack.c.bf16 %v44_v43, %v44_v43  ;;  %v4220_v53 = vld [vmem:[#allocation2 + $0x818] sm:$0xf]  ;;  %v5012_v54 = vld [vmem:[#allocation2 + $0x830] sm:$0xf0]  ;;  %v5253_v55 = vpack.c.bf16 %v42_v51, %v42_v51  ;;  %v43_v56 = vld [vmem:[#allocation5 + $0x8] sm:$0xff]  ;;  %v3385_v62 = vor.u32 %v4799_v49, %v3382_v50  ;;  %s3169_s1 = sshll.u32 %s5229_s0, 4  ;;  %s3170_s1 = int_to_ptr.vmem [resolvable:$true] %s3169_s1 }
  0x28   :  { %2552 = vmatpush.bf16.msra.mxu2 %v3661_v16  ;;  %v4668_v58 = vld [vmem:[#allocation2 + $0xb98] sm:$0xf]  ;;  %v5124_v59 = vld [vmem:[#allocation2 + $0xbb0] sm:$0xf0]  ;;  %v5255_v61 = vpack.c.bf16 %v43_v56, %v43_v56  ;;  %v4221_v1 = vor.u32 %v5012_v54, %v4220_v53  ;;  %v3354_v3 = vld [vmem:[#allocation2 + $0x16c] sm:$0xf0] }
  0x29   :  { %2539 = vmatpush.bf16.msra.mxu1 %v3437_v20  ;;  %2564 = vmatpush.bf16.msra.mxu3 %v3913_v24  ;;  %v4444_v63 = vld [vmem:[#allocation2 + $0x9d8] sm:$0xf]  ;;  %v5068_v0 = vld [vmem:[#allocation2 + $0x9f0] sm:$0xf0]  ;;  %v4669_v4 = vor.u32 %v5124_v59, %v4668_v58  ;;  %v4192_v5 = vld [vmem:[#allocation2 + $0x7e0] sm:$0xf] }
  0x2a   :  { %v4792_v2 = vld [vmem:[#allocation2 + $0x154] sm:$0xf]  ;;  %v5005_v6 = vld [vmem:[#allocation2 + $0x7f8] sm:$0xf0]  ;;  %v4445_v7 = vor.u32 %v5068_v0, %v4444_v63  ;;  %v4640_v8 = vld [vmem:[#allocation2 + $0xb60] sm:$0xf] }
  0x2b   :  { %2527 = vmatpush.bf16.msra.mxu0 %v3185_v28  ;;  %v5117_v9 = vld [vmem:[#allocation2 + $0xb78] sm:$0xf0]  ;;  %v3357_v11 = vor.u32 %v4792_v2, %v3354_v3  ;;  %v4416_v12 = vld [vmem:[#allocation2 + $0x9a0] sm:$0xf]  ;;  %v4193_v15 = vor.u32 %v5005_v6, %v4192_v5  ;;  %v3326_v17 = vld [vmem:[#allocation2 + $0x134] sm:$0xf0] }
  0x2c   :  { %2553 = vmatpush.bf16.msra.mxu2 %v3633_v33  ;;  %v45_v10 = vld [vmem:[#allocation5 + $0x18] sm:$0xff]  ;;  %v4641_v18 = vor.u32 %v5117_v9, %v4640_v8  ;;  %v4164_v19 = vld [vmem:[#allocation2 + $0x7a8] sm:$0xf]  ;;  %v4998_v20 = vld [vmem:[#allocation2 + $0x7c0] sm:$0xf0] }
  0x2d   :  { %2540 = vmatpush.bf16.msra.mxu1 %v3409_v37  ;;  %2565 = vmatpush.bf16.msra.mxu3 %v3885_v41  ;;  %v5061_v13 = vld [vmem:[#allocation2 + $0x9b8] sm:$0xf0]  ;;  %v5260_v14 = vpack.c.bf16 %v45_v10, %v45_v10  ;;  %v4612_v22 = vld [vmem:[#allocation2 + $0xb28] sm:$0xf]  ;;  %v5110_v23 = vld [vmem:[#allocation2 + $0xb40] sm:$0xf0]  ;;  %v4165_v27 = vor.u32 %v4998_v20, %v4164_v19 }
  0x2e   :  { %2528 = vmatmul.bf16.vlgmr.msra.gmra.mxu0 %v5253_v55  ;;  %v4785_v16 = vld [vmem:[#allocation2 + $0x11c] sm:$0xf]  ;;  %v4417_v21 = vor.u32 %v5061_v13, %v4416_v12  ;;  %v4388_v25 = vld [vmem:[#allocation2 + $0x968] sm:$0xf]  ;;  %v5054_v26 = vld [vmem:[#allocation2 + $0x980] sm:$0xf0]  ;;  %v4613_v30 = vor.u32 %v5110_v23, %v4612_v22 }
  0x2f   :  { %2572 = vmatpush.bf16.msrb.mxu0 %v4277_v32  ;;  %2554 = vmatmul.bf16.vlgmr.msra.gmra.mxu2 %v5251_v47  ;;  %v3329_v24 = vor.u32 %v4785_v16, %v3326_v17  ;;  %v4778_v28 = vld [vmem:[#allocation2 + $0xe4] sm:$0xf]  ;;  %v3298_v29 = vld [vmem:[#allocation2 + $0xfc] sm:$0xf0]  ;;  %v4136_v31 = vld [vmem:[#allocation2 + $0x770] sm:$0xf]  ;;  %v4389_v33 = vor.u32 %v5054_v26, %v4388_v25 }
  0x30   :  { %2598 = vmatpush.bf16.msrb.mxu2 %v4725_v34  ;;  %2541 = vmatmul.bf16.vlgmr.msra.gmra.mxu1 %v5255_v61  ;;  %v4991_v32 = vld [vmem:[#allocation2 + $0x788] sm:$0xf0]  ;;  %v4584_v34 = vld [vmem:[#allocation2 + $0xaf0] sm:$0xf]  ;;  %v3301_v36 = vor.u32 %v4778_v28, %v3298_v29  ;;  %v3270_v41 = vld [vmem:[#allocation2 + $0xc4] sm:$0xf0] }
  0x31   :  { %2585 = vmatpush.bf16.msrb.mxu1 %v4501_v39  ;;  %2566 = vmatpush.bf16.msra.mxu3 %v3857_v60  ;;  %v5103_v35 = vld [vmem:[#allocation2 + $0xb08] sm:$0xf0]  ;;  %v4360_v37 = vld [vmem:[#allocation2 + $0x930] sm:$0xf]  ;;  %v4137_v39 = vor.u32 %v4991_v32, %v4136_v31  ;;  %v4108_v43 = vld [vmem:[#allocation2 + $0x738] sm:$0xf] }
  0x32   :  { %v5047_v38 = vld [vmem:[#allocation2 + $0x948] sm:$0xf0]  ;;  %v4585_v42 = vor.u32 %v5103_v35, %v4584_v34  ;;  %v4984_v44 = vld [vmem:[#allocation2 + $0x750] sm:$0xf0]  ;;  %v4556_v46 = vld [vmem:[#allocation2 + $0xab8] sm:$0xf] }
  0x33   :  { %2573 = vmatpush.bf16.msrb.mxu0 %v4249_v48  ;;  %v4771_v40 = vld [vmem:[#allocation2 + $0xac] sm:$0xf]  ;;  %v4361_v45 = vor.u32 %v5047_v38, %v4360_v37  ;;  %v5096_v48 = vld [vmem:[#allocation2 + $0xad0] sm:$0xf0]  ;;  %v4332_v50 = vld [vmem:[#allocation2 + $0x8f8] sm:$0xf] }
  0x34   :  { %2599 = vmatpush.bf16.msrb.mxu2 %v4697_v52  ;;  %2567 = vmatmul.bf16.vlgmr.msra.gmra.mxu3 %v5260_v14  ;;  %v3273_v49 = vor.u32 %v4771_v40, %v3270_v41  ;;  %v5040_v51 = vld [vmem:[#allocation2 + $0x910] sm:$0xf0]  ;;  %v4109_v52 = vor.u32 %v4984_v44, %v4108_v43  ;;  %v4080_v53 = vld [vmem:[#allocation2 + $0x700] sm:$0xf]  ;;  %v3242_v56 = vld [vmem:[#allocation2 + $0x8c] sm:$0xf0] }
  0x35   :  { %2586 = vmatpush.bf16.msrb.mxu1 %v4473_v57  ;;  %2611 = vmatpush.bf16.msrb.mxu3 %v3385_v62  ;;  %v4764_v54 = vld [vmem:[#allocation2 + $0x74] sm:$0xf]  ;;  %v4557_v57 = vor.u32 %v5096_v48, %v4556_v46  ;;  %v4977_v58 = vld [vmem:[#allocation2 + $0x718] sm:$0xf0]  ;;  %v4855_v59 = vld [vmem:[#allocation2 + $0x34c] sm:$0xf]  ;;  %v4333_v62 = vor.u32 %v5040_v51, %v4332_v50 }
  0x36   :  { %v3606_v60 = vld [vmem:[#allocation2 + $0x364] sm:$0xf0]  ;;  %v4528_v63 = vld [vmem:[#allocation2 + $0xa80] sm:$0xf]  ;;  %v5089_v0 = vld [vmem:[#allocation2 + $0xa98] sm:$0xf0]  ;;  %v3245_v3 = vor.u32 %v4764_v54, %v3242_v56  ;;  %v4081_v6 = vor.u32 %v4977_v58, %v4080_v53 }
  0x37   :  { %2574 = vmatpush.bf16.msrb.mxu0 %v4221_v1  ;;  %v4967_v1 = vld [vmem:[#allocation2 + $0x6cc] sm:$0xf]  ;;  %v4054_v2 = vld [vmem:[#allocation2 + $0x6e4] sm:$0xf0]  ;;  %v5033_v5 = vld [vmem:[#allocation2 + $0x8d8] sm:$0xf0]  ;;  %v3609_v10 = vor.u32 %v4855_v59, %v3606_v60 }
  0x38   :  { %2600 = vmatpush.bf16.msrb.mxu2 %v4669_v4  ;;  %v4304_v4 = vld [vmem:[#allocation2 + $0x8c0] sm:$0xf]  ;;  %v4911_v8 = vld [vmem:[#allocation2 + $0x50c] sm:$0xf]  ;;  %v3830_v9 = vld [vmem:[#allocation2 + $0x524] sm:$0xf0]  ;;  %v4057_v16 = vor.u32 %v4967_v1, %v4054_v2 }
  0x39   :  { %2587 = vmatpush.bf16.msrb.mxu1 %v4445_v7  ;;  %2612 = vmatpush.bf16.msrb.mxu3 %v3357_v11  ;;  %v46_v7 = vld [vmem:[#allocation5 + $0x20] sm:$0xff]  ;;  %v4529_v11 = vor.u32 %v5089_v0, %v4528_v63  ;;  %v48_v12 = vld [vmem:[#allocation5 + $0x30] sm:$0xff]  ;;  %v4757_v13 = vld [vmem:[#allocation2 + $0x3c] sm:$0xf]  ;;  %v4305_v19 = vor.u32 %v5033_v5, %v4304_v4  ;;  %v3833_v22 = vor.u32 %v4911_v8, %v3830_v9 }
  0x3a   :  { %v4848_v17 = vld [vmem:[#allocation2 + $0x314] sm:$0xf]  ;;  %v47_v20 = vld [vmem:[#allocation5 + $0x28] sm:$0xff]  ;;  %v5265_v25 = vpack.c.bf16 %v48_v12, %v48_v12  ;;  %v3802_v28 = vld [vmem:[#allocation2 + $0x4ec] sm:$0xf0] }
  0x3b   :  { %2575 = vmatpush.bf16.msrb.mxu0 %v4193_v15  ;;  %v3214_v15 = vld [vmem:[#allocation2 + $0x54] sm:$0xf0]  ;;  %v4960_v23 = vld [vmem:[#allocation2 + $0x694] sm:$0xf]  ;;  %v4841_v31 = vld [vmem:[#allocation2 + $0x2dc] sm:$0xf] }
  0x3c   :  { %2601 = vmatpush.bf16.msrb.mxu2 %v4641_v18  ;;  %v3578_v18 = vld [vmem:[#allocation2 + $0x32c] sm:$0xf0]  ;;  %v3217_v26 = vor.u32 %v4757_v13, %v3214_v15  ;;  %v4750_v32 = vld [vmem:[#allocation2 + $0x4] sm:$0xf]  ;;  %v3550_v35 = vld [vmem:[#allocation2 + $0x2f4] sm:$0xf0] }
  0x3d   :  { %2588 = vmatpush.bf16.msrb.mxu1 %v4417_v21  ;;  %2613 = vmatpush.bf16.msrb.mxu3 %v3329_v24  ;;  %v5263_v21 = vpack.c.bf16 %v46_v7, %v46_v7  ;;  %v4026_v24 = vld [vmem:[#allocation2 + $0x6ac] sm:$0xf0]  ;;  %v3581_v29 = vor.u32 %v4848_v17, %v3578_v18  ;;  %v4278_v37 = vld [vmem:[#allocation2 + $0x8a4] sm:$0xf0]  ;;  %v3998_v40 = vld [vmem:[#allocation2 + $0x674] sm:$0xf0]  ;;  %v3553_v44 = vor.u32 %v4841_v31, %v3550_v35 }
  0x3e   :  { %v4029_v34 = vor.u32 %v4960_v23, %v4026_v24  ;;  %v3774_v43 = vld [vmem:[#allocation2 + $0x4b4] sm:$0xf0]  ;;  %v5016_v50 = vld [vmem:[#allocation2 + $0x854] sm:$0xf]  ;;  %v4250_v51 = vld [vmem:[#allocation2 + $0x86c] sm:$0xf0] }
  0x3f   :  { %2576 = vmatpush.bf16.msrb.mxu0 %v4165_v27  ;;  %v4904_v27 = vld [vmem:[#allocation2 + $0x4d4] sm:$0xf]  ;;  %v4946_v53 = vld [vmem:[#allocation2 + $0x624] sm:$0xf]  ;;  %v3970_v54 = vld [vmem:[#allocation2 + $0x63c] sm:$0xf0]  ;;  %v4253_v60 = vor.u32 %v5016_v50, %v4250_v51 }
  0x40   :  { %2602 = vmatpush.bf16.msrb.mxu2 %v4613_v30  ;;  %v5267_v30 = vpack.c.bf16 %v47_v20, %v47_v20  ;;  %v3805_v38 = vor.u32 %v4904_v27, %v3802_v28  ;;  %v4890_v56 = vld [vmem:[#allocation2 + $0x464] sm:$0xf]  ;;  %v4827_v59 = vld [vmem:[#allocation2 + $0x26c] sm:$0xf]  ;;  %v3494_v63 = vld [vmem:[#allocation2 + $0x284] sm:$0xf0] }
  0x41   :  { %2589 = vmatpush.bf16.msrb.mxu1 %v4389_v33  ;;  %2614 = vmatpush.bf16.msrb.mxu3 %v3301_v36  ;;  %v3186_v33 = vld [vmem:[#allocation2 + $0x1c] sm:$0xf0]  ;;  %v5023_v36 = vld [vmem:[#allocation2 + $0x88c] sm:$0xf]  ;;  %v5009_v0 = vld [vmem:[#allocation2 + $0x81c] sm:$0xf]  ;;  %v3497_v7 = vor.u32 %v4827_v59, %v3494_v63 }
  0x42   :  { %v3189_v41 = vor.u32 %v4750_v32, %v3186_v33  ;;  %v4281_v46 = vor.u32 %v5023_v36, %v4278_v37  ;;  %v4222_v1 = vld [vmem:[#allocation2 + $0x834] sm:$0xf0]  ;;  %v3942_v4 = vld [vmem:[#allocation2 + $0x604] sm:$0xf0]  ;;  %v4883_v5 = vld [vmem:[#allocation2 + $0x42c] sm:$0xf] }
  0x43   :  { %2577 = vmatpush.bf16.msrb.mxu0 %v4137_v39  ;;  %v4953_v39 = vld [vmem:[#allocation2 + $0x65c] sm:$0xf]  ;;  %v4820_v8 = vld [vmem:[#allocation2 + $0x234] sm:$0xf]  ;;  %v4225_v9 = vor.u32 %v5009_v0, %v4222_v1  ;;  %v5002_v12 = vld [vmem:[#allocation2 + $0x7e4] sm:$0xf] }
  0x44   :  { %2603 = vmatpush.bf16.msrb.mxu2 %v4585_v42  ;;  %v4897_v42 = vld [vmem:[#allocation2 + $0x49c] sm:$0xf]  ;;  %v4001_v48 = vor.u32 %v4953_v39, %v3998_v40  ;;  %v4194_v13 = vld [vmem:[#allocation2 + $0x7fc] sm:$0xf0]  ;;  %v3914_v17 = vld [vmem:[#allocation2 + $0x5cc] sm:$0xf0] }
  0x45   :  { %2590 = vmatpush.bf16.msrb.mxu1 %v4361_v45  ;;  %2615 = vmatpush.bf16.msrb.mxu3 %v3273_v49  ;;  %v4834_v45 = vld [vmem:[#allocation2 + $0x2a4] sm:$0xf]  ;;  %v3522_v49 = vld [vmem:[#allocation2 + $0x2bc] sm:$0xf0]  ;;  %v4876_v18 = vld [vmem:[#allocation2 + $0x3f4] sm:$0xf]  ;;  %v4197_v23 = vor.u32 %v5002_v12, %v4194_v13 }
  0x46   :  { %v3525_v58 = vor.u32 %v4834_v45, %v3522_v49  ;;  %v4995_v27 = vld [vmem:[#allocation2 + $0x7ac] sm:$0xf]  ;;  %v4166_v28 = vld [vmem:[#allocation2 + $0x7c4] sm:$0xf0]  ;;  %v4925_v31 = vld [vmem:[#allocation2 + $0x57c] sm:$0xf] }
  0x47   :  { %2578 = vmatpush.bf16.msrb.mxu0 %v4109_v52  ;;  %v3777_v52 = vor.u32 %v4897_v42, %v3774_v43  ;;  %v3886_v32 = vld [vmem:[#allocation2 + $0x594] sm:$0xf0]  ;;  %v4869_v33 = vld [vmem:[#allocation2 + $0x3bc] sm:$0xf]  ;;  %v4806_v36 = vld [vmem:[#allocation2 + $0x1c4] sm:$0xf] }
  0x48   :  { %2604 = vmatpush.bf16.msrb.mxu2 %v4557_v57  ;;  %v3746_v57 = vld [vmem:[#allocation2 + $0x47c] sm:$0xf0]  ;;  %v5079_v39 = vld [vmem:[#allocation2 + $0xa4c] sm:$0xf]  ;;  %v3889_v40 = vor.u32 %v4925_v31, %v3886_v32  ;;  %v4988_v42 = vld [vmem:[#allocation2 + $0x774] sm:$0xf] }
  0x49   :  { %2591 = vmatpush.bf16.msrb.mxu1 %v4333_v62  ;;  %2616 = vmatpush.bf16.msrb.mxu3 %v3245_v3  ;;  %v3973_v62 = vor.u32 %v4946_v53, %v3970_v54  ;;  %v3749_v2 = vor.u32 %v4890_v56, %v3746_v57  ;;  %v4939_v3 = vld [vmem:[#allocation2 + $0x5ec] sm:$0xf]  ;;  %v3410_v37 = vld [vmem:[#allocation2 + $0x1dc] sm:$0xf0]  ;;  %v4138_v43 = vld [vmem:[#allocation2 + $0x78c] sm:$0xf0] }
  0x4a   :  { %v4918_v45 = vld [vmem:[#allocation2 + $0x544] sm:$0xf]  ;;  %v4803_v49 = vld [vmem:[#allocation2 + $0x1a8] sm:$0xf0]  ;;  %v3634_v51 = vld [vmem:[#allocation2 + $0x39c] sm:$0xf0]  ;;  %v4141_v53 = vor.u32 %v4988_v42, %v4138_v43 }
  0x4b   :  { %2579 = vmatpush.bf16.msrb.mxu0 %v4081_v6  ;;  %v3718_v6 = vld [vmem:[#allocation2 + $0x444] sm:$0xf0]  ;;  %v4862_v50 = vld [vmem:[#allocation2 + $0x384] sm:$0xf]  ;;  %v5135_v54 = vld [vmem:[#allocation2 + $0xc0c] sm:$0xf] }
  0x4c   :  { %2605 = vmatpush.bf16.msrb.mxu2 %v4529_v11  ;;  %v3466_v11 = vld [vmem:[#allocation2 + $0x24c] sm:$0xf0]  ;;  %v3721_v15 = vor.u32 %v4883_v5, %v3718_v6  ;;  %v4726_v56 = vld [vmem:[#allocation2 + $0xc24] sm:$0xf0]  ;;  %v4981_v59 = vld [vmem:[#allocation2 + $0x73c] sm:$0xf]  ;;  %v3637_v1 = vor.u32 %v4862_v50, %v3634_v51 }
  0x4d   :  { %2592 = vmatpush.bf16.msrb.mxu1 %v4305_v19  ;;  %2617 = vmatpush.bf16.msrb.mxu3 %v3217_v26  ;;  %v3690_v19 = vld [vmem:[#allocation2 + $0x40c] sm:$0xf0]  ;;  %v3469_v20 = vor.u32 %v4820_v8, %v3466_v11  ;;  %v3438_v26 = vld [vmem:[#allocation2 + $0x214] sm:$0xf0]  ;;  %v5072_v63 = vld [vmem:[#allocation2 + $0xa14] sm:$0xf] }
  0x4e   :  { %2580 = vmatmul.bf16.vlgmr.msrb.gmra.mxu0 %v5263_v21  ;;  %v4474_v0 = vld [vmem:[#allocation2 + $0xa2c] sm:$0xf0]  ;;  %v5128_v6 = vld [vmem:[#allocation2 + $0xbd4] sm:$0xf]  ;;  %v4082_v11 = vld [vmem:[#allocation2 + $0x71c] sm:$0xf0] }
  0x4f   :  { %2624 = vmatpush.bf16.msra.mxu0 %v3609_v10  ;;  %2606 = vmatmul.bf16.vlgmr.msrb.gmra.mxu2 %v5265_v25  ;;  %v3945_v10 = vor.u32 %v4939_v3, %v3942_v4  ;;  %v3360_v3 = vld [vmem:[#allocation2 + $0x158] sm:$0xf]  ;;  %v4796_v4 = vld [vmem:[#allocation2 + $0x170] sm:$0xf0]  ;;  %v4477_v8 = vor.u32 %v5072_v63, %v4474_v0  ;;  %v4390_v42 = vld [vmem:[#allocation2 + $0x984] sm:$0xf0] }
  0x50   :  { %2650 = vmatpush.bf16.msra.mxu2 %v4057_v16  ;;  %2593 = vmatmul.bf16.vlgmr.msrb.gmra.mxu1 %v5267_v30  ;;  %v4932_v16 = vld [vmem:[#allocation2 + $0x5b4] sm:$0xf]  ;;  %v3361_v12 = vor.u32 %v4796_v4, %v3360_v3  ;;  %v4446_v13 = vld [vmem:[#allocation2 + $0x9f4] sm:$0xf0]  ;;  %v3556_v43 = vld [vmem:[#allocation2 + $0x2e0] sm:$0xf] }
  0x51   :  { %2637 = vmatpush.bf16.msra.mxu1 %v3833_v22  ;;  %2618 = vmatpush.bf16.msrb.mxu3 %v3189_v41  ;;  %v4813_v22 = vld [vmem:[#allocation2 + $0x1fc] sm:$0xf]  ;;  %v3917_v24 = vor.u32 %v4932_v16, %v3914_v17  ;;  %v4502_v41 = vld [vmem:[#allocation2 + $0xa64] sm:$0xf0]  ;;  %v4859_v16 = vld [vmem:[#allocation2 + $0x368] sm:$0xf0] }
  0x52   :  { %v3441_v35 = vor.u32 %v4813_v22, %v3438_v26  ;;  %v4505_v57 = vor.u32 %v5079_v39, %v4502_v41  ;;  %v5121_v22 = vld [vmem:[#allocation2 + $0xb9c] sm:$0xf]  ;;  %v5058_v26 = vld [vmem:[#allocation2 + $0x9a4] sm:$0xf]  ;;  %v3584_v31 = vld [vmem:[#allocation2 + $0x318] sm:$0xf] }
  0x53   :  { %2625 = vmatpush.bf16.msra.mxu0 %v3581_v29  ;;  %v3693_v29 = vor.u32 %v4876_v18, %v3690_v19  ;;  %v3332_v18 = vld [vmem:[#allocation2 + $0x120] sm:$0xf]  ;;  %v4789_v19 = vld [vmem:[#allocation2 + $0x138] sm:$0xf0]  ;;  %v4852_v32 = vld [vmem:[#allocation2 + $0x330] sm:$0xf0] }
  0x54   :  { %2651 = vmatpush.bf16.msra.mxu2 %v4029_v34  ;;  %2619 = vmatmul.bf16.vlgmr.msrb.gmra.mxu3 %v5253_v55  ;;  %v3662_v34 = vld [vmem:[#allocation2 + $0x3d4] sm:$0xf0]  ;;  %v5051_v39 = vld [vmem:[#allocation2 + $0x96c] sm:$0xf]  ;;  %v4614_v50 = vld [vmem:[#allocation2 + $0xb44] sm:$0xf0] }
  0x55   :  { %2638 = vmatpush.bf16.msra.mxu1 %v3805_v38  ;;  %2663 = vmatpush.bf16.msra.mxu3 %v4281_v46  ;;  %v4169_v38 = vor.u32 %v4995_v27, %v4166_v28  ;;  %v3858_v46 = vld [vmem:[#allocation2 + $0x55c] sm:$0xf0]  ;;  %v3333_v28 = vor.u32 %v4789_v19, %v3332_v18  ;;  %v4393_v51 = vor.u32 %v5051_v39, %v4390_v42  ;;  %v5100_v63 = vld [vmem:[#allocation2 + $0xaf4] sm:$0xf]  ;;  %v4586_v0 = vld [vmem:[#allocation2 + $0xb0c] sm:$0xf0] }
  0x56   :  { %v3836_v18 = vld [vmem:[#allocation2 + $0x510] sm:$0xf]  ;;  %v3444_v39 = vld [vmem:[#allocation2 + $0x200] sm:$0xf]  ;;  %v3808_v42 = vld [vmem:[#allocation2 + $0x4d8] sm:$0xf] }
  0x57   :  { %2626 = vmatpush.bf16.msra.mxu0 %v3553_v44  ;;  %v3665_v44 = vor.u32 %v4869_v33, %v3662_v34  ;;  %v3304_v34 = vld [vmem:[#allocation2 + $0xe8] sm:$0xf] }
  0x58   :  { %2652 = vmatpush.bf16.msra.mxu2 %v4001_v48  ;;  %v3388_v48 = vld [vmem:[#allocation2 + $0x190] sm:$0xf] }
  0x59   :  { %2639 = vmatpush.bf16.msra.mxu1 %v3777_v52  ;;  %2664 = vmatpush.bf16.msra.mxu3 %v4253_v60  ;;  %v3413_v52 = vor.u32 %v4806_v36, %v3410_v37  ;;  %v4110_v60 = vld [vmem:[#allocation2 + $0x754] sm:$0xf0]  ;;  %v5114_v36 = vld [vmem:[#allocation2 + $0xb64] sm:$0xf]  ;;  %v4642_v37 = vld [vmem:[#allocation2 + $0xb7c] sm:$0xf0] }
  0x5a   :  { %v4113_v5 = vor.u32 %v4981_v59, %v4110_v60  ;;  %v3248_v60 = vld [vmem:[#allocation2 + $0x78] sm:$0xf] }
  0x5b   :  { %2627 = vmatpush.bf16.msra.mxu0 %v3525_v58  ;;  %v3861_v58 = vor.u32 %v4918_v45, %v3858_v46  ;;  %v4645_v45 = vor.u32 %v5114_v36, %v4642_v37  ;;  %v3276_v46 = vld [vmem:[#allocation2 + $0xb0] sm:$0xf]  ;;  %v4971_v36 = vld [vmem:[#allocation2 + $0x6e8] sm:$0xf0] }
  0x5c   :  { %2653 = vmatpush.bf16.msra.mxu2 %v3973_v62  ;;  %v3389_v62 = vor.u32 %v4803_v49, %v3388_v48  ;;  %v4775_v48 = vld [vmem:[#allocation2 + $0xc8] sm:$0xf0] }
  0x5d   :  { %2640 = vmatpush.bf16.msra.mxu1 %v3749_v2  ;;  %2665 = vmatpush.bf16.msra.mxu3 %v4225_v9  ;;  %v4729_v2 = vor.u32 %v5135_v54, %v4726_v56  ;;  %v5065_v9 = vld [vmem:[#allocation2 + $0x9dc] sm:$0xf]  ;;  %v5107_v49 = vld [vmem:[#allocation2 + $0xb2c] sm:$0xf]  ;;  %v3277_v54 = vor.u32 %v4775_v48, %v3276_v46  ;;  %v4362_v56 = vld [vmem:[#allocation2 + $0x94c] sm:$0xf0] }
  0x5e   :  { %v4617_v59 = vor.u32 %v5107_v49, %v4614_v50  ;;  %v4256_v46 = vld [vmem:[#allocation2 + $0x858] sm:$0xf]  ;;  %v5020_v48 = vld [vmem:[#allocation2 + $0x870] sm:$0xf0] }
  0x5f   :  { %2628 = vmatpush.bf16.msra.mxu0 %v3497_v7  ;;  %v4698_v7 = vld [vmem:[#allocation2 + $0xbec] sm:$0xf0]  ;;  %v4032_v50 = vld [vmem:[#allocation2 + $0x698] sm:$0xf] }
  0x60   :  { %2654 = vmatpush.bf16.msra.mxu2 %v3945_v10  ;;  %v4974_v10 = vld [vmem:[#allocation2 + $0x704] sm:$0xf]  ;;  %v4701_v17 = vor.u32 %v5128_v6, %v4698_v7  ;;  %v3500_v6 = vld [vmem:[#allocation2 + $0x270] sm:$0xf]  ;;  %v4831_v7 = vld [vmem:[#allocation2 + $0x288] sm:$0xf0] }
  0x61   :  { %2641 = vmatpush.bf16.msra.mxu1 %v3721_v15  ;;  %2666 = vmatpush.bf16.msra.mxu3 %v4197_v23  ;;  %v3612_v15 = vld [vmem:[#allocation2 + $0x350] sm:$0xf]  ;;  %v4670_v23 = vld [vmem:[#allocation2 + $0xbb4] sm:$0xf0] }
  0x62   :  { %v3613_v27 = vor.u32 %v4859_v16, %v3612_v15  ;;  %v4673_v33 = vor.u32 %v5121_v22, %v4670_v23  ;;  %v5030_v15 = vld [vmem:[#allocation2 + $0x8c4] sm:$0xf]  ;;  %v4306_v16 = vld [vmem:[#allocation2 + $0x8dc] sm:$0xf0]  ;;  %v3472_v22 = vld [vmem:[#allocation2 + $0x238] sm:$0xf] }
  0x63   :  { %2629 = vmatpush.bf16.msra.mxu0 %v3469_v20  ;;  %v4085_v20 = vor.u32 %v4974_v10, %v4082_v11  ;;  %v4761_v10 = vld [vmem:[#allocation2 + $0x58] sm:$0xf0]  ;;  %v4824_v23 = vld [vmem:[#allocation2 + $0x250] sm:$0xf0] }
  0x64   :  { %2655 = vmatpush.bf16.msra.mxu2 %v3917_v24  ;;  %v4449_v24 = vor.u32 %v5065_v9, %v4446_v13  ;;  %v3220_v9 = vld [vmem:[#allocation2 + $0x40] sm:$0xf]  ;;  %v5093_v11 = vld [vmem:[#allocation2 + $0xabc] sm:$0xf] }
  0x65   :  { %2642 = vmatpush.bf16.msra.mxu1 %v3693_v29  ;;  %2667 = vmatpush.bf16.msra.mxu3 %v4169_v38  ;;  %v4418_v29 = vld [vmem:[#allocation2 + $0x9bc] sm:$0xf0]  ;;  %v3221_v19 = vor.u32 %v4761_v10, %v3220_v9  ;;  %v4480_v9 = vld [vmem:[#allocation2 + $0xa18] sm:$0xf]  ;;  %v5076_v10 = vld [vmem:[#allocation2 + $0xa30] sm:$0xf0] }
  0x66   :  { %v4421_v38 = vor.u32 %v5058_v26, %v4418_v29  ;;  %v3192_v26 = vld [vmem:[#allocation2 + $0x8] sm:$0xf]  ;;  %v5027_v29 = vld [vmem:[#allocation2 + $0x8a8] sm:$0xf0] }
  0x67   :  { %2630 = vmatpush.bf16.msra.mxu0 %v3441_v35  ;;  %v4782_v35 = vld [vmem:[#allocation2 + $0x100] sm:$0xf0] }
  0x68   :  { %2656 = vmatpush.bf16.msra.mxu2 %v3889_v40  ;;  %v3585_v40 = vor.u32 %v4852_v32, %v3584_v31  ;;  %v3305_v41 = vor.u32 %v4782_v35, %v3304_v34  ;;  %v5086_v31 = vld [vmem:[#allocation2 + $0xa84] sm:$0xf]  ;;  %v4530_v32 = vld [vmem:[#allocation2 + $0xa9c] sm:$0xf0]  ;;  %v3473_v34 = vor.u32 %v4824_v23, %v3472_v22  ;;  %v4060_v35 = vld [vmem:[#allocation2 + $0x6d0] sm:$0xf] }
  0x69   :  { %2643 = vmatpush.bf16.msra.mxu1 %v3665_v44  ;;  %2668 = vmatpush.bf16.msra.mxu3 %v4141_v53  ;;  %v4845_v44 = vld [vmem:[#allocation2 + $0x2f8] sm:$0xf0]  ;;  %v4887_v22 = vld [vmem:[#allocation2 + $0x448] sm:$0xf0]  ;;  %v4452_v23 = vld [vmem:[#allocation2 + $0x9e0] sm:$0xf] }
  0x6a   :  { %v3557_v53 = vor.u32 %v4845_v44, %v3556_v43  ;;  %v4908_v43 = vld [vmem:[#allocation2 + $0x4f0] sm:$0xf0]  ;;  %v4533_v44 = vor.u32 %v5086_v31, %v4530_v32  ;;  %v4943_v31 = vld [vmem:[#allocation2 + $0x608] sm:$0xf0] }
  0x6b   :  { %2631 = vmatpush.bf16.msra.mxu0 %v3413_v52  ;;  %v5044_v52 = vld [vmem:[#allocation2 + $0x934] sm:$0xf] }
  0x6c   :  { %2657 = vmatpush.bf16.msra.mxu2 %v3861_v58  ;;  %v4838_v58 = vld [vmem:[#allocation2 + $0x2c0] sm:$0xf0] }
  0x6d   :  { %2644 = vmatpush.bf16.msra.mxu1 %v3637_v1  ;;  %2669 = vmatpush.bf16.msra.mxu3 %v4113_v5  ;;  %v4365_v1 = vor.u32 %v5044_v52, %v4362_v56  ;;  %v4334_v5 = vld [vmem:[#allocation2 + $0x914] sm:$0xf0]  ;;  %v3809_v52 = vor.u32 %v4908_v43, %v3808_v42  ;;  %v4810_v56 = vld [vmem:[#allocation2 + $0x1e0] sm:$0xf0]  ;;  %v4936_v43 = vld [vmem:[#allocation2 + $0x5d0] sm:$0xf0] }
  0x6e   :  { %2632 = vmatmul.bf16.vlgmr.msra.gmra.mxu0 %v5255_v61  ;;  %v3920_v42 = vld [vmem:[#allocation2 + $0x5b8] sm:$0xf] }
  0x6f   :  { %2676 = vmatpush.bf16.msrb.mxu0 %v4505_v57  ;;  %2658 = vmatmul.bf16.vlgmr.msra.gmra.mxu2 %v5260_v14  ;;  %v3528_v57 = vld [vmem:[#allocation2 + $0x2a8] sm:$0xf] }
  0x70   :  { %2702 = vmatpush.bf16.msrb.mxu2 %v3389_v62  ;;  %2645 = vmatmul.bf16.vlgmr.msra.gmra.mxu1 %v5251_v47  ;;  %v4768_v62 = vld [vmem:[#allocation2 + $0x90] sm:$0xf0]  ;;  %v3529_v3 = vor.u32 %v4838_v58, %v3528_v57  ;;  %v4257_v57 = vor.u32 %v5020_v48, %v4256_v46  ;;  %v4901_v58 = vld [vmem:[#allocation2 + $0x4b8] sm:$0xf0] }
  0x71   :  { %2689 = vmatpush.bf16.msrb.mxu1 %v4729_v2  ;;  %2670 = vmatpush.bf16.msra.mxu3 %v4085_v20  ;;  %v5037_v2 = vld [vmem:[#allocation2 + $0x8fc] sm:$0xf]  ;;  %v3249_v4 = vor.u32 %v4768_v62, %v3248_v60  ;;  %v4915_v20 = vld [vmem:[#allocation2 + $0x528] sm:$0xf0] }
  0x72   :  { %v4337_v13 = vor.u32 %v5037_v2, %v4334_v5  ;;  %v3837_v37 = vor.u32 %v4915_v20, %v3836_v18  ;;  %v5083_v60 = vld [vmem:[#allocation2 + $0xa68] sm:$0xf0]  ;;  %v4004_v2 = vld [vmem:[#allocation2 + $0x660] sm:$0xf]  ;;  %v3752_v5 = vld [vmem:[#allocation2 + $0x468] sm:$0xf] }
  0x73   :  { %2677 = vmatpush.bf16.msrb.mxu0 %v4477_v8  ;;  %v4589_v8 = vor.u32 %v5100_v63, %v4586_v0  ;;  %v4228_v63 = vld [vmem:[#allocation2 + $0x820] sm:$0xf]  ;;  %v5013_v0 = vld [vmem:[#allocation2 + $0x838] sm:$0xf0]  ;;  %v3724_v18 = vld [vmem:[#allocation2 + $0x430] sm:$0xf] }
  0x74   :  { %2703 = vmatpush.bf16.msrb.mxu2 %v3361_v12  ;;  %2671 = vmatmul.bf16.vlgmr.msra.gmra.mxu3 %v5263_v21  ;;  %v4558_v12 = vld [vmem:[#allocation2 + $0xad4] sm:$0xf0]  ;;  %v3725_v32 = vor.u32 %v4887_v22, %v3724_v18  ;;  %v4340_v18 = vld [vmem:[#allocation2 + $0x900] sm:$0xf] }
  0x75   :  { %2690 = vmatpush.bf16.msrb.mxu1 %v4701_v17  ;;  %2715 = vmatpush.bf16.msrb.mxu3 %v3613_v27  ;;  %v3501_v17 = vor.u32 %v4831_v7, %v3500_v6  ;;  %v4754_v27 = vld [vmem:[#allocation2 + $0x20] sm:$0xf0]  ;;  %v4229_v7 = vor.u32 %v5013_v0, %v4228_v63  ;;  %v4732_v63 = vld [vmem:[#allocation2 + $0xc10] sm:$0xf]  ;;  %v4704_v22 = vld [vmem:[#allocation2 + $0xbd8] sm:$0xf] }
  0x77   :  { %2678 = vmatpush.bf16.msrb.mxu0 %v4449_v24  ;;  %v4561_v24 = vor.u32 %v5093_v11, %v4558_v12  ;;  %v4200_v12 = vld [vmem:[#allocation2 + $0x7e8] sm:$0xf] }
  0x78   :  { %2704 = vmatpush.bf16.msrb.mxu2 %v3333_v28  ;;  %v4284_v28 = vld [vmem:[#allocation2 + $0x890] sm:$0xf] }
  0x79   :  { %2691 = vmatpush.bf16.msrb.mxu1 %v4673_v33  ;;  %2716 = vmatpush.bf16.msrb.mxu3 %v3585_v40  ;;  %v4309_v33 = vor.u32 %v5030_v15, %v4306_v16  ;;  %v4817_v40 = vld [vmem:[#allocation2 + $0x218] sm:$0xf0]  ;;  %v3976_v15 = vld [vmem:[#allocation2 + $0x628] sm:$0xf]  ;;  %v4950_v16 = vld [vmem:[#allocation2 + $0x640] sm:$0xf0] }
  0x7a   :  { %v3445_v49 = vor.u32 %v4817_v40, %v3444_v39  ;;  %v4144_v40 = vld [vmem:[#allocation2 + $0x778] sm:$0xf] }
  0x7b   :  { %2679 = vmatpush.bf16.msrb.mxu0 %v4421_v38  ;;  %v3193_v38 = vor.u32 %v4754_v27, %v3192_v26  ;;  %v3977_v26 = vor.u32 %v4950_v16, %v3976_v15  ;;  %v4172_v27 = vld [vmem:[#allocation2 + $0x7b0] sm:$0xf] }
  0x7c   :  { %2705 = vmatpush.bf16.msrb.mxu2 %v3305_v41  ;;  %v4285_v41 = vor.u32 %v5027_v29, %v4284_v28  ;;  %v4999_v28 = vld [vmem:[#allocation2 + $0x7c8] sm:$0xf0]  ;;  %v3948_v29 = vld [vmem:[#allocation2 + $0x5f0] sm:$0xf] }
  0x7d   :  { %2692 = vmatpush.bf16.msrb.mxu1 %v4645_v45  ;;  %2717 = vmatpush.bf16.msrb.mxu3 %v3557_v53  ;;  %v4061_v45 = vor.u32 %v4971_v36, %v4060_v35  ;;  %v3780_v53 = vld [vmem:[#allocation2 + $0x4a0] sm:$0xf]  ;;  %v4173_v35 = vor.u32 %v4999_v28, %v4172_v27  ;;  %v4880_v36 = vld [vmem:[#allocation2 + $0x410] sm:$0xf0]  ;;  %v3949_v39 = vor.u32 %v4943_v31, %v3948_v29  ;;  %v3390_v15 = vld [vmem:[#allocation2 + $0x1ac] sm:$0xf0] }
  0x7e   :  { %v4849_v27 = vld [vmem:[#allocation2 + $0x31c] sm:$0xf]  ;;  %v3586_v28 = vld [vmem:[#allocation2 + $0x334] sm:$0xf0] }
  0x7f   :  { %2680 = vmatpush.bf16.msrb.mxu0 %v4393_v51  ;;  %v4964_v51 = vld [vmem:[#allocation2 + $0x6b0] sm:$0xf0]  ;;  %v4793_v31 = vld [vmem:[#allocation2 + $0x15c] sm:$0xf] }
  0x80   :  { %2706 = vmatpush.bf16.msrb.mxu2 %v3277_v54  ;;  %v3416_v54 = vld [vmem:[#allocation2 + $0x1c8] sm:$0xf]  ;;  %v4033_v62 = vor.u32 %v4964_v51, %v4032_v50  ;;  %v4396_v50 = vld [vmem:[#allocation2 + $0x970] sm:$0xf]  ;;  %v5055_v51 = vld [vmem:[#allocation2 + $0x988] sm:$0xf0] }
  0x81   :  { %2693 = vmatpush.bf16.msrb.mxu1 %v4617_v59  ;;  %2718 = vmatpush.bf16.msrb.mxu3 %v3529_v3  ;;  %v4508_v59 = vld [vmem:[#allocation2 + $0xa50] sm:$0xf]  ;;  %v4957_v3 = vld [vmem:[#allocation2 + $0x678] sm:$0xf0] }
  0x82   :  { %v4509_v6 = vor.u32 %v5083_v60, %v4508_v59  ;;  %v4005_v11 = vor.u32 %v4957_v3, %v4004_v2  ;;  %v3640_v59 = vld [vmem:[#allocation2 + $0x388] sm:$0xf]  ;;  %v4866_v60 = vld [vmem:[#allocation2 + $0x3a0] sm:$0xf0]  ;;  %v4368_v2 = vld [vmem:[#allocation2 + $0x938] sm:$0xf] }
  0x83   :  { %2681 = vmatpush.bf16.msrb.mxu0 %v4365_v1  ;;  %v3417_v1 = vor.u32 %v4810_v56, %v3416_v54  ;;  %v4985_v54 = vld [vmem:[#allocation2 + $0x758] sm:$0xf0]  ;;  %v3892_v56 = vld [vmem:[#allocation2 + $0x580] sm:$0xf]  ;;  %v5048_v3 = vld [vmem:[#allocation2 + $0x950] sm:$0xf0] }
  0x84   :  { %2707 = vmatpush.bf16.msrb.mxu2 %v3249_v4  ;;  %v3781_v4 = vor.u32 %v4901_v58, %v3780_v53  ;;  %v4116_v53 = vld [vmem:[#allocation2 + $0x740] sm:$0xf] }
  0x85   :  { %2694 = vmatpush.bf16.msrb.mxu1 %v4589_v8  ;;  %2719 = vmatpush.bf16.msrb.mxu3 %v3501_v17  ;;  %v4894_v8 = vld [vmem:[#allocation2 + $0x480] sm:$0xf0]  ;;  %v4117_v0 = vor.u32 %v4985_v54, %v4116_v53  ;;  %v4905_v53 = vld [vmem:[#allocation2 + $0x4dc] sm:$0xf]  ;;  %v3810_v54 = vld [vmem:[#allocation2 + $0x4f4] sm:$0xf0] }
  0x86   :  { %v3753_v17 = vor.u32 %v4894_v8, %v3752_v5  ;;  %v4088_v5 = vld [vmem:[#allocation2 + $0x708] sm:$0xf]  ;;  %v3614_v8 = vld [vmem:[#allocation2 + $0x36c] sm:$0xf0] }
  0x87   :  { %2682 = vmatpush.bf16.msrb.mxu0 %v4337_v13  ;;  %v5006_v13 = vld [vmem:[#allocation2 + $0x800] sm:$0xf0] }
  0x88   :  { %2708 = vmatpush.bf16.msrb.mxu2 %v3221_v19  ;;  %v4481_v19 = vor.u32 %v5076_v10, %v4480_v9  ;;  %v4201_v20 = vor.u32 %v5006_v13, %v4200_v12  ;;  %v3864_v9 = vld [vmem:[#allocation2 + $0x548] sm:$0xf]  ;;  %v4922_v10 = vld [vmem:[#allocation2 + $0x560] sm:$0xf0]  ;;  %v4369_v12 = vor.u32 %v5048_v3, %v4368_v2  ;;  %v4800_v13 = vld [vmem:[#allocation2 + $0x194] sm:$0xf] }
  0x89   :  { %2695 = vmatpush.bf16.msrb.mxu1 %v4561_v24  ;;  %2720 = vmatpush.bf16.msrb.mxu3 %v3473_v34  ;;  %v5069_v24 = vld [vmem:[#allocation2 + $0x9f8] sm:$0xf0]  ;;  %v5111_v2 = vld [vmem:[#allocation2 + $0xb48] sm:$0xf0]  ;;  %v4898_v3 = vld [vmem:[#allocation2 + $0x4a4] sm:$0xf] }
  0x8a   :  { %v4453_v34 = vor.u32 %v5069_v24, %v4452_v23  ;;  %v5132_v23 = vld [vmem:[#allocation2 + $0xbf0] sm:$0xf0]  ;;  %v3865_v24 = vor.u32 %v4922_v10, %v3864_v9  ;;  %v3278_v9 = vld [vmem:[#allocation2 + $0xcc] sm:$0xf0] }
  0x8b   :  { %2683 = vmatpush.bf16.msrb.mxu0 %v4309_v33  ;;  %v3696_v33 = vld [vmem:[#allocation2 + $0x3f8] sm:$0xf] }
  0x8c   :  { %2709 = vmatpush.bf16.msrb.mxu2 %v3193_v38  ;;  %v5062_v38 = vld [vmem:[#allocation2 + $0x9c0] sm:$0xf0] }
  0x8d   :  { %2696 = vmatpush.bf16.msrb.mxu1 %v4533_v44  ;;  %2721 = vmatpush.bf16.msrb.mxu3 %v3445_v49  ;;  %v3697_v44 = vor.u32 %v4880_v36, %v3696_v33  ;;  %v4873_v49 = vld [vmem:[#allocation2 + $0x3d8] sm:$0xf0]  ;;  %v4705_v33 = vor.u32 %v5132_v23, %v4704_v22  ;;  %v5034_v36 = vld [vmem:[#allocation2 + $0x8e0] sm:$0xf0]  ;;  %v3474_v23 = vld [vmem:[#allocation2 + $0x254] sm:$0xf0] }
  0x8e   :  { %2684 = vmatmul.bf16.vlgmr.msrb.gmra.mxu0 %v5267_v30  ;;  %v4821_v22 = vld [vmem:[#allocation2 + $0x23c] sm:$0xf] }
  0x8f   :  { %2728 = vmatpush.bf16.msra.mxu0 %v3837_v37  ;;  %2710 = vmatmul.bf16.vlgmr.msrb.gmra.mxu2 %v5253_v55  ;;  %v4424_v37 = vld [vmem:[#allocation2 + $0x9a8] sm:$0xf] }
  0x90   :  { %2754 = vmatpush.bf16.msra.mxu2 %v4285_v41  ;;  %2697 = vmatmul.bf16.vlgmr.msrb.gmra.mxu1 %v5265_v25  ;;  %v4992_v41 = vld [vmem:[#allocation2 + $0x790] sm:$0xf0]  ;;  %v4425_v46 = vor.u32 %v5062_v38, %v4424_v37  ;;  %v3589_v37 = vor.u32 %v4849_v27, %v3586_v28  ;;  %v5125_v38 = vld [vmem:[#allocation2 + $0xbb8] sm:$0xf0]  ;;  %v4564_v28 = vld [vmem:[#allocation2 + $0xac0] sm:$0xf] }
  0x91   :  { %2741 = vmatpush.bf16.msra.mxu1 %v4061_v45  ;;  %2722 = vmatpush.bf16.msrb.mxu3 %v3417_v1  ;;  %v3668_v45 = vld [vmem:[#allocation2 + $0x3c0] sm:$0xf]  ;;  %v4145_v48 = vor.u32 %v4992_v41, %v4144_v40  ;;  %v5139_v1 = vld [vmem:[#allocation2 + $0xc28] sm:$0xf0]  ;;  %v3838_v40 = vld [vmem:[#allocation2 + $0x52c] sm:$0xf0] }
  0x92   :  { %v3669_v58 = vor.u32 %v4873_v49, %v3668_v45  ;;  %v4733_v16 = vor.u32 %v5139_v1, %v4732_v63  ;;  %v4786_v45 = vld [vmem:[#allocation2 + $0x124] sm:$0xf]  ;;  %v4648_v49 = vld [vmem:[#allocation2 + $0xb68] sm:$0xf]  ;;  %v4620_v63 = vld [vmem:[#allocation2 + $0xb30] sm:$0xf] }
  0x93   :  { %2729 = vmatpush.bf16.msra.mxu0 %v3809_v52  ;;  %v3921_v52 = vor.u32 %v4936_v43, %v3920_v42  ;;  %v4842_v42 = vld [vmem:[#allocation2 + $0x2e4] sm:$0xf]  ;;  %v3558_v43 = vld [vmem:[#allocation2 + $0x2fc] sm:$0xf0]  ;;  %v4621_v10 = vor.u32 %v5111_v2, %v4620_v63 }
  0x94   :  { %2755 = vmatpush.bf16.msra.mxu2 %v4257_v57  ;;  %2723 = vmatmul.bf16.vlgmr.msrb.gmra.mxu3 %v5255_v61  ;;  %v4929_v57 = vld [vmem:[#allocation2 + $0x598] sm:$0xf0] }
  0x95   :  { %2742 = vmatpush.bf16.msra.mxu1 %v4033_v62  ;;  %2767 = vmatpush.bf16.msra.mxu3 %v4509_v6  ;;  %v4397_v62 = vor.u32 %v5055_v51, %v4396_v50  ;;  %v4978_v6 = vld [vmem:[#allocation2 + $0x720] sm:$0xf0]  ;;  %v3561_v51 = vor.u32 %v4842_v42, %v3558_v43  ;;  %v4536_v42 = vld [vmem:[#allocation2 + $0xa88] sm:$0xf] }
  0x96   :  { %v5090_v43 = vld [vmem:[#allocation2 + $0xaa0] sm:$0xf0] }
  0x97   :  { %2730 = vmatpush.bf16.msra.mxu0 %v3781_v4  ;;  %v3893_v4 = vor.u32 %v4929_v57, %v3892_v56  ;;  %v4835_v57 = vld [vmem:[#allocation2 + $0x2ac] sm:$0xf] }
  0x98   :  { %2756 = vmatpush.bf16.msra.mxu2 %v4229_v7  ;;  %v4856_v7 = vld [vmem:[#allocation2 + $0x354] sm:$0xf] }
  0x99   :  { %2743 = vmatpush.bf16.msra.mxu1 %v4005_v11  ;;  %2768 = vmatpush.bf16.msra.mxu3 %v4481_v19  ;;  %v3641_v11 = vor.u32 %v4866_v60, %v3640_v59  ;;  %v5041_v19 = vld [vmem:[#allocation2 + $0x918] sm:$0xf0]  ;;  %v4779_v59 = vld [vmem:[#allocation2 + $0xec] sm:$0xf]  ;;  %v3306_v60 = vld [vmem:[#allocation2 + $0x104] sm:$0xf0] }
  0x9a   :  { %v4341_v29 = vor.u32 %v5041_v19, %v4340_v18  ;;  %v3754_v18 = vld [vmem:[#allocation2 + $0x484] sm:$0xf0] }
  0x9b   :  { %2731 = vmatpush.bf16.msra.mxu0 %v3753_v17  ;;  %v4089_v17 = vor.u32 %v4978_v6, %v4088_v5  ;;  %v3309_v5 = vor.u32 %v4779_v59, %v3306_v60  ;;  %v4828_v6 = vld [vmem:[#allocation2 + $0x274] sm:$0xf]  ;;  %v4751_v59 = vld [vmem:[#allocation2 + $0xc] sm:$0xf]  ;;  %v3194_v60 = vld [vmem:[#allocation2 + $0x24] sm:$0xf0] }
  0x9c   :  { %2757 = vmatpush.bf16.msra.mxu2 %v4201_v20  ;;  %v3617_v20 = vor.u32 %v4856_v7, %v3614_v8  ;;  %v3502_v7 = vld [vmem:[#allocation2 + $0x28c] sm:$0xf0]  ;;  %v4772_v8 = vld [vmem:[#allocation2 + $0xb4] sm:$0xf] }
  0x9d   :  { %2744 = vmatpush.bf16.msra.mxu1 %v3977_v26  ;;  %2769 = vmatpush.bf16.msra.mxu3 %v4453_v34  ;;  %v3393_v26 = vor.u32 %v4800_v13, %v3390_v15  ;;  %v4676_v34 = vld [vmem:[#allocation2 + $0xba0] sm:$0xf]  ;;  %v3505_v15 = vor.u32 %v4828_v6, %v3502_v7 }
  0x9e   :  { %v3670_v6 = vld [vmem:[#allocation2 + $0x3dc] sm:$0xf0] }
  0x9f   :  { %2732 = vmatpush.bf16.msra.mxu0 %v3725_v32  ;;  %v3362_v32 = vld [vmem:[#allocation2 + $0x174] sm:$0xf0] }
  0xa0   :  { %2758 = vmatpush.bf16.msra.mxu2 %v4173_v35  ;;  %v4312_v35 = vld [vmem:[#allocation2 + $0x8c8] sm:$0xf]  ;;  %v3365_v41 = vor.u32 %v4793_v31, %v3362_v32  ;;  %v3477_v31 = vor.u32 %v4821_v22, %v3474_v23  ;;  %v5097_v32 = vld [vmem:[#allocation2 + $0xad8] sm:$0xf0] }
  0xa1   :  { %2745 = vmatpush.bf16.msra.mxu1 %v3949_v39  ;;  %2770 = vmatpush.bf16.msra.mxu3 %v4425_v46  ;;  %v4912_v39 = vld [vmem:[#allocation2 + $0x514] sm:$0xf]  ;;  %v3334_v46 = vld [vmem:[#allocation2 + $0x13c] sm:$0xf0] }
  0xa2   :  { %v3841_v50 = vor.u32 %v4912_v39, %v3838_v40  ;;  %v3337_v56 = vor.u32 %v4786_v45, %v3334_v46  ;;  %v4758_v39 = vld [vmem:[#allocation2 + $0x44] sm:$0xf]  ;;  %v3222_v40 = vld [vmem:[#allocation2 + $0x5c] sm:$0xf0]  ;;  %v4968_v45 = vld [vmem:[#allocation2 + $0x6d4] sm:$0xf] }
  0xa3   :  { %2733 = vmatpush.bf16.msra.mxu0 %v3697_v44  ;;  %v4313_v44 = vor.u32 %v5034_v36, %v4312_v35  ;;  %v4814_v36 = vld [vmem:[#allocation2 + $0x204] sm:$0xf] }
  0xa4   :  { %2759 = vmatpush.bf16.msra.mxu2 %v4145_v48  ;;  %v4677_v48 = vor.u32 %v5125_v38, %v4676_v34  ;;  %v3726_v34 = vld [vmem:[#allocation2 + $0x44c] sm:$0xf0] }
  0xa5   :  { %2746 = vmatpush.bf16.msra.mxu1 %v3921_v52  ;;  %2771 = vmatpush.bf16.msra.mxu3 %v4397_v62  ;;  %v5118_v52 = vld [vmem:[#allocation2 + $0xb80] sm:$0xf0] }
  0xa6   :  { %v4649_v62 = vor.u32 %v5118_v52, %v4648_v49  ;;  %v4062_v49 = vld [vmem:[#allocation2 + $0x6ec] sm:$0xf0] }
  0xa7   :  { %2734 = vmatpush.bf16.msra.mxu0 %v3669_v58  ;;  %v3530_v58 = vld [vmem:[#allocation2 + $0x2c4] sm:$0xf0] }
  0xa8   :  { %2760 = vmatpush.bf16.msra.mxu2 %v4117_v0  ;;  %v3813_v0 = vor.u32 %v4905_v53, %v3810_v54  ;;  %v3533_v1 = vor.u32 %v4835_v57, %v3530_v58  ;;  %v3225_v53 = vor.u32 %v4758_v39, %v3222_v40  ;;  %v4807_v54 = vld [vmem:[#allocation2 + $0x1cc] sm:$0xf]  ;;  %v5080_v57 = vld [vmem:[#allocation2 + $0xa54] sm:$0xf]  ;;  %v4510_v58 = vld [vmem:[#allocation2 + $0xa6c] sm:$0xf0] }
  0xa9   :  { %2747 = vmatpush.bf16.msra.mxu1 %v3893_v4  ;;  %2772 = vmatpush.bf16.msra.mxu3 %v4369_v12  ;;  %v3782_v4 = vld [vmem:[#allocation2 + $0x4bc] sm:$0xf0]  ;;  %v4513_v7 = vor.u32 %v5080_v57, %v4510_v58  ;;  %v3950_v58 = vld [vmem:[#allocation2 + $0x60c] sm:$0xf0] }
  0xaa   :  { %v3785_v12 = vor.u32 %v4898_v3, %v3782_v4  ;;  %v4065_v3 = vor.u32 %v4968_v45, %v4062_v49  ;;  %v5129_v45 = vld [vmem:[#allocation2 + $0xbdc] sm:$0xf]  ;;  %v5059_v49 = vld [vmem:[#allocation2 + $0x9ac] sm:$0xf] }
  0xab   :  { %2735 = vmatpush.bf16.msra.mxu0 %v3641_v11  ;;  %v4592_v11 = vld [vmem:[#allocation2 + $0xaf8] sm:$0xf]  ;;  %v5285_v13 = vpop.f32.mrf.mxu0 }
  0xac   :  { %2761 = vmatpush.bf16.msra.mxu2 %v4089_v17  ;;  %v4891_v17 = vld [vmem:[#allocation2 + $0x46c] sm:$0xf] }
  0xad   :  { %2748 = vmatpush.bf16.msra.mxu1 %v3865_v24  ;;  %2773 = vmatpush.bf16.msra.mxu3 %v4341_v29  ;;  %v5287_v19 = vpop.f32.mrf.mxu1  ;;  %v4765_v24 = vld [vmem:[#allocation2 + $0x7c] sm:$0xf]  ;;  %v3757_v29 = vor.u32 %v4891_v17, %v3754_v18 }
  0xae   :  { %2736 = vmatmul.bf16.vlgmr.msra.gmra.mxu0 %v5251_v47  ;;  %v5017_v18 = vld [vmem:[#allocation2 + $0x85c] sm:$0xf]  ;;  %v2543_v22 = vadd.f32 %v5287_v19, %v5285_v13  ;;  %v5010_v13 = vld [vmem:[#allocation2 + $0x824] sm:$0xf]  ;;  %v4230_v19 = vld [vmem:[#allocation2 + $0x83c] sm:$0xf0] }
  0xaf   :  { %2780 = vmatpush.bf16.msrb.mxu0 %v4733_v16  ;;  %2762 = vmatmul.bf16.vlgmr.msra.gmra.mxu2 %v5263_v21  ;;  %v5104_v16 = vld [vmem:[#allocation2 + $0xb10] sm:$0xf0] }
  0xb0   :  { %2806 = vmatpush.bf16.msrb.mxu2 %v3617_v20  ;;  %2749 = vmatmul.bf16.vlgmr.msra.gmra.mxu1 %v5260_v14  ;;  %v3281_v20 = vor.u32 %v4772_v8, %v3278_v9  ;;  %v4593_v27 = vor.u32 %v5104_v16, %v4592_v11  ;;  %v4961_v8 = vld [vmem:[#allocation2 + $0x69c] sm:$0xf]  ;;  %v4034_v9 = vld [vmem:[#allocation2 + $0x6b4] sm:$0xf0] }
  0xb1   :  { %2793 = vmatpush.bf16.msrb.mxu1 %v3393_v26  ;;  %2774 = vmatpush.bf16.msra.mxu3 %v4313_v44  ;;  %v3250_v26 = vld [vmem:[#allocation2 + $0x94] sm:$0xf0]  ;;  %v4037_v23 = vor.u32 %v4961_v8, %v4034_v9 }
  0xb2   :  { %v3253_v35 = vor.u32 %v4765_v24, %v3250_v26  ;;  %v5289_v38 = vpop.f32.mrf.mxu2  ;;  %v4482_v16 = vld [vmem:[#allocation2 + $0xa34] sm:$0xf0]  ;;  %v4954_v24 = vld [vmem:[#allocation2 + $0x664] sm:$0xf]  ;;  %v4863_v26 = vld [vmem:[#allocation2 + $0x38c] sm:$0xf] }
  0xb3   :  { %2781 = vmatpush.bf16.msrb.mxu0 %v4705_v33  ;;  %v4884_v33 = vld [vmem:[#allocation2 + $0x434] sm:$0xf]  ;;  %v2531_v46 = vpop.f32.mrf.mxu0  ;;  %v2556_v39 = vadd.f32 %v5289_v38, %v2543_v22  ;;  %v4146_v22 = vld [vmem:[#allocation2 + $0x794] sm:$0xf0] }
  0xb4   :  { %2807 = vmatpush.bf16.msrb.mxu2 %v3589_v37  ;;  %2775 = vmatmul.bf16.vlgmr.msra.gmra.mxu3 %v5267_v30  ;;  %v3446_v37 = vld [vmem:[#allocation2 + $0x21c] sm:$0xf0]  ;;  %v3729_v44 = vor.u32 %v4884_v33, %v3726_v34  ;;  %v5066_v34 = vld [vmem:[#allocation2 + $0x9e4] sm:$0xf]  ;;  %v4706_v46 = vld [vmem:[#allocation2 + $0xbf4] sm:$0xf0] }
  0xb5   :  { %2794 = vmatpush.bf16.msrb.mxu1 %v3365_v41  ;;  %2819 = vmatpush.bf16.msrb.mxu3 %v3841_v50  ;;  %v4565_v41 = vor.u32 %v5097_v32, %v4564_v28  ;;  %v4877_v50 = vld [vmem:[#allocation2 + $0x3fc] sm:$0xf]  ;;  %v2544_v52 = vpop.f32.mrf.mxu1  ;;  %v4734_v32 = vld [vmem:[#allocation2 + $0xc2c] sm:$0xf0] }
  0xb6   :  { %v4202_v52 = vld [vmem:[#allocation2 + $0x804] sm:$0xf0] }
  0xb7   :  { %2782 = vmatpush.bf16.msrb.mxu0 %v4677_v48  ;;  %v3449_v48 = vor.u32 %v4814_v36, %v3446_v37  ;;  %v5291_v2 = vpop.f32.mrf.mxu3 }
  0xb8   :  { %2808 = vmatpush.bf16.msrb.mxu2 %v3561_v51  ;;  %v3698_v51 = vld [vmem:[#allocation2 + $0x414] sm:$0xf0] }
  0xb9   :  { %2795 = vmatpush.bf16.msrb.mxu1 %v3337_v56  ;;  %2820 = vmatpush.bf16.msrb.mxu3 %v3813_v0  ;;  %v3418_v56 = vld [vmem:[#allocation2 + $0x1e4] sm:$0xf0]  ;;  %v3701_v63 = vor.u32 %v4877_v50, %v3698_v51  ;;  %v5024_v0 = vld [vmem:[#allocation2 + $0x894] sm:$0xf]  ;;  %v5003_v51 = vld [vmem:[#allocation2 + $0x7ec] sm:$0xf] }
  0xba   :  { %v3421_v4 = vor.u32 %v4807_v54, %v3418_v56  ;;  %v2557_v11 = vpop.f32.mrf.mxu2  ;;  %v4426_v50 = vld [vmem:[#allocation2 + $0x9c4] sm:$0xf0]  ;;  %v4940_v54 = vld [vmem:[#allocation2 + $0x5f4] sm:$0xf]  ;;  %v4709_v56 = vor.u32 %v5129_v45, %v4706_v46  ;;  %v5101_v46 = vld [vmem:[#allocation2 + $0xafc] sm:$0xf] }
  0xbb   :  { %2783 = vmatpush.bf16.msrb.mxu0 %v4649_v62  ;;  %v4537_v62 = vor.u32 %v5090_v43, %v4536_v42  ;;  %v4429_v57 = vor.u32 %v5059_v49, %v4426_v50  ;;  %v5115_v11 = vld [vmem:[#allocation2 + $0xb6c] sm:$0xf] }
  0xbc   :  { %2809 = vmatpush.bf16.msrb.mxu2 %v3533_v1  ;;  %v4286_v1 = vld [vmem:[#allocation2 + $0x8ac] sm:$0xf0] }
  0xbd   :  { %2796 = vmatpush.bf16.msrb.mxu1 %v3309_v5  ;;  %2821 = vmatpush.bf16.msrb.mxu3 %v3785_v12  ;;  %v4870_v5 = vld [vmem:[#allocation2 + $0x3c4] sm:$0xf]  ;;  %v4289_v12 = vor.u32 %v5024_v0, %v4286_v1  ;;  %v4398_v0 = vld [vmem:[#allocation2 + $0x98c] sm:$0xf0] }
  0xbe   :  { %v3673_v17 = vor.u32 %v4870_v5, %v3670_v6  ;;  %v4933_v6 = vld [vmem:[#allocation2 + $0x5bc] sm:$0xf] }
  0xbf   :  { %2784 = vmatpush.bf16.msrb.mxu0 %v4621_v10  ;;  %v3197_v10 = vor.u32 %v4751_v59, %v3194_v60  ;;  %v2570_v37 = vpop.f32.mrf.mxu3  ;;  %v5122_v59 = vld [vmem:[#allocation2 + $0xba4] sm:$0xf]  ;;  %v4678_v60 = vld [vmem:[#allocation2 + $0xbbc] sm:$0xf0] }
  0xc0   :  { %2810 = vmatpush.bf16.msrb.mxu2 %v3505_v15  ;;  %v5073_v15 = vld [vmem:[#allocation2 + $0xa1c] sm:$0xf]  ;;  %v4118_v37 = vld [vmem:[#allocation2 + $0x75c] sm:$0xf0] }
  0xc1   :  { %2797 = vmatpush.bf16.msrb.mxu1 %v3281_v20  ;;  %2822 = vmatpush.bf16.msrb.mxu3 %v3757_v29  ;;  %v4258_v20 = vld [vmem:[#allocation2 + $0x874] sm:$0xf0]  ;;  %v4485_v28 = vor.u32 %v5073_v15, %v4482_v16  ;;  %v4006_v29 = vld [vmem:[#allocation2 + $0x67c] sm:$0xf0]  ;;  %v5045_v16 = vld [vmem:[#allocation2 + $0x93c] sm:$0xf] }
  0xc2   :  { %v4261_v33 = vor.u32 %v5017_v18, %v4258_v20  ;;  %v4009_v40 = vor.u32 %v4954_v24, %v4006_v29  ;;  %v4989_v20 = vld [vmem:[#allocation2 + $0x77c] sm:$0xf]  ;;  %v4926_v24 = vld [vmem:[#allocation2 + $0x584] sm:$0xf]  ;;  %v5108_v29 = vld [vmem:[#allocation2 + $0xb34] sm:$0xf] }
  0xc3   :  { %2785 = vmatpush.bf16.msrb.mxu0 %v4593_v27  ;;  %v3642_v27 = vld [vmem:[#allocation2 + $0x3a4] sm:$0xf0] }
  0xc4   :  { %2811 = vmatpush.bf16.msrb.mxu2 %v3477_v31  ;;  %v5136_v31 = vld [vmem:[#allocation2 + $0xc14] sm:$0xf]  ;;  %v3645_v36 = vor.u32 %v4863_v26, %v3642_v27 }
  0xc5   :  { %2798 = vmatpush.bf16.msrb.mxu1 %v3253_v35  ;;  %2823 = vmatpush.bf16.msrb.mxu3 %v3729_v44  ;;  %v4454_v35 = vld [vmem:[#allocation2 + $0x9fc] sm:$0xf0]  ;;  %v4737_v42 = vor.u32 %v5136_v31, %v4734_v32  ;;  %v3978_v44 = vld [vmem:[#allocation2 + $0x644] sm:$0xf0]  ;;  %v4622_v31 = vld [vmem:[#allocation2 + $0xb4c] sm:$0xf0] }
  0xc6   :  { %v4457_v43 = vor.u32 %v5066_v34, %v4454_v35  ;;  %v5038_v34 = vld [vmem:[#allocation2 + $0x904] sm:$0xf]  ;;  %v4342_v35 = vld [vmem:[#allocation2 + $0x91c] sm:$0xf0] }
  0xc7   :  { %2786 = vmatpush.bf16.msrb.mxu0 %v4565_v41  ;;  %v4947_v41 = vld [vmem:[#allocation2 + $0x62c] sm:$0xf]  ;;  %v4345_v45 = vor.u32 %v5038_v34, %v4342_v35  ;;  %v3312_v35 = vld [vmem:[#allocation2 + $0xf0] sm:$0xf] }
  0xc8   :  { %2812 = vmatpush.bf16.msrb.mxu2 %v3449_v48  ;;  %v4233_v48 = vor.u32 %v5010_v13, %v4230_v19  ;;  %v3981_v38 = vor.u32 %v4947_v41, %v3978_v44  ;;  %v4919_v13 = vld [vmem:[#allocation2 + $0x54c] sm:$0xf]  ;;  %v4982_v19 = vld [vmem:[#allocation2 + $0x744] sm:$0xf]  ;;  %v3866_v41 = vld [vmem:[#allocation2 + $0x564] sm:$0xf0] }
  0xc9   :  { %2799 = vmatpush.bf16.msrb.mxu1 %v3225_v53  ;;  %2824 = vmatpush.bf16.msrb.mxu3 %v3701_v63  ;;  %v2569_v53 = vadd.f32 %v5291_v2, %v2556_v39  ;;  %v5052_v63 = vld [vmem:[#allocation2 + $0x974] sm:$0xf]  ;;  %v3953_v2 = vor.u32 %v4940_v54, %v3950_v58  ;;  %v4121_v50 = vor.u32 %v4982_v19, %v4118_v37  ;;  %v4975_v54 = vld [vmem:[#allocation2 + $0x70c] sm:$0xf] }
  0xca   :  { %v4401_v9 = vor.u32 %v5052_v63, %v4398_v0  ;;  %v4804_v44 = vld [vmem:[#allocation2 + $0x1b0] sm:$0xf0]  ;;  %v5094_v0 = vld [vmem:[#allocation2 + $0xac4] sm:$0xf]  ;;  %v4783_v37 = vld [vmem:[#allocation2 + $0x108] sm:$0xf0] }
  0xcb   :  { %2787 = vmatpush.bf16.msrb.mxu0 %v4537_v62  ;;  %v4205_v62 = vor.u32 %v5003_v51, %v4202_v52  ;;  %v2581_v1 = vpop.f32.mrf.mxu0  ;;  %v5031_v51 = vld [vmem:[#allocation2 + $0x8cc] sm:$0xf]  ;;  %v4314_v52 = vld [vmem:[#allocation2 + $0x8e4] sm:$0xf0] }
  0xcc   :  { %2813 = vmatpush.bf16.msrb.mxu2 %v3421_v4  ;;  %v4174_v4 = vld [vmem:[#allocation2 + $0x7cc] sm:$0xf0]  ;;  %v2582_v5 = vadd.f32 %v2581_v1, %v2569_v53  ;;  %v4916_v53 = vld [vmem:[#allocation2 + $0x530] sm:$0xf0]  ;;  %v4317_v63 = vor.u32 %v5031_v51, %v4314_v52  ;;  %v4566_v1 = vld [vmem:[#allocation2 + $0xadc] sm:$0xf0] }
  0xcd   :  { %2800 = vmatpush.bf16.msrb.mxu1 %v3197_v10  ;;  %2825 = vmatpush.bf16.msrb.mxu3 %v3673_v17  ;;  %v2594_v8 = vpop.f32.mrf.mxu1  ;;  %v3922_v10 = vld [vmem:[#allocation2 + $0x5d4] sm:$0xf0]  ;;  %v4776_v51 = vld [vmem:[#allocation2 + $0xd0] sm:$0xf0]  ;;  %v4012_v52 = vld [vmem:[#allocation2 + $0x668] sm:$0xf] }
  0xce   :  { %2788 = vmatmul.bf16.vlgmr.msrb.gmra.mxu0 %v5265_v25  ;;  %v4370_v17 = vld [vmem:[#allocation2 + $0x954] sm:$0xf0]  ;;  %v2595_v18 = vadd.f32 %v2594_v8, %v2582_v5  ;;  %v3368_v5 = vld [vmem:[#allocation2 + $0x160] sm:$0xf] }
  0xcf   :  { %2832 = vmatpush.bf16.msra.mxu0 %v4065_v3  ;;  %2814 = vmatmul.bf16.vlgmr.msrb.gmra.mxu2 %v5255_v61  ;;  %v4996_v3 = vld [vmem:[#allocation2 + $0x7b4] sm:$0xf]  ;;  %v4373_v27 = vor.u32 %v5045_v16, %v4370_v17  ;;  %v3340_v17 = vld [vmem:[#allocation2 + $0x128] sm:$0xf] }
  0xd0   :  { %2858 = vmatpush.bf16.msra.mxu2 %v4513_v7  ;;  %2801 = vmatmul.bf16.vlgmr.msrb.gmra.mxu1 %v5253_v55  ;;  %v4681_v7 = vor.u32 %v5122_v59, %v4678_v60  ;;  %v4177_v15 = vor.u32 %v4996_v3, %v4174_v4  ;;  %v3620_v59 = vld [vmem:[#allocation2 + $0x358] sm:$0xf]  ;;  %v4860_v60 = vld [vmem:[#allocation2 + $0x370] sm:$0xf0] }
  0xd1   :  { %2845 = vmatpush.bf16.msra.mxu1 %v4289_v12  ;;  %2826 = vmatpush.bf16.msrb.mxu3 %v3645_v36  ;;  %v4650_v12 = vld [vmem:[#allocation2 + $0xb84] sm:$0xf0]  ;;  %v3621_v8 = vor.u32 %v4860_v60, %v3620_v59 }
  0xd2   :  { %v4653_v26 = vor.u32 %v5115_v11, %v4650_v12  ;;  %v2607_v32 = vpop.f32.mrf.mxu2  ;;  %v4569_v11 = vor.u32 %v5094_v0, %v4566_v1  ;;  %v3592_v12 = vld [vmem:[#allocation2 + $0x320] sm:$0xf]  ;;  %v4769_v1 = vld [vmem:[#allocation2 + $0x98] sm:$0xf0] }
  0xd3   :  { %2833 = vmatpush.bf16.msra.mxu0 %v4037_v23  ;;  %v3925_v23 = vor.u32 %v4933_v6, %v3922_v10  ;;  %v2608_v36 = vadd.f32 %v2607_v32, %v2595_v18  ;;  %v2583_v39 = vpop.f32.mrf.mxu0  ;;  %v4909_v10 = vld [vmem:[#allocation2 + $0x4f8] sm:$0xf0]  ;;  %v5087_v18 = vld [vmem:[#allocation2 + $0xa8c] sm:$0xf]  ;;  %v3564_v32 = vld [vmem:[#allocation2 + $0x2e8] sm:$0xf] }
  0xd4   :  { %2859 = vmatpush.bf16.msra.mxu2 %v4485_v28  ;;  %2827 = vmatmul.bf16.vlgmr.msrb.gmra.mxu3 %v5251_v47  ;;  %v3894_v28 = vld [vmem:[#allocation2 + $0x59c] sm:$0xf0] }
  0xd5   :  { %2846 = vmatpush.bf16.msra.mxu1 %v4261_v33  ;;  %2871 = vmatpush.bf16.msra.mxu3 %v4737_v42  ;;  %v4149_v33 = vor.u32 %v4989_v20, %v4146_v22  ;;  %v4625_v42 = vor.u32 %v5108_v29, %v4622_v31  ;;  %3157 = vst [vmem:[#allocation7] sm:$0xff] %v2608_v36  ;;  %v2596_v49 = vpop.f32.mrf.mxu1  ;;  %v4538_v20 = vld [vmem:[#allocation2 + $0xaa4] sm:$0xf0]  ;;  %v4902_v29 = vld [vmem:[#allocation2 + $0x4c0] sm:$0xf0] }
  0xd6   :  { %v4541_v31 = vor.u32 %v5087_v18, %v4538_v20  ;;  %v4040_v39 = vld [vmem:[#allocation2 + $0x6a0] sm:$0xf]  ;;  %v3956_v18 = vld [vmem:[#allocation2 + $0x5f8] sm:$0xf]  ;;  %v4944_v20 = vld [vmem:[#allocation2 + $0x610] sm:$0xf0] }
  0xd7   :  { %2834 = vmatpush.bf16.msra.mxu0 %v4009_v40  ;;  %v3897_v40 = vor.u32 %v4926_v24, %v3894_v28  ;;  %v5301_v3 = vpop.f32.mrf.mxu3  ;;  %v4068_v24 = vld [vmem:[#allocation2 + $0x6d8] sm:$0xf]  ;;  %v3788_v28 = vld [vmem:[#allocation2 + $0x4a8] sm:$0xf] }
  0xd8   :  { %2860 = vmatpush.bf16.msra.mxu2 %v4457_v43  ;;  %v3396_v43 = vld [vmem:[#allocation2 + $0x198] sm:$0xf]  ;;  %v3789_v19 = vor.u32 %v4902_v29, %v3788_v28  ;;  %v4818_v28 = vld [vmem:[#allocation2 + $0x220] sm:$0xf0] }
  0xd9   :  { %2847 = vmatpush.bf16.msra.mxu1 %v4233_v48  ;;  %2872 = vmatpush.bf16.msra.mxu3 %v4709_v56  ;;  %v4594_v48 = vld [vmem:[#allocation2 + $0xb14] sm:$0xf0]  ;;  %v4090_v56 = vld [vmem:[#allocation2 + $0x724] sm:$0xf0] }
  0xda   :  { %v4597_v58 = vor.u32 %v5101_v46, %v4594_v48  ;;  %v4093_v6 = vor.u32 %v4975_v54, %v4090_v56  ;;  %v3313_v46 = vor.u32 %v4783_v37, %v3312_v35  ;;  %v3284_v48 = vld [vmem:[#allocation2 + $0xb8] sm:$0xf]  ;;  %v4888_v56 = vld [vmem:[#allocation2 + $0x450] sm:$0xf0]  ;;  %v4937_v37 = vld [vmem:[#allocation2 + $0x5d8] sm:$0xf0] }
  0xdb   :  { %2835 = vmatpush.bf16.msra.mxu0 %v3981_v38  ;;  %v3844_v38 = vld [vmem:[#allocation2 + $0x518] sm:$0xf]  ;;  %v3285_v60 = vor.u32 %v4776_v51, %v3284_v48  ;;  %v5084_v51 = vld [vmem:[#allocation2 + $0xa70] sm:$0xf0] }
  0xdc   :  { %2861 = vmatpush.bf16.msra.mxu2 %v4429_v57  ;;  %v3869_v57 = vor.u32 %v4919_v13, %v3866_v41  ;;  %v3845_v4 = vor.u32 %v4916_v53, %v3844_v38  ;;  %v4958_v38 = vld [vmem:[#allocation2 + $0x680] sm:$0xf0]  ;;  %v3732_v54 = vld [vmem:[#allocation2 + $0x438] sm:$0xf] }
  0xdd   :  { %2848 = vmatpush.bf16.msra.mxu1 %v4205_v62  ;;  %2873 = vmatpush.bf16.msra.mxu3 %v4681_v7  ;;  %v3397_v62 = vor.u32 %v4804_v44, %v3396_v43  ;;  %v2609_v7 = vpop.f32.mrf.mxu2  ;;  %v4895_v43 = vld [vmem:[#allocation2 + $0x488] sm:$0xf0]  ;;  %v3536_v44 = vld [vmem:[#allocation2 + $0x2b0] sm:$0xf]  ;;  %v3733_v0 = vor.u32 %v4888_v56, %v3732_v54  ;;  %v4292_v35 = vld [vmem:[#allocation2 + $0x898] sm:$0xf] }
  0xde   :  { %v3704_v7 = vld [vmem:[#allocation2 + $0x400] sm:$0xf]  ;;  %v3900_v54 = vld [vmem:[#allocation2 + $0x588] sm:$0xf]  ;;  %v4930_v56 = vld [vmem:[#allocation2 + $0x5a0] sm:$0xf0] }
  0xdf   :  { %2836 = vmatpush.bf16.msra.mxu0 %v3953_v2  ;;  %v4797_v2 = vld [vmem:[#allocation2 + $0x178] sm:$0xf0]  ;;  %v2622_v13 = vpop.f32.mrf.mxu3 }
  0xe0   :  { %2862 = vmatpush.bf16.msra.mxu2 %v4401_v9  ;;  %v3816_v9 = vld [vmem:[#allocation2 + $0x4e0] sm:$0xf]  ;;  %v3369_v16 = vor.u32 %v4797_v2, %v3368_v5  ;;  %v4951_v5 = vld [vmem:[#allocation2 + $0x648] sm:$0xf0]  ;;  %v5028_v13 = vld [vmem:[#allocation2 + $0x8b0] sm:$0xf0] }
  0xe1   :  { %2849 = vmatpush.bf16.msra.mxu1 %v4177_v15  ;;  %2874 = vmatpush.bf16.msra.mxu3 %v4653_v26  ;;  %v4853_v15 = vld [vmem:[#allocation2 + $0x338] sm:$0xf0]  ;;  %v3817_v22 = vor.u32 %v4909_v10, %v3816_v9  ;;  %v4972_v26 = vld [vmem:[#allocation2 + $0x6f0] sm:$0xf0]  ;;  %v3480_v9 = vld [vmem:[#allocation2 + $0x240] sm:$0xf] }
  0xe2   :  { %v4069_v36 = vor.u32 %v4972_v26, %v4068_v24  ;;  %v4825_v10 = vld [vmem:[#allocation2 + $0x258] sm:$0xf0]  ;;  %v4874_v24 = vld [vmem:[#allocation2 + $0x3e0] sm:$0xf0] }
  0xe3   :  { %2837 = vmatpush.bf16.msra.mxu0 %v3925_v23  ;;  %v4790_v23 = vld [vmem:[#allocation2 + $0x140] sm:$0xf0] }
  0xe4   :  { %2863 = vmatpush.bf16.msra.mxu2 %v4373_v27  ;;  %v3593_v27 = vor.u32 %v4853_v15, %v3592_v12  ;;  %v3341_v34 = vor.u32 %v4790_v23, %v3340_v17  ;;  %v3228_v12 = vld [vmem:[#allocation2 + $0x48] sm:$0xf]  ;;  %v4762_v17 = vld [vmem:[#allocation2 + $0x60] sm:$0xf0] }
  0xe5   :  { %2850 = vmatpush.bf16.msra.mxu1 %v4149_v33  ;;  %2875 = vmatpush.bf16.msra.mxu3 %v4625_v42  ;;  %v4846_v33 = vld [vmem:[#allocation2 + $0x300] sm:$0xf0]  ;;  %v3760_v42 = vld [vmem:[#allocation2 + $0x470] sm:$0xf]  ;;  %v3676_v23 = vld [vmem:[#allocation2 + $0x3c8] sm:$0xf] }
  0xe6   :  { %v3565_v41 = vor.u32 %v4846_v33, %v3564_v32  ;;  %v3200_v32 = vld [vmem:[#allocation2 + $0x10] sm:$0xf]  ;;  %v4755_v33 = vld [vmem:[#allocation2 + $0x28] sm:$0xf0] }
  0xe7   :  { %2838 = vmatpush.bf16.msra.mxu0 %v3897_v40  ;;  %v4965_v40 = vld [vmem:[#allocation2 + $0x6b8] sm:$0xf0]  ;;  %v3201_v48 = vor.u32 %v4755_v33, %v3200_v32 }
  0xe8   :  { %2864 = vmatpush.bf16.msra.mxu2 %v4345_v45  ;;  %v4839_v45 = vld [vmem:[#allocation2 + $0x2c8] sm:$0xf0]  ;;  %v4041_v49 = vor.u32 %v4965_v40, %v4040_v39 }
  0xe9   :  { %2851 = vmatpush.bf16.msra.mxu1 %v4121_v50  ;;  %2876 = vmatpush.bf16.msra.mxu3 %v4597_v58  ;;  %v3761_v50 = vor.u32 %v4895_v43, %v3760_v42  ;;  %v3537_v53 = vor.u32 %v4839_v45, %v3536_v44  ;;  %v4832_v58 = vld [vmem:[#allocation2 + $0x290] sm:$0xf0]  ;;  %v4867_v42 = vld [vmem:[#allocation2 + $0x3a8] sm:$0xf0]  ;;  %v4740_v43 = vld [vmem:[#allocation2 + $0xc18] sm:$0xf] }
  0xea   :  { %v5140_v44 = vld [vmem:[#allocation2 + $0xc30] sm:$0xf0]  ;;  %v3424_v45 = vld [vmem:[#allocation2 + $0x1d0] sm:$0xf] }
  0xeb   :  { %2839 = vmatpush.bf16.msra.mxu0 %v3869_v57  ;;  %v3508_v57 = vld [vmem:[#allocation2 + $0x278] sm:$0xf]  ;;  %v5307_v59 = vpop.f32.mrf.mxu0 }
  0xec   :  { %2865 = vmatpush.bf16.msra.mxu2 %v4317_v63  ;;  %v4013_v63 = vor.u32 %v4958_v38, %v4012_v52  ;;  %v4293_v52 = vor.u32 %v5028_v13, %v4292_v35  ;;  %v2634_v38 = vadd.f32 %v5307_v59, %v5301_v3  ;;  %v4794_v35 = vld [vmem:[#allocation2 + $0x164] sm:$0xf] }
  0xed   :  { %2852 = vmatpush.bf16.msra.mxu1 %v4093_v6  ;;  %2877 = vmatpush.bf16.msra.mxu3 %v4569_v11  ;;  %v5309_v2 = vpop.f32.mrf.mxu1  ;;  %v3509_v6 = vor.u32 %v4832_v58, %v3508_v57  ;;  %v4741_v58 = vor.u32 %v5140_v44, %v4740_v43 }
  0xee   :  { %2840 = vmatmul.bf16.vlgmr.msra.gmra.mxu0 %v5260_v14  ;;  %v2647_v3 = vadd.f32 %v5309_v2, %v2634_v38  ;;  %v5070_v2 = vld [vmem:[#allocation2 + $0xa00] sm:$0xf0]  ;;  %v4404_v38 = vld [vmem:[#allocation2 + $0x978] sm:$0xf] }
  0xef   :  { %2884 = vmatpush.bf16.msrb.mxu0 %v3397_v62  ;;  %2866 = vmatmul.bf16.vlgmr.msra.gmra.mxu2 %v5267_v30  ;;  %v3256_v62 = vld [vmem:[#allocation2 + $0x80] sm:$0xf] }
  0xf0   :  { %2910 = vmatpush.bf16.msrb.mxu2 %v3845_v4  ;;  %2853 = vmatmul.bf16.vlgmr.msra.gmra.mxu1 %v5263_v21  ;;  %v3984_v4 = vld [vmem:[#allocation2 + $0x630] sm:$0xf]  ;;  %v3257_v11 = vor.u32 %v4769_v1, %v3256_v62  ;;  %v5021_v62 = vld [vmem:[#allocation2 + $0x878] sm:$0xf0] }
  0xf1   :  { %2897 = vmatpush.bf16.msrb.mxu1 %v3621_v8  ;;  %2878 = vmatpush.bf16.msra.mxu3 %v4541_v31  ;;  %v4881_v8 = vld [vmem:[#allocation2 + $0x418] sm:$0xf0]  ;;  %v3985_v15 = vor.u32 %v4951_v5, %v3984_v4  ;;  %v3229_v31 = vor.u32 %v4762_v17, %v3228_v12  ;;  %v4712_v4 = vld [vmem:[#allocation2 + $0xbe0] sm:$0xf]  ;;  %v3398_v17 = vld [vmem:[#allocation2 + $0x1b4] sm:$0xf0] }
  0xf2   :  { %v5311_v26 = vpop.f32.mrf.mxu2  ;;  %v5133_v5 = vld [vmem:[#allocation2 + $0xbf8] sm:$0xf0] }
  0xf3   :  { %2885 = vmatpush.bf16.msrb.mxu0 %v3369_v16  ;;  %v3705_v16 = vor.u32 %v4881_v8, %v3704_v7  ;;  %v2635_v29 = vpop.f32.mrf.mxu0  ;;  %v4488_v7 = vld [vmem:[#allocation2 + $0xa20] sm:$0xf]  ;;  %v5077_v8 = vld [vmem:[#allocation2 + $0xa38] sm:$0xf0]  ;;  %v4713_v12 = vor.u32 %v5133_v5, %v4712_v4 }
  0xf4   :  { %2911 = vmatpush.bf16.msrb.mxu2 %v3817_v22  ;;  %2879 = vmatmul.bf16.vlgmr.msra.gmra.mxu3 %v5265_v25  ;;  %v3481_v22 = vor.u32 %v4825_v10, %v3480_v9  ;;  %v4236_v9 = vld [vmem:[#allocation2 + $0x828] sm:$0xf]  ;;  %v3872_v10 = vld [vmem:[#allocation2 + $0x550] sm:$0xf]  ;;  %v2660_v29 = vadd.f32 %v5311_v26, %v2647_v3  ;;  %v5049_v3 = vld [vmem:[#allocation2 + $0x958] sm:$0xf0] }
  0xf5   :  { %2898 = vmatpush.bf16.msrb.mxu1 %v3593_v27  ;;  %2923 = vmatpush.bf16.msrb.mxu3 %v4069_v36  ;;  %v3452_v27 = vld [vmem:[#allocation2 + $0x208] sm:$0xf]  ;;  %v3677_v36 = vor.u32 %v4874_v24, %v3676_v23  ;;  %v2648_v39 = vpop.f32.mrf.mxu1 }
  0xf6   :  { %v3453_v40 = vor.u32 %v4818_v28, %v3452_v27  ;;  %v4460_v24 = vld [vmem:[#allocation2 + $0x9e8] sm:$0xf]  ;;  %v4208_v28 = vld [vmem:[#allocation2 + $0x7f0] sm:$0xf] }
  0xf7   :  { %2886 = vmatpush.bf16.msrb.mxu0 %v3341_v34  ;;  %v3957_v34 = vor.u32 %v4944_v20, %v3956_v18  ;;  %v2672_v57 = vpop.f32.mrf.mxu3  ;;  %v4489_v18 = vor.u32 %v5077_v8, %v4488_v7  ;;  %v4684_v20 = vld [vmem:[#allocation2 + $0xba8] sm:$0xf]  ;;  %v4461_v13 = vor.u32 %v5070_v2, %v4460_v24  ;;  %v4432_v39 = vld [vmem:[#allocation2 + $0x9b0] sm:$0xf]  ;;  %v5105_v7 = vld [vmem:[#allocation2 + $0xb18] sm:$0xf0] }
  0xf8   :  { %2912 = vmatpush.bf16.msrb.mxu2 %v3789_v19  ;;  %v3928_v19 = vld [vmem:[#allocation2 + $0x5c0] sm:$0xf]  ;;  %v2673_v26 = vadd.f32 %v2672_v57, %v2660_v29 }
  0xf9   :  { %2899 = vmatpush.bf16.msrb.mxu1 %v3565_v41  ;;  %2924 = vmatpush.bf16.msrb.mxu3 %v4041_v49  ;;  %v3648_v41 = vld [vmem:[#allocation2 + $0x390] sm:$0xf]  ;;  %v3929_v49 = vor.u32 %v4937_v37, %v3928_v19  ;;  %v5119_v37 = vld [vmem:[#allocation2 + $0xb88] sm:$0xf0]  ;;  %v4152_v57 = vld [vmem:[#allocation2 + $0x780] sm:$0xf] }
  0xfa   :  { %v4656_v19 = vld [vmem:[#allocation2 + $0xb70] sm:$0xf]  ;;  %v4376_v8 = vld [vmem:[#allocation2 + $0x940] sm:$0xf] }
  0xfb   :  { %2887 = vmatpush.bf16.msrb.mxu0 %v3313_v46  ;;  %v4811_v46 = vld [vmem:[#allocation2 + $0x1e8] sm:$0xf0]  ;;  %v4657_v44 = vor.u32 %v5119_v37, %v4656_v19  ;;  %v4544_v37 = vld [vmem:[#allocation2 + $0xa90] sm:$0xf] }
  0xfc   :  { %2913 = vmatpush.bf16.msrb.mxu2 %v3761_v50  ;;  %v4516_v50 = vld [vmem:[#allocation2 + $0xa58] sm:$0xf] }
  0xfd   :  { %2900 = vmatpush.bf16.msrb.mxu1 %v3537_v53  ;;  %2925 = vmatpush.bf16.msrb.mxu3 %v4013_v63  ;;  %v3649_v53 = vor.u32 %v4867_v42, %v3648_v41  ;;  %v3425_v63 = vor.u32 %v4811_v46, %v3424_v45  ;;  %v4517_v1 = vor.u32 %v5084_v51, %v4516_v50  ;;  %v4180_v42 = vld [vmem:[#allocation2 + $0x7b8] sm:$0xf]  ;;  %v5000_v45 = vld [vmem:[#allocation2 + $0x7d0] sm:$0xf0]  ;;  %v4787_v46 = vld [vmem:[#allocation2 + $0x12c] sm:$0xf] }
  0xfe   :  { %v4628_v50 = vld [vmem:[#allocation2 + $0xb38] sm:$0xf]  ;;  %v5112_v51 = vld [vmem:[#allocation2 + $0xb50] sm:$0xf0] }
  0xff   :  { %2888 = vmatpush.bf16.msrb.mxu0 %v3285_v60  ;;  %v4264_v60 = vld [vmem:[#allocation2 + $0x860] sm:$0xf]  ;;  %v2674_v32 = vpop.f32.mrf.mxu3 }
 0x100   :  { %2914 = vmatpush.bf16.msrb.mxu2 %v3733_v0  ;;  %v2661_v0 = vpop.f32.mrf.mxu2  ;;  %v4265_v59 = vor.u32 %v5021_v62, %v4264_v60  ;;  %v4629_v60 = vor.u32 %v5112_v51, %v4628_v50  ;;  %v4759_v50 = vld [vmem:[#allocation2 + $0x4c] sm:$0xf]  ;;  %v3230_v51 = vld [vmem:[#allocation2 + $0x64] sm:$0xf0] }
 0x101   :  { %2901 = vmatpush.bf16.msrb.mxu1 %v3509_v6  ;;  %2926 = vmatpush.bf16.msrb.mxu3 %v3985_v15  ;;  %v3901_v6 = vor.u32 %v4930_v56, %v3900_v54  ;;  %v5014_v15 = vld [vmem:[#allocation2 + $0x840] sm:$0xf0]  ;;  %v4181_v54 = vor.u32 %v5000_v45, %v4180_v42  ;;  %v4780_v0 = vld [vmem:[#allocation2 + $0xf4] sm:$0xf]  ;;  %v4070_v42 = vld [vmem:[#allocation2 + $0x6f4] sm:$0xf0] }
 0x102   :  { %v4237_v27 = vor.u32 %v5014_v15, %v4236_v9  ;;  %v4124_v9 = vld [vmem:[#allocation2 + $0x748] sm:$0xf]  ;;  %v4773_v15 = vld [vmem:[#allocation2 + $0xbc] sm:$0xf] }
 0x103   :  { %2889 = vmatpush.bf16.msrb.mxu0 %v3257_v11  ;;  %v4923_v11 = vld [vmem:[#allocation2 + $0x568] sm:$0xf0]  ;;  %v4913_v45 = vld [vmem:[#allocation2 + $0x51c] sm:$0xf] }
 0x104   :  { %2915 = vmatpush.bf16.msrb.mxu2 %v3705_v16  ;;  %v4801_v16 = vld [vmem:[#allocation2 + $0x19c] sm:$0xf]  ;;  %v3873_v23 = vor.u32 %v4923_v11, %v3872_v10 }
 0x105   :  { %2902 = vmatpush.bf16.msrb.mxu1 %v3481_v22  ;;  %2927 = vmatpush.bf16.msrb.mxu3 %v3957_v34  ;;  %v5126_v22 = vld [vmem:[#allocation2 + $0xbc0] sm:$0xf0]  ;;  %v5007_v34 = vld [vmem:[#allocation2 + $0x808] sm:$0xf0] }
 0x106   :  { %v4685_v33 = vor.u32 %v5126_v22, %v4684_v20  ;;  %v4209_v41 = vor.u32 %v5007_v34, %v4208_v28  ;;  %v5098_v20 = vld [vmem:[#allocation2 + $0xae0] sm:$0xf0]  ;;  %v4348_v22 = vld [vmem:[#allocation2 + $0x908] sm:$0xf]  ;;  %v4979_v28 = vld [vmem:[#allocation2 + $0x728] sm:$0xf0] }
 0x107   :  { %2890 = vmatpush.bf16.msrb.mxu0 %v3229_v31  ;;  %v3401_v31 = vor.u32 %v4801_v16, %v3398_v17  ;;  %v3286_v16 = vld [vmem:[#allocation2 + $0xd4] sm:$0xf0]  ;;  %v4377_v17 = vor.u32 %v5049_v3, %v4376_v8  ;;  %v4766_v34 = vld [vmem:[#allocation2 + $0x84] sm:$0xf]  ;;  %v3566_v8 = vld [vmem:[#allocation2 + $0x304] sm:$0xf0] }
 0x108   :  { %2916 = vmatpush.bf16.msrb.mxu2 %v3677_v36  ;;  %v3370_v36 = vld [vmem:[#allocation2 + $0x17c] sm:$0xf0]  ;;  %v3289_v29 = vor.u32 %v4773_v15, %v3286_v16  ;;  %v5025_v3 = vld [vmem:[#allocation2 + $0x89c] sm:$0xf]  ;;  %v4899_v16 = vld [vmem:[#allocation2 + $0x4ac] sm:$0xf] }
 0x109   :  { %2903 = vmatpush.bf16.msrb.mxu1 %v3453_v40  ;;  %2928 = vmatpush.bf16.msrb.mxu3 %v3929_v49  ;;  %v5063_v40 = vld [vmem:[#allocation2 + $0x9c8] sm:$0xf0]  ;;  %v3373_v43 = vor.u32 %v4794_v35, %v3370_v36  ;;  %v3258_v35 = vld [vmem:[#allocation2 + $0x9c] sm:$0xf0] }
 0x10a   :  { %v4433_v49 = vor.u32 %v5063_v40, %v4432_v39  ;;  %v5091_v39 = vld [vmem:[#allocation2 + $0xaa8] sm:$0xf0]  ;;  %v4320_v40 = vld [vmem:[#allocation2 + $0x8d0] sm:$0xf] }
 0x10b   :  { %2891 = vmatpush.bf16.msrb.mxu0 %v3201_v48  ;;  %v3342_v48 = vld [vmem:[#allocation2 + $0x144] sm:$0xf0] }
 0x10c   :  { %2917 = vmatpush.bf16.msrb.mxu2 %v3649_v53  ;;  %v5056_v53 = vld [vmem:[#allocation2 + $0x990] sm:$0xf0] }
 0x10d   :  { %2904 = vmatpush.bf16.msrb.mxu1 %v3425_v63  ;;  %2929 = vmatpush.bf16.msrb.mxu3 %v3901_v6  ;;  %v2698_v62 = vpop.f32.mrf.mxu1  ;;  %v4993_v63 = vld [vmem:[#allocation2 + $0x798] sm:$0xf0]  ;;  %v4405_v5 = vor.u32 %v5056_v53, %v4404_v38  ;;  %v4600_v6 = vld [vmem:[#allocation2 + $0xb00] sm:$0xf]  ;;  %v4850_v38 = vld [vmem:[#allocation2 + $0x324] sm:$0xf] }
 0x10e   :  { %2892 = vmatmul.bf16.vlgmr.msrb.gmra.mxu0 %v5253_v55  ;;  %v4601_v11 = vor.u32 %v5105_v7, %v4600_v6  ;;  %v3594_v53 = vld [vmem:[#allocation2 + $0x33c] sm:$0xf0]  ;;  %v3202_v6 = vld [vmem:[#allocation2 + $0x2c] sm:$0xf0] }
 0x10f   :  { %2936 = vmatpush.bf16.msra.mxu0 %v4293_v52  ;;  %2918 = vmatmul.bf16.vlgmr.msrb.gmra.mxu2 %v5251_v47  ;;  %v2685_v52 = vpop.f32.mrf.mxu0 }
 0x110   :  { %2962 = vmatpush.bf16.msra.mxu2 %v4741_v58  ;;  %2905 = vmatmul.bf16.vlgmr.msrb.gmra.mxu1 %v5255_v61  ;;  %v2686_v56 = vadd.f32 %v2685_v52, %v2673_v26  ;;  %v3345_v58 = vor.u32 %v4787_v46, %v3342_v48  ;;  %v4969_v26 = vld [vmem:[#allocation2 + $0x6dc] sm:$0xf]  ;;  %v3846_v46 = vld [vmem:[#allocation2 + $0x534] sm:$0xf0] }
 0x111   :  { %2949 = vmatpush.bf16.msra.mxu1 %v4517_v1  ;;  %2930 = vmatpush.bf16.msrb.mxu3 %v3873_v23  ;;  %v3314_v1 = vld [vmem:[#allocation2 + $0x10c] sm:$0xf0]  ;;  %v5042_v23 = vld [vmem:[#allocation2 + $0x920] sm:$0xf0] }
 0x112   :  { %v2699_v4 = vadd.f32 %v2698_v62, %v2686_v56  ;;  %v3317_v10 = vor.u32 %v4780_v0, %v3314_v1  ;;  %v5321_v36 = vpop.f32.mrf.mxu2  ;;  %v4349_v19 = vor.u32 %v5042_v23, %v4348_v22  ;;  %v4073_v56 = vor.u32 %v4969_v26, %v4070_v42  ;;  %v3818_v0 = vld [vmem:[#allocation2 + $0x4fc] sm:$0xf0]  ;;  %v4941_v42 = vld [vmem:[#allocation2 + $0x5fc] sm:$0xf] }
 0x113   :  { %2937 = vmatpush.bf16.msra.mxu0 %v4265_v59  ;;  %v4153_v59 = vor.u32 %v4993_v63, %v4152_v57  ;;  %v3849_v57 = vor.u32 %v4913_v45, %v3846_v46  ;;  %v3233_v62 = vor.u32 %v4759_v50, %v3230_v51  ;;  %v4906_v63 = vld [vmem:[#allocation2 + $0x4e4] sm:$0xf]  ;;  %v3597_v1 = vor.u32 %v4850_v38, %v3594_v53  ;;  %v3734_v45 = vld [vmem:[#allocation2 + $0x454] sm:$0xf0]  ;;  %v3482_v51 = vld [vmem:[#allocation2 + $0x25c] sm:$0xf0] }
 0x114   :  { %2963 = vmatpush.bf16.msra.mxu2 %v4713_v12  ;;  %2931 = vmatmul.bf16.vlgmr.msrb.gmra.mxu3 %v5260_v14  ;;  %3158 = vst [vmem:[#allocation7 + $0x8] sm:$0xff] %v2699_v4  ;;  %v4986_v12 = vld [vmem:[#allocation2 + $0x760] sm:$0xf0]  ;;  %v4843_v4 = vld [vmem:[#allocation2 + $0x2ec] sm:$0xf] }
 0x115   :  { %2950 = vmatpush.bf16.msra.mxu1 %v4489_v18  ;;  %2975 = vmatpush.bf16.msra.mxu3 %v3401_v31  ;;  %v4572_v18 = vld [vmem:[#allocation2 + $0xac8] sm:$0xf]  ;;  %v4125_v2 = vor.u32 %v4986_v12, %v4124_v9  ;;  %v4857_v31 = vld [vmem:[#allocation2 + $0x35c] sm:$0xf]  ;;  %v5004_v38 = vld [vmem:[#allocation2 + $0x7f4] sm:$0xf] }
 0x116   :  { %v4573_v32 = vor.u32 %v5098_v20, %v4572_v18  ;;  %v4014_v12 = vld [vmem:[#allocation2 + $0x684] sm:$0xf0]  ;;  %v3569_v18 = vor.u32 %v4843_v4, %v3566_v8  ;;  %v4836_v20 = vld [vmem:[#allocation2 + $0x2b4] sm:$0xf]  ;;  %v4210_v53 = vld [vmem:[#allocation2 + $0x80c] sm:$0xf0] }
 0x117   :  { %2938 = vmatpush.bf16.msra.mxu0 %v4237_v27  ;;  %v2687_v24 = vpop.f32.mrf.mxu0  ;;  %v4096_v27 = vld [vmem:[#allocation2 + $0x710] sm:$0xf]  ;;  %v5323_v52 = vpop.f32.mrf.mxu3  ;;  %v4213_v4 = vor.u32 %v5004_v38, %v4210_v53  ;;  %v3376_v53 = vld [vmem:[#allocation2 + $0x168] sm:$0xf] }
 0x118   :  { %2964 = vmatpush.bf16.msra.mxu2 %v4685_v33  ;;  %v3622_v33 = vld [vmem:[#allocation2 + $0x374] sm:$0xf0]  ;;  %v3538_v24 = vld [vmem:[#allocation2 + $0x2cc] sm:$0xf0] }
 0x119   :  { %2951 = vmatpush.bf16.msra.mxu1 %v4461_v13  ;;  %2976 = vmatpush.bf16.msra.mxu3 %v3373_v43  ;;  %v2700_v13 = vpop.f32.mrf.mxu1  ;;  %v4097_v43 = vor.u32 %v4979_v28, %v4096_v27  ;;  %v3625_v48 = vor.u32 %v4857_v31, %v3622_v33  ;;  %v4266_v27 = vld [vmem:[#allocation2 + $0x87c] sm:$0xf0]  ;;  %v4948_v31 = vld [vmem:[#allocation2 + $0x634] sm:$0xf] }
 0x11a   :  { %v2713_v7 = vpop.f32.mrf.mxu2  ;;  %v4892_v33 = vld [vmem:[#allocation2 + $0x474] sm:$0xf]  ;;  %v4829_v13 = vld [vmem:[#allocation2 + $0x27c] sm:$0xf] }
 0x11b   :  { %2939 = vmatpush.bf16.msra.mxu0 %v4209_v41  ;;  %v5035_v41 = vld [vmem:[#allocation2 + $0x8e8] sm:$0xf0]  ;;  %v4182_v7 = vld [vmem:[#allocation2 + $0x7d4] sm:$0xf0] }
 0x11c   :  { %2965 = vmatpush.bf16.msra.mxu2 %v4657_v44  ;;  %v3261_v44 = vor.u32 %v4766_v34, %v3258_v35  ;;  %v3762_v34 = vld [vmem:[#allocation2 + $0x48c] sm:$0xf0]  ;;  %v3541_v35 = vor.u32 %v4836_v20, %v3538_v24  ;;  %v4518_v24 = vld [vmem:[#allocation2 + $0xa74] sm:$0xf0] }
 0x11d   :  { %2952 = vmatpush.bf16.msra.mxu1 %v4433_v49  ;;  %2977 = vmatpush.bf16.msra.mxu3 %v3345_v58  ;;  %v4545_v49 = vor.u32 %v5091_v39, %v4544_v37  ;;  %v4962_v58 = vld [vmem:[#allocation2 + $0x6a4] sm:$0xf]  ;;  %v3510_v37 = vld [vmem:[#allocation2 + $0x294] sm:$0xf0]  ;;  %v5011_v39 = vld [vmem:[#allocation2 + $0x82c] sm:$0xf]  ;;  %v3765_v26 = vor.u32 %v4892_v33, %v3762_v34 }
 0x11e   :  { %v4920_v33 = vld [vmem:[#allocation2 + $0x554] sm:$0xf]  ;;  %v3874_v34 = vld [vmem:[#allocation2 + $0x56c] sm:$0xf0] }
 0x11f   :  { %2940 = vmatpush.bf16.msra.mxu0 %v4181_v54  ;;  %v4321_v54 = vor.u32 %v5035_v41, %v4320_v40  ;;  %v2726_v23 = vpop.f32.mrf.mxu3  ;;  %v4238_v40 = vld [vmem:[#allocation2 + $0x844] sm:$0xf0] }
 0x120   :  { %2966 = vmatpush.bf16.msra.mxu2 %v4629_v60  ;;  %v4042_v60 = vld [vmem:[#allocation2 + $0x6bc] sm:$0xf0]  ;;  %v4241_v50 = vor.u32 %v5011_v39, %v4238_v40  ;;  %v2725_v23 = vadd.f32 %v5323_v52, %v5321_v36  ;;  %v5137_v40 = vld [vmem:[#allocation2 + $0xc1c] sm:$0xf]  ;;  %v4742_v36 = vld [vmem:[#allocation2 + $0xc34] sm:$0xf0] }
 0x121   :  { %2953 = vmatpush.bf16.msra.mxu1 %v4405_v5  ;;  %2978 = vmatpush.bf16.msra.mxu3 %v3317_v10  ;;  %v4752_v5 = vld [vmem:[#allocation2 + $0x14] sm:$0xf]  ;;  %v4045_v9 = vor.u32 %v4962_v58, %v4042_v60  ;;  %v3821_v10 = vor.u32 %v4906_v63, %v3818_v0  ;;  %v4934_v58 = vld [vmem:[#allocation2 + $0x5c4] sm:$0xf]  ;;  %v3930_v60 = vld [vmem:[#allocation2 + $0x5dc] sm:$0xf0]  ;;  %v4745_v38 = vor.u32 %v5137_v40, %v4742_v36 }
 0x122   :  { %v3205_v15 = vor.u32 %v4752_v5, %v3202_v6  ;;  %v3706_v63 = vld [vmem:[#allocation2 + $0x41c] sm:$0xf0]  ;;  %v3454_v5 = vld [vmem:[#allocation2 + $0x224] sm:$0xf0]  ;;  %v4997_v6 = vld [vmem:[#allocation2 + $0x7bc] sm:$0xf]  ;;  %v3933_v8 = vor.u32 %v4934_v58, %v3930_v60 }
 0x123   :  { %2941 = vmatpush.bf16.msra.mxu0 %v4153_v59  ;;  %v4294_v59 = vld [vmem:[#allocation2 + $0x8b4] sm:$0xf0]  ;;  %v4185_v20 = vor.u32 %v4997_v6, %v4182_v7  ;;  %v5130_v58 = vld [vmem:[#allocation2 + $0xbe4] sm:$0xf]  ;;  %v4714_v60 = vld [vmem:[#allocation2 + $0xbfc] sm:$0xf0] }
 0x124   :  { %2967 = vmatpush.bf16.msra.mxu2 %v4601_v11  ;;  %v4955_v11 = vld [vmem:[#allocation2 + $0x66c] sm:$0xf]  ;;  %v4297_v22 = vor.u32 %v5025_v3, %v4294_v59  ;;  %v4861_v6 = vld [vmem:[#allocation2 + $0x378] sm:$0xf0]  ;;  %v3292_v40 = vld [vmem:[#allocation2 + $0xc0] sm:$0xf] }
 0x125   :  { %2954 = vmatpush.bf16.msra.mxu1 %v4377_v17  ;;  %2979 = vmatpush.bf16.msra.mxu3 %v3289_v29  ;;  %v3790_v17 = vld [vmem:[#allocation2 + $0x4c4] sm:$0xf0]  ;;  %v4017_v28 = vor.u32 %v4955_v11, %v4014_v12  ;;  %v4927_v59 = vld [vmem:[#allocation2 + $0x58c] sm:$0xf]  ;;  %v4777_v36 = vld [vmem:[#allocation2 + $0xd8] sm:$0xf0] }
 0x126   :  { %v3793_v29 = vor.u32 %v4899_v16, %v3790_v17  ;;  %v4871_v11 = vld [vmem:[#allocation2 + $0x3cc] sm:$0xf]  ;;  %v3678_v12 = vld [vmem:[#allocation2 + $0x3e4] sm:$0xf0]  ;;  %v4808_v17 = vld [vmem:[#allocation2 + $0x1d4] sm:$0xf] }
 0x127   :  { %2942 = vmatpush.bf16.msra.mxu0 %v4125_v2  ;;  %v5018_v2 = vld [vmem:[#allocation2 + $0x864] sm:$0xf] }
 0x128   :  { %2968 = vmatpush.bf16.msra.mxu2 %v4573_v32  ;;  %v3986_v32 = vld [vmem:[#allocation2 + $0x64c] sm:$0xf0] }
 0x129   :  { %2955 = vmatpush.bf16.msra.mxu1 %v4349_v19  ;;  %2980 = vmatpush.bf16.msra.mxu3 %v3261_v44  ;;  %v4269_v19 = vor.u32 %v5018_v2, %v4266_v27  ;;  %v3989_v41 = vor.u32 %v4948_v31, %v3986_v32  ;;  %v4885_v44 = vld [vmem:[#allocation2 + $0x43c] sm:$0xf]  ;;  %v4990_v2 = vld [vmem:[#allocation2 + $0x784] sm:$0xf]  ;;  %v4154_v27 = vld [vmem:[#allocation2 + $0x79c] sm:$0xf0]  ;;  %v3681_v31 = vor.u32 %v4871_v11, %v3678_v12 }
 0x12a   :  { %v4864_v32 = vld [vmem:[#allocation2 + $0x394] sm:$0xf]  ;;  %v4157_v39 = vor.u32 %v4990_v2, %v4154_v27  ;;  %v5123_v11 = vld [vmem:[#allocation2 + $0xbac] sm:$0xf]  ;;  %v4686_v12 = vld [vmem:[#allocation2 + $0xbc4] sm:$0xf0] }
 0x12b   :  { %2943 = vmatpush.bf16.msra.mxu0 %v4097_v43  ;;  %v3958_v43 = vld [vmem:[#allocation2 + $0x614] sm:$0xf0]  ;;  %v5329_v46 = vpop.f32.mrf.mxu0  ;;  %v4689_v2 = vor.u32 %v5123_v11, %v4686_v12  ;;  %v5032_v12 = vld [vmem:[#allocation2 + $0x8d4] sm:$0xf] }
 0x12c   :  { %2969 = vmatpush.bf16.msra.mxu2 %v4545_v49  ;;  %v4822_v49 = vld [vmem:[#allocation2 + $0x244] sm:$0xf]  ;;  %v3320_v27 = vld [vmem:[#allocation2 + $0xf8] sm:$0xf] }
 0x12d   :  { %2956 = vmatpush.bf16.msra.mxu1 %v4321_v54  ;;  %2981 = vmatpush.bf16.msra.mxu3 %v3233_v62  ;;  %v3961_v54 = vor.u32 %v4941_v42, %v3958_v43  ;;  %v4878_v62 = vld [vmem:[#allocation2 + $0x404] sm:$0xf]  ;;  %v3485_v0 = vor.u32 %v4822_v49, %v3482_v51  ;;  %v4126_v42 = vld [vmem:[#allocation2 + $0x764] sm:$0xf0]  ;;  %v3877_v43 = vor.u32 %v4920_v33, %v3874_v34  ;;  %v5053_v33 = vld [vmem:[#allocation2 + $0x97c] sm:$0xf] }
 0x12e   :  { %2944 = vmatmul.bf16.vlgmr.msra.gmra.mxu0 %v5263_v21  ;;  %v3709_v3 = vor.u32 %v4878_v62, %v3706_v63  ;;  %v5067_v62 = vld [vmem:[#allocation2 + $0x9ec] sm:$0xf] }
 0x12f   :  { %2988 = vmatpush.bf16.msrb.mxu0 %v3625_v48  ;;  %2970 = vmatmul.bf16.vlgmr.msra.gmra.mxu2 %v5265_v25  ;;  %v3513_v48 = vor.u32 %v4829_v13, %v3510_v37  ;;  %v3404_v13 = vld [vmem:[#allocation2 + $0x1a0] sm:$0xf] }
 0x130   :  { %3014 = vmatpush.bf16.msrb.mxu2 %v4073_v56  ;;  %2957 = vmatmul.bf16.vlgmr.msra.gmra.mxu1 %v5267_v30  ;;  %v5331_v56 = vpop.f32.mrf.mxu1 }
 0x131   :  { %3001 = vmatpush.bf16.msrb.mxu1 %v3849_v57  ;;  %2982 = vmatpush.bf16.msra.mxu3 %v3205_v15  ;;  %v3737_v57 = vor.u32 %v4885_v44, %v3734_v45  ;;  %v5074_v45 = vld [vmem:[#allocation2 + $0xa24] sm:$0xf] }
 0x133   :  { %2989 = vmatpush.bf16.msrb.mxu0 %v3597_v1  ;;  %v4815_v1 = vld [vmem:[#allocation2 + $0x20c] sm:$0xf]  ;;  %v2739_v15 = vpop.f32.mrf.mxu0 }
 0x134   :  { %3015 = vmatpush.bf16.msrb.mxu2 %v4045_v9  ;;  %2983 = vmatmul.bf16.vlgmr.msra.gmra.mxu3 %v5253_v55  ;;  %v3902_v9 = vld [vmem:[#allocation2 + $0x5a4] sm:$0xf0]  ;;  %v3457_v16 = vor.u32 %v4815_v1, %v3454_v5  ;;  %v4098_v1 = vld [vmem:[#allocation2 + $0x72c] sm:$0xf0]  ;;  %v3628_v5 = vld [vmem:[#allocation2 + $0x360] sm:$0xf] }
 0x135   :  { %3002 = vmatpush.bf16.msrb.mxu1 %v3821_v10  ;;  %3027 = vmatpush.bf16.msrb.mxu3 %v4297_v22  ;;  %v5333_v10 = vpop.f32.mrf.mxu2  ;;  %v5081_v22 = vld [vmem:[#allocation2 + $0xa5c] sm:$0xf]  ;;  %v5060_v15 = vld [vmem:[#allocation2 + $0x9b4] sm:$0xf] }
 0x136   :  { %v4521_v52 = vor.u32 %v5081_v22, %v4518_v24  ;;  %v3600_v22 = vld [vmem:[#allocation2 + $0x328] sm:$0xf] }
 0x137   :  { %2990 = vmatpush.bf16.msrb.mxu0 %v3569_v18  ;;  %v3426_v18 = vld [vmem:[#allocation2 + $0x1ec] sm:$0xf0]  ;;  %v2776_v44 = vpop.f32.mrf.mxu3 }
 0x138   :  { %3016 = vmatpush.bf16.msrb.mxu2 %v4017_v28  ;;  %v3905_v28 = vor.u32 %v4927_v59, %v3902_v9  ;;  %v3429_v37 = vor.u32 %v4808_v17, %v3426_v18  ;;  %v4791_v59 = vld [vmem:[#allocation2 + $0x148] sm:$0xf0]  ;;  %v3629_v17 = vor.u32 %v4861_v6, %v3628_v5 }
 0x139   :  { %3003 = vmatpush.bf16.msrb.mxu1 %v3793_v29  ;;  %3028 = vmatpush.bf16.msrb.mxu3 %v4269_v19  ;;  %v2752_v29 = vpop.f32.mrf.mxu1  ;;  %v4805_v19 = vld [vmem:[#allocation2 + $0x1b8] sm:$0xf0] }
 0x13a   :  { %v5116_v29 = vld [vmem:[#allocation2 + $0xb74] sm:$0xf] }
 0x13b   :  { %2991 = vmatpush.bf16.msrb.mxu0 %v3541_v35  ;;  %v3650_v35 = vld [vmem:[#allocation2 + $0x3ac] sm:$0xf0] }
 0x13c   :  { %3017 = vmatpush.bf16.msrb.mxu2 %v3989_v41  ;;  %v2738_v41 = vadd.f32 %v5329_v46, %v2725_v23  ;;  %v3653_v49 = vor.u32 %v4864_v32, %v3650_v35  ;;  %v4854_v23 = vld [vmem:[#allocation2 + $0x340] sm:$0xf0]  ;;  %v4406_v35 = vld [vmem:[#allocation2 + $0x994] sm:$0xf0] }
 0x13d   :  { %3004 = vmatpush.bf16.msrb.mxu1 %v3765_v26  ;;  %3029 = vmatpush.bf16.msrb.mxu3 %v4241_v50  ;;  %v4983_v26 = vld [vmem:[#allocation2 + $0x74c] sm:$0xf]  ;;  %v3405_v50 = vor.u32 %v4805_v19, %v3404_v13  ;;  %v2765_v51 = vpop.f32.mrf.mxu2  ;;  %v3601_v34 = vor.u32 %v4854_v23, %v3600_v22  ;;  %v3572_v13 = vld [vmem:[#allocation2 + $0x2f0] sm:$0xf] }
 0x13e   :  { %v2751_v63 = vadd.f32 %v5331_v56, %v2738_v41  ;;  %v4847_v19 = vld [vmem:[#allocation2 + $0x308] sm:$0xf0]  ;;  %v5109_v41 = vld [vmem:[#allocation2 + $0xb3c] sm:$0xf]  ;;  %v3293_v51 = vor.u32 %v4777_v36, %v3292_v40 }
 0x13f   :  { %2992 = vmatpush.bf16.msrb.mxu0 %v3513_v48  ;;  %v4490_v48 = vld [vmem:[#allocation2 + $0xa3c] sm:$0xf0]  ;;  %v2778_v18 = vpop.f32.mrf.mxu3 }
 0x140   :  { %3018 = vmatpush.bf16.msrb.mxu2 %v3961_v54  ;;  %v4798_v54 = vld [vmem:[#allocation2 + $0x180] sm:$0xf0]  ;;  %v4493_v46 = vor.u32 %v5074_v45, %v4490_v48  ;;  %v3573_v45 = vor.u32 %v4847_v19, %v3572_v13  ;;  %v4378_v48 = vld [vmem:[#allocation2 + $0x95c] sm:$0xf0]  ;;  %v3488_v18 = vld [vmem:[#allocation2 + $0x248] sm:$0xf] }
 0x141   :  { %3005 = vmatpush.bf16.msrb.mxu1 %v3737_v57  ;;  %3030 = vmatpush.bf16.msrb.mxu3 %v4213_v4  ;;  %v4129_v57 = vor.u32 %v4983_v26, %v4126_v42  ;;  %v4462_v4 = vld [vmem:[#allocation2 + $0xa04] sm:$0xf0]  ;;  %v3377_v7 = vor.u32 %v4798_v54, %v3376_v53  ;;  %v4630_v26 = vld [vmem:[#allocation2 + $0xb54] sm:$0xf0]  ;;  %v4409_v42 = vor.u32 %v5053_v33, %v4406_v35  ;;  %v4770_v54 = vld [vmem:[#allocation2 + $0xa0] sm:$0xf0] }
 0x142   :  { %v4465_v56 = vor.u32 %v5067_v62, %v4462_v4  ;;  %v3264_v53 = vld [vmem:[#allocation2 + $0x88] sm:$0xf]  ;;  %v4973_v35 = vld [vmem:[#allocation2 + $0x6f8] sm:$0xf0]  ;;  %v3460_v19 = vld [vmem:[#allocation2 + $0x210] sm:$0xf] }
 0x143   :  { %2993 = vmatpush.bf16.msrb.mxu0 %v3485_v0  ;;  %v4976_v0 = vld [vmem:[#allocation2 + $0x714] sm:$0xf]  ;;  %v3265_v4 = vor.u32 %v4770_v54, %v3264_v53  ;;  %v3432_v53 = vld [vmem:[#allocation2 + $0x1d8] sm:$0xf] }
 0x144   :  { %3019 = vmatpush.bf16.msrb.mxu2 %v3933_v8  ;;  %v4717_v8 = vor.u32 %v5130_v58, %v4714_v60  ;;  %v4101_v9 = vor.u32 %v4976_v0, %v4098_v1  ;;  %v4602_v58 = vld [vmem:[#allocation2 + $0xb1c] sm:$0xf0]  ;;  %v4833_v1 = vld [vmem:[#allocation2 + $0x298] sm:$0xf0]  ;;  %v4812_v54 = vld [vmem:[#allocation2 + $0x1f0] sm:$0xf0] }
 0x145   :  { %3006 = vmatpush.bf16.msrb.mxu1 %v3709_v3  ;;  %3031 = vmatpush.bf16.msrb.mxu3 %v4185_v20  ;;  %v3348_v3 = vld [vmem:[#allocation2 + $0x130] sm:$0xf]  ;;  %v3516_v0 = vld [vmem:[#allocation2 + $0x280] sm:$0xf] }
 0x146   :  { %v4434_v20 = vld [vmem:[#allocation2 + $0x9cc] sm:$0xf0]  ;;  %v3349_v24 = vor.u32 %v4791_v59, %v3348_v3  ;;  %v5095_v3 = vld [vmem:[#allocation2 + $0xacc] sm:$0xf]  ;;  %v4574_v59 = vld [vmem:[#allocation2 + $0xae4] sm:$0xf0] }
 0x147   :  { %2994 = vmatpush.bf16.msrb.mxu0 %v3457_v16  ;;  %v2764_v16 = vadd.f32 %v5333_v10, %v2751_v63  ;;  %v4437_v32 = vor.u32 %v5060_v15, %v4434_v20  ;;  %v4350_v63 = vld [vmem:[#allocation2 + $0x924] sm:$0xf0]  ;;  %v3517_v15 = vor.u32 %v4833_v1, %v3516_v0  ;;  %v4826_v20 = vld [vmem:[#allocation2 + $0x260] sm:$0xf0]  ;;  %v4244_v0 = vld [vmem:[#allocation2 + $0x830] sm:$0xf] }
 0x148   :  { %3020 = vmatpush.bf16.msrb.mxu2 %v3905_v28  ;;  %v4784_v28 = vld [vmem:[#allocation2 + $0x110] sm:$0xf0]  ;;  %v3489_v33 = vor.u32 %v4826_v20, %v3488_v18  ;;  %v5015_v1 = vld [vmem:[#allocation2 + $0x848] sm:$0xf0] }
 0x149   :  { %3007 = vmatpush.bf16.msrb.mxu1 %v3681_v31  ;;  %3032 = vmatpush.bf16.msrb.mxu3 %v4157_v39  ;;  %v4658_v31 = vld [vmem:[#allocation2 + $0xb8c] sm:$0xf0]  ;;  %v2777_v10 = vadd.f32 %v2776_v44, %v2764_v16  ;;  %v5046_v44 = vld [vmem:[#allocation2 + $0x944] sm:$0xf]  ;;  %v3852_v16 = vld [vmem:[#allocation2 + $0x520] sm:$0xf] }
 0x14a   :  { %v4661_v39 = vor.u32 %v5116_v29, %v4658_v31  ;;  %v4381_v60 = vor.u32 %v5046_v44, %v4378_v48  ;;  %v4546_v29 = vld [vmem:[#allocation2 + $0xaac] sm:$0xf0]  ;;  %v4300_v31 = vld [vmem:[#allocation2 + $0x8a0] sm:$0xf]  ;;  %v4272_v44 = vld [vmem:[#allocation2 + $0x868] sm:$0xf] }
 0x14b   :  { %2995 = vmatpush.bf16.msrb.mxu0 %v3429_v37  ;;  %v3321_v37 = vor.u32 %v4784_v28, %v3320_v27  ;;  %v3208_v27 = vld [vmem:[#allocation2 + $0x18] sm:$0xf]  ;;  %v4756_v28 = vld [vmem:[#allocation2 + $0x30] sm:$0xf0] }
 0x14c   :  { %3021 = vmatpush.bf16.msrb.mxu2 %v3877_v43  ;;  %v5008_v18 = vld [vmem:[#allocation2 + $0x810] sm:$0xf0] }
 0x14d   :  { %3008 = vmatpush.bf16.msrb.mxu1 %v3653_v49  ;;  %3033 = vmatpush.bf16.msrb.mxu3 %v4129_v57  ;;  %v3544_v49 = vld [vmem:[#allocation2 + $0x2b8] sm:$0xf]  ;;  %v5102_v57 = vld [vmem:[#allocation2 + $0xb04] sm:$0xf]  ;;  %v5344_v5 = vpop.f32.mrf.mxu1 }
 0x14e   :  { %2996 = vmatmul.bf16.vlgmr.msrb.gmra.mxu0 %v5255_v61  ;;  %v4605_v6 = vor.u32 %v5102_v57, %v4602_v58  ;;  %v4903_v58 = vld [vmem:[#allocation2 + $0x4c8] sm:$0xf0] }
 0x14f   :  { %3040 = vmatpush.bf16.msra.mxu0 %v4521_v52  ;;  %3022 = vmatmul.bf16.vlgmr.msrb.gmra.mxu2 %v5260_v14  ;;  %v2789_v52 = vpop.f32.mrf.mxu0 }
 0x150   :  { %3066 = vmatpush.bf16.msra.mxu2 %v3405_v50  ;;  %3009 = vmatmul.bf16.vlgmr.msrb.gmra.mxu1 %v5251_v47  ;;  %v2790_v43 = vadd.f32 %v2789_v52, %v2777_v10  ;;  %v4840_v50 = vld [vmem:[#allocation2 + $0x2d0] sm:$0xf0]  ;;  %v3824_v52 = vld [vmem:[#allocation2 + $0x4e8] sm:$0xf] }
 0x151   :  { %3053 = vmatpush.bf16.msra.mxu1 %v4745_v38  ;;  %3034 = vmatpush.bf16.msrb.mxu3 %v4101_v9  ;;  %v4633_v38 = vor.u32 %v5109_v41, %v4630_v26  ;;  %v3545_v62 = vor.u32 %v4840_v50, %v3544_v49  ;;  %v4910_v41 = vld [vmem:[#allocation2 + $0x500] sm:$0xf0]  ;;  %v4048_v49 = vld [vmem:[#allocation2 + $0x6a8] sm:$0xf] }
 0x152   :  { %3159 = vst [vmem:[#allocation7 + $0x10] sm:$0xff] %v2790_v43  ;;  %v5346_v23 = vpop.f32.mrf.mxu2  ;;  %v4966_v50 = vld [vmem:[#allocation2 + $0x6c0] sm:$0xf0] }
 0x153   :  { %3041 = vmatpush.bf16.msra.mxu0 %v4493_v46  ;;  %v5039_v46 = vld [vmem:[#allocation2 + $0x90c] sm:$0xf]  ;;  %v2816_v20 = vadd.f32 %v5346_v23, %v5344_v5  ;;  %v3964_v23 = vld [vmem:[#allocation2 + $0x600] sm:$0xf] }
 0x154   :  { %3067 = vmatpush.bf16.msra.mxu2 %v3377_v7  ;;  %3035 = vmatmul.bf16.vlgmr.msrb.gmra.mxu3 %v5263_v21  ;;  %v3236_v7 = vld [vmem:[#allocation2 + $0x50] sm:$0xf]  ;;  %v4353_v11 = vor.u32 %v5039_v46, %v4350_v63  ;;  %v5085_v46 = vld [vmem:[#allocation2 + $0xa78] sm:$0xf0]  ;;  %v4049_v63 = vor.u32 %v4966_v50, %v4048_v49 }
 0x155   :  { %3054 = vmatpush.bf16.msra.mxu1 %v4717_v8  ;;  %3079 = vmatpush.bf16.msra.mxu3 %v3629_v17  ;;  %v4763_v8 = vld [vmem:[#allocation2 + $0x68] sm:$0xf0]  ;;  %v4917_v17 = vld [vmem:[#allocation2 + $0x538] sm:$0xf0]  ;;  %v2804_v36 = vpop.f32.mrf.mxu1  ;;  %v3684_v50 = vld [vmem:[#allocation2 + $0x3d0] sm:$0xf] }
 0x156   :  { %v3237_v22 = vor.u32 %v4763_v8, %v3236_v7  ;;  %v3853_v13 = vor.u32 %v4917_v17, %v3852_v16  ;;  %v4959_v7 = vld [vmem:[#allocation2 + $0x688] sm:$0xf0]  ;;  %v4216_v17 = vld [vmem:[#allocation2 + $0x7f8] sm:$0xf]  ;;  %v4882_v36 = vld [vmem:[#allocation2 + $0x420] sm:$0xf0] }
 0x157   :  { %3042 = vmatpush.bf16.msra.mxu0 %v4465_v56  ;;  %v2791_v9 = vpop.f32.mrf.mxu0  ;;  %v4322_v56 = vld [vmem:[#allocation2 + $0x8ec] sm:$0xf0]  ;;  %v5348_v40 = vpop.f32.mrf.mxu3 }
 0x158   :  { %3068 = vmatpush.bf16.msra.mxu2 %v3349_v24  ;;  %v4577_v24 = vor.u32 %v5095_v3, %v4574_v59  ;;  %v4325_v10 = vor.u32 %v5032_v12, %v4322_v56  ;;  %v3768_v3 = vld [vmem:[#allocation2 + $0x478] sm:$0xf]  ;;  %v4496_v12 = vld [vmem:[#allocation2 + $0xa28] sm:$0xf]  ;;  %v5078_v56 = vld [vmem:[#allocation2 + $0xa40] sm:$0xf0] }
 0x159   :  { %3055 = vmatpush.bf16.msra.mxu1 %v4689_v2  ;;  %3080 = vmatpush.bf16.msra.mxu3 %v3601_v34  ;;  %v5088_v2 = vld [vmem:[#allocation2 + $0xa94] sm:$0xf]  ;;  %v4076_v34 = vld [vmem:[#allocation2 + $0x6e0] sm:$0xf] }
 0x15a   :  { %v4549_v26 = vor.u32 %v5088_v2, %v4546_v29  ;;  %v4077_v43 = vor.u32 %v4973_v35, %v4076_v34  ;;  %v2817_v57 = vpop.f32.mrf.mxu2  ;;  %v3740_v2 = vld [vmem:[#allocation2 + $0x440] sm:$0xf]  ;;  %v4468_v29 = vld [vmem:[#allocation2 + $0x9f0] sm:$0xf]  ;;  %v5001_v34 = vld [vmem:[#allocation2 + $0x7d8] sm:$0xf0]  ;;  %v2829_v35 = vadd.f32 %v5348_v40, %v2816_v20 }
 0x15b   :  { %3043 = vmatpush.bf16.msra.mxu0 %v4437_v32  ;;  %v5029_v32 = vld [vmem:[#allocation2 + $0x8b8] sm:$0xf0]  ;;  %v4160_v40 = vld [vmem:[#allocation2 + $0x788] sm:$0xf] }
 0x15c   :  { %3069 = vmatpush.bf16.msra.mxu2 %v3321_v37  ;;  %v4819_v37 = vld [vmem:[#allocation2 + $0x228] sm:$0xf0] }
 0x15d   :  { %3056 = vmatpush.bf16.msra.mxu1 %v4661_v39  ;;  %3081 = vmatpush.bf16.msra.mxu3 %v3573_v45  ;;  %v3209_v39 = vor.u32 %v4756_v28, %v3208_v27  ;;  %v5022_v45 = vld [vmem:[#allocation2 + $0x880] sm:$0xf0]  ;;  %v3461_v48 = vor.u32 %v4819_v37, %v3460_v19  ;;  %v4497_v27 = vor.u32 %v5078_v56, %v4496_v12  ;;  %v4889_v28 = vld [vmem:[#allocation2 + $0x458] sm:$0xf0]  ;;  %v3712_v37 = vld [vmem:[#allocation2 + $0x408] sm:$0xf] }
 0x15e   :  { %v3741_v19 = vor.u32 %v4889_v28, %v3740_v2  ;;  %v3713_v49 = vor.u32 %v4882_v36, %v3712_v37  ;;  %v4356_v28 = vld [vmem:[#allocation2 + $0x910] sm:$0xf]  ;;  %v5036_v37 = vld [vmem:[#allocation2 + $0x8f0] sm:$0xf0]  ;;  %v5127_v36 = vld [vmem:[#allocation2 + $0xbc8] sm:$0xf0] }
 0x15f   :  { %3044 = vmatpush.bf16.msra.mxu0 %v4409_v42  ;;  %v4301_v42 = vor.u32 %v5029_v32, %v4300_v31  ;;  %v2830_v9 = vpop.f32.mrf.mxu3  ;;  %v5071_v31 = vld [vmem:[#allocation2 + $0xa08] sm:$0xf0]  ;;  %v4217_v32 = vor.u32 %v5008_v18, %v4216_v17  ;;  %v4104_v17 = vld [vmem:[#allocation2 + $0x718] sm:$0xf]  ;;  %v4980_v18 = vld [vmem:[#allocation2 + $0x730] sm:$0xf0] }
 0x160   :  { %3070 = vmatpush.bf16.msra.mxu2 %v3293_v51  ;;  %v3825_v51 = vor.u32 %v4910_v41, %v3824_v52  ;;  %v4440_v52 = vld [vmem:[#allocation2 + $0x9b8] sm:$0xf]  ;;  %v5064_v41 = vld [vmem:[#allocation2 + $0x9d0] sm:$0xf0]  ;;  %v4384_v9 = vld [vmem:[#allocation2 + $0x948] sm:$0xf] }
 0x161   :  { %3057 = vmatpush.bf16.msra.mxu1 %v4633_v38  ;;  %3082 = vmatpush.bf16.msra.mxu3 %v3545_v62  ;;  %v3796_v38 = vld [vmem:[#allocation2 + $0x4b0] sm:$0xf]  ;;  %v4273_v62 = vor.u32 %v5022_v45, %v4272_v44  ;;  %v4994_v45 = vld [vmem:[#allocation2 + $0x7a0] sm:$0xf0] }
 0x162   :  { %v3797_v8 = vor.u32 %v4903_v58, %v3796_v38  ;;  %v4875_v38 = vld [vmem:[#allocation2 + $0x3e8] sm:$0xf0]  ;;  %v4161_v57 = vor.u32 %v4994_v45, %v4160_v40  ;;  %v4636_v40 = vld [vmem:[#allocation2 + $0xb40] sm:$0xf]  ;;  %v5113_v45 = vld [vmem:[#allocation2 + $0xb58] sm:$0xf0] }
 0x163   :  { %3045 = vmatpush.bf16.msra.mxu0 %v4381_v60  ;;  %v4524_v60 = vld [vmem:[#allocation2 + $0xa60] sm:$0xf] }
 0x164   :  { %3071 = vmatpush.bf16.msra.mxu2 %v3265_v4  ;;  %v3433_v4 = vor.u32 %v4812_v54, %v3432_v53  ;;  %v4525_v59 = vor.u32 %v5085_v46, %v4524_v60  ;;  %v4412_v53 = vld [vmem:[#allocation2 + $0x980] sm:$0xf]  ;;  %v5057_v54 = vld [vmem:[#allocation2 + $0x998] sm:$0xf0]  ;;  %v4132_v60 = vld [vmem:[#allocation2 + $0x750] sm:$0xf] }
 0x165   :  { %3058 = vmatpush.bf16.msra.mxu1 %v4605_v6  ;;  %3083 = vmatpush.bf16.msra.mxu3 %v3517_v15  ;;  %v4020_v6 = vld [vmem:[#allocation2 + $0x670] sm:$0xf]  ;;  %v4245_v15 = vor.u32 %v5015_v1, %v4244_v0  ;;  %v4987_v46 = vld [vmem:[#allocation2 + $0x768] sm:$0xf0] }
 0x166   :  { %v4021_v16 = vor.u32 %v4959_v7, %v4020_v6  ;;  %v3908_v1 = vld [vmem:[#allocation2 + $0x590] sm:$0xf]  ;;  %v3685_v6 = vor.u32 %v4875_v38, %v3684_v50  ;;  %v3656_v7 = vld [vmem:[#allocation2 + $0x398] sm:$0xf]  ;;  %v4133_v12 = vor.u32 %v4987_v46, %v4132_v60 }
 0x167   :  { %3046 = vmatpush.bf16.msra.mxu0 %v4353_v11  ;;  %v4896_v11 = vld [vmem:[#allocation2 + $0x490] sm:$0xf0] }
 0x168   :  { %3072 = vmatpush.bf16.msra.mxu2 %v3237_v22  ;;  %v4952_v22 = vld [vmem:[#allocation2 + $0x650] sm:$0xf0] }
 0x169   :  { %3059 = vmatpush.bf16.msra.mxu1 %v4577_v24  ;;  %3084 = vmatpush.bf16.msra.mxu3 %v3489_v33  ;;  %v3769_v24 = vor.u32 %v4896_v11, %v3768_v3  ;;  %v4188_v33 = vld [vmem:[#allocation2 + $0x7c0] sm:$0xf]  ;;  %v4413_v3 = vor.u32 %v5057_v54, %v4412_v53  ;;  %v5050_v11 = vld [vmem:[#allocation2 + $0x960] sm:$0xf0] }
 0x16a   :  { %v4385_v2 = vor.u32 %v5050_v11, %v4384_v9 }
 0x16b   :  { %3047 = vmatpush.bf16.msra.mxu0 %v4325_v10  ;;  %v2841_v5 = vpop.f32.mrf.mxu0 }
 0x16c   :  { %3073 = vmatpush.bf16.msra.mxu2 %v3209_v39  ;;  %v4469_v39 = vor.u32 %v5071_v31, %v4468_v29  ;;  %v5043_v29 = vld [vmem:[#allocation2 + $0x928] sm:$0xf0]  ;;  %v4105_v31 = vor.u32 %v4980_v18, %v4104_v17 }
 0x16d   :  { %3060 = vmatpush.bf16.msra.mxu1 %v4549_v26  ;;  %3085 = vmatpush.bf16.msra.mxu3 %v3461_v48  ;;  %v4189_v26 = vor.u32 %v5001_v34, %v4188_v33  ;;  %v4938_v48 = vld [vmem:[#allocation2 + $0x5e0] sm:$0xf0] }
 0x16e   :  { %3048 = vmatmul.bf16.vlgmr.msra.gmra.mxu0 %v5267_v30  ;;  %v5134_v33 = vld [vmem:[#allocation2 + $0xc00] sm:$0xf0] }
 0x16f   :  { %3092 = vmatpush.bf16.msrb.mxu0 %v3853_v13  ;;  %3074 = vmatmul.bf16.vlgmr.msra.gmra.mxu2 %v5253_v55  ;;  %v3992_v55 = vld [vmem:[#allocation2 + $0x638] sm:$0xf]  ;;  %v4945_v13 = vld [vmem:[#allocation2 + $0x618] sm:$0xf0] }
 0x170   :  { %3118 = vmatpush.bf16.msrb.mxu2 %v4301_v42  ;;  %3061 = vmatmul.bf16.vlgmr.msra.gmra.mxu1 %v5265_v25  ;;  %v3993_v10 = vor.u32 %v4952_v22, %v3992_v55  ;;  %v2854_v42 = vpop.f32.mrf.mxu1  ;;  %v3965_v44 = vor.u32 %v4945_v13, %v3964_v23  ;;  %v3880_v55 = vld [vmem:[#allocation2 + $0x558] sm:$0xf]  ;;  %v4924_v22 = vld [vmem:[#allocation2 + $0x570] sm:$0xf0]  ;;  %v4357_v23 = vor.u32 %v5043_v29, %v4356_v28 }
 0x171   :  { %3105 = vmatpush.bf16.msrb.mxu1 %v4077_v43  ;;  %3086 = vmatpush.bf16.msra.mxu3 %v3433_v4  ;;  %v2842_v43 = vadd.f32 %v2841_v5, %v2829_v35  ;;  %v4931_v4 = vld [vmem:[#allocation2 + $0x5a8] sm:$0xf0]  ;;  %v3881_v34 = vor.u32 %v4924_v22, %v3880_v55 }
 0x173   :  { %3093 = vmatpush.bf16.msrb.mxu0 %v3825_v51  ;;  %v4441_v51 = vor.u32 %v5064_v41, %v4440_v52  ;;  %v2843_v0 = vpop.f32.mrf.mxu0 }
 0x174   :  { %3119 = vmatpush.bf16.msrb.mxu2 %v4273_v62  ;;  %3087 = vmatmul.bf16.vlgmr.msra.gmra.mxu3 %v5255_v61  ;;  %v3936_v61 = vld [vmem:[#allocation2 + $0x5c8] sm:$0xf]  ;;  %v2855_v62 = vadd.f32 %v2854_v42, %v2842_v43  ;;  %v4664_v42 = vld [vmem:[#allocation2 + $0xb78] sm:$0xf]  ;;  %v5120_v43 = vld [vmem:[#allocation2 + $0xb90] sm:$0xf0] }
 0x175   :  { %3106 = vmatpush.bf16.msrb.mxu1 %v4049_v63  ;;  %3131 = vmatpush.bf16.msrb.mxu3 %v4525_v59  ;;  %v3937_v58 = vor.u32 %v4938_v48, %v3936_v61  ;;  %v2867_v63 = vpop.f32.mrf.mxu2  ;;  %v4748_v59 = vld [vmem:[#allocation2 + $0xc20] sm:$0xf]  ;;  %v4608_v48 = vld [vmem:[#allocation2 + $0xb08] sm:$0xf] }
 0x176   :  { %v2868_v20 = vadd.f32 %v2867_v63, %v2855_v62 }
 0x177   :  { %3094 = vmatpush.bf16.msrb.mxu0 %v3797_v8  ;;  %v4868_v8 = vld [vmem:[#allocation2 + $0x3b0] sm:$0xf0] }
 0x178   :  { %3120 = vmatpush.bf16.msrb.mxu2 %v4245_v15  ;;  %v2856_v56 = vpop.f32.mrf.mxu1  ;;  %v5141_v15 = vld [vmem:[#allocation2 + $0xc38] sm:$0xf0] }
 0x179   :  { %3107 = vmatpush.bf16.msrb.mxu1 %v4021_v16  ;;  %3132 = vmatpush.bf16.msrb.mxu3 %v4497_v27  ;;  %v3909_v16 = vor.u32 %v4931_v4, %v3908_v1  ;;  %v4749_v27 = vor.u32 %v5141_v15, %v4748_v59 }
 0x17b   :  { %3095 = vmatpush.bf16.msrb.mxu0 %v3769_v24  ;;  %v3657_v24 = vor.u32 %v4868_v8, %v3656_v7 }
 0x17c   :  { %3121 = vmatpush.bf16.msrb.mxu2 %v4217_v32  ;;  %v2880_v32 = vpop.f32.mrf.mxu3 }
 0x17d   :  { %3108 = vmatpush.bf16.msrb.mxu1 %v3993_v10  ;;  %3133 = vmatpush.bf16.msrb.mxu3 %v4469_v39  ;;  %v4720_v10 = vld [vmem:[#allocation2 + $0xbe8] sm:$0xf]  ;;  %v2881_v35 = vadd.f32 %v2880_v32, %v2868_v20  ;;  %v2869_v5 = vpop.f32.mrf.mxu2  ;;  %v4692_v39 = vld [vmem:[#allocation2 + $0xbb0] sm:$0xf] }
 0x17e   :  { %v4721_v13 = vor.u32 %v5134_v33, %v4720_v10  ;;  %v4693_v41 = vor.u32 %v5127_v36, %v4692_v39 }
 0x17f   :  { %3096 = vmatpush.bf16.msrb.mxu0 %v3741_v19  ;;  %3160 = vst [vmem:[#allocation7 + $0x18] sm:$0xff] %v2881_v35  ;;  %v4328_v19 = vld [vmem:[#allocation2 + $0x8d8] sm:$0xf] }
 0x180   :  { %3122 = vmatpush.bf16.msrb.mxu2 %v4189_v26  ;;  %v4329_v52 = vor.u32 %v5036_v37, %v4328_v19 }
 0x181   :  { %3109 = vmatpush.bf16.msrb.mxu1 %v3965_v44  ;;  %3134 = vmatpush.bf16.msrb.mxu3 %v4441_v51  ;;  %v4665_v44 = vor.u32 %v5120_v43, %v4664_v42  ;;  %v4580_v51 = vld [vmem:[#allocation2 + $0xad0] sm:$0xf] }
 0x183   :  { %3097 = vmatpush.bf16.msrb.mxu0 %v3713_v49  ;;  %v5106_v49 = vld [vmem:[#allocation2 + $0xb20] sm:$0xf0] }
 0x184   :  { %3123 = vmatpush.bf16.msrb.mxu2 %v4161_v57  ;;  %v2882_v26 = vpop.f32.mrf.mxu3  ;;  %v4609_v50 = vor.u32 %v5106_v49, %v4608_v48  ;;  %v4552_v57 = vld [vmem:[#allocation2 + $0xa98] sm:$0xf] }
 0x185   :  { %3110 = vmatpush.bf16.msrb.mxu1 %v3937_v58  ;;  %3135 = vmatpush.bf16.msrb.mxu3 %v4413_v3  ;;  %v5092_v58 = vld [vmem:[#allocation2 + $0xab0] sm:$0xf0] }
 0x186   :  { %v4553_v46 = vor.u32 %v5092_v58, %v4552_v57 }
 0x187   :  { %3098 = vmatpush.bf16.msrb.mxu0 %v3685_v6 }
 0x188   :  { %3124 = vmatpush.bf16.msrb.mxu2 %v4133_v12 }
 0x189   :  { %3111 = vmatpush.bf16.msrb.mxu1 %v3909_v16  ;;  %3136 = vmatpush.bf16.msrb.mxu3 %v4385_v2 }
 0x18b   :  { %3099 = vmatpush.bf16.msrb.mxu0 %v3657_v24  ;;  %v2893_v61 = vpop.f32.mrf.mxu0 }
 0x18c   :  { %3125 = vmatpush.bf16.msrb.mxu2 %v4105_v31 }
 0x18d   :  { %3112 = vmatpush.bf16.msrb.mxu1 %v3881_v34  ;;  %3137 = vmatpush.bf16.msrb.mxu3 %v4357_v23 }
 0x18e   :  { %3100 = vmatmul.bf16.vlgmr.msrb.gmra.mxu0 %v5251_v47  ;;  %v4637_v47 = vor.u32 %v5113_v45, %v4636_v40 }
 0x18f   :  { %3144 = vmatpush.bf16.msra.mxu0 %v4749_v27  ;;  %3126 = vmatmul.bf16.vlgmr.msrb.gmra.mxu2 %v5263_v21  ;;  %v2906_v21 = vpop.f32.mrf.mxu1 }
 0x190   :  { %3113 = vmatmul.bf16.vlgmr.msrb.gmra.mxu1 %v5260_v14  ;;  %v5099_v14 = vld [vmem:[#allocation2 + $0xae8] sm:$0xf0]  ;;  %v2907_v63 = vadd.f32 %v2906_v21, %v2893_v61 }
 0x191   :  { %3138 = vmatpush.bf16.msrb.mxu3 %v4329_v52  ;;  %v4581_v54 = vor.u32 %v5099_v14, %v4580_v51 }
 0x192   :  { %v2919_v38 = vpop.f32.mrf.mxu2 }
 0x193   :  { %3145 = vmatpush.bf16.msra.mxu0 %v4721_v13  ;;  %v2895_v53 = vpop.f32.mrf.mxu0  ;;  %v2920_v0 = vadd.f32 %v2919_v38, %v2907_v63 }
 0x194   :  { %3139 = vmatmul.bf16.vlgmr.msrb.gmra.mxu3 %v5267_v30 }
 0x197   :  { %3146 = vmatpush.bf16.msra.mxu0 %v4693_v41  ;;  %v2908_v60 = vpop.f32.mrf.mxu1  ;;  %v2932_v30 = vpop.f32.mrf.mxu3 }
 0x198   :  { %v2933_v4 = vadd.f32 %v2932_v30, %v2920_v0 }
 0x19a   :  { %v2921_v62 = vpop.f32.mrf.mxu2 }
 0x19b   :  { %3147 = vmatpush.bf16.msra.mxu0 %v4665_v44 }
 0x19f   :  { %3148 = vmatpush.bf16.msra.mxu0 %v4637_v47  ;;  %v2934_v1 = vpop.f32.mrf.mxu3 }
 0x1a3   :  { %3149 = vmatpush.bf16.msra.mxu0 %v4609_v50 }
 0x1a7   :  { %3150 = vmatpush.bf16.msra.mxu0 %v4581_v54 }
 0x1ab   :  { %3151 = vmatpush.bf16.msra.mxu0 %v4553_v46  ;;  %v2945_v6 = vpop.f32.mrf.mxu0 }
 0x1ac   :  { %v2946_v7 = vadd.f32 %v2945_v6, %v2933_v4 }
 0x1ad   :  { %v2958_v8 = vpop.f32.mrf.mxu1 }
 0x1ae   :  { %3152 = vmatmul.bf16.vlgmr.msra.gmra.mxu0 %v5265_v25  ;;  %v2959_v3 = vadd.f32 %v2958_v8, %v2946_v7 }
 0x1b2   :  { %v2971_v59 = vpop.f32.mrf.mxu2 }
 0x1b3   :  { %v2972_v9 = vadd.f32 %v2971_v59, %v2959_v3  ;;  %v2947_v11 = vpop.f32.mrf.mxu0 }
 0x1b5   :  { %3161 = vst [vmem:[#allocation7 + $0x20] sm:$0xff] %v2972_v9  ;;  %v2960_v12 = vpop.f32.mrf.mxu1 }
 0x1b7   :  { %v2984_v56 = vpop.f32.mrf.mxu3 }
 0x1ba   :  { %v2973_v15 = vpop.f32.mrf.mxu2 }
 0x1bf   :  { %v2986_v16 = vpop.f32.mrf.mxu3 }
 0x1cb   :  { %v2997_v17 = vpop.f32.mrf.mxu0 }
 0x1cc   :  { %v2998_v22 = vadd.f32 %v2997_v17, %v2984_v56 }
 0x1cd   :  { %v3010_v18 = vpop.f32.mrf.mxu1 }
 0x1ce   :  { %v3011_v27 = vadd.f32 %v3010_v18, %v2998_v22 }
 0x1d2   :  { %v3023_v20 = vpop.f32.mrf.mxu2 }
 0x1d3   :  { %v2999_v55 = vpop.f32.mrf.mxu0  ;;  %v3024_v28 = vadd.f32 %v3023_v20, %v3011_v27 }
 0x1d5   :  { %v3012_v25 = vpop.f32.mrf.mxu1 }
 0x1d7   :  { %v3036_v24 = vpop.f32.mrf.mxu3 }
 0x1d8   :  { %v3037_v31 = vadd.f32 %v3036_v24, %v3024_v28 }
 0x1da   :  { %v3025_v2 = vpop.f32.mrf.mxu2 }
 0x1df   :  { %v3038_v29 = vpop.f32.mrf.mxu3 }
 0x1eb   :  { %v3049_v32 = vpop.f32.mrf.mxu0 }
 0x1ec   :  { %v3050_v10 = vadd.f32 %v3049_v32, %v3037_v31 }
 0x1ed   :  { %v3062_v33 = vpop.f32.mrf.mxu1 }
 0x1ee   :  { %v3063_v34 = vadd.f32 %v3062_v33, %v3050_v10 }
 0x1f0   :  { %3162 = vst [vmem:[#allocation7 + $0x28] sm:$0xff] %v3063_v34 }
 0x1f2   :  { %v3075_v35 = vpop.f32.mrf.mxu2 }
 0x1f3   :  { %v3051_v5 = vpop.f32.mrf.mxu0 }
 0x1f5   :  { %v3064_v23 = vpop.f32.mrf.mxu1 }
 0x1f7   :  { %v3088_v13 = vpop.f32.mrf.mxu3 }
 0x1f8   :  { %v3089_v42 = vadd.f32 %v3088_v13, %v3075_v35 }
 0x1fa   :  { %v3077_v19 = vpop.f32.mrf.mxu2 }
 0x1ff   :  { %v3090_v37 = vpop.f32.mrf.mxu3 }
 0x20b   :  { %v3101_v39 = vpop.f32.mrf.mxu0 }
 0x20c   :  { %v3102_v40 = vadd.f32 %v3101_v39, %v3089_v42 }
 0x20d   :  { %v3114_v36 = vpop.f32.mrf.mxu1 }
 0x20e   :  { %v3115_v45 = vadd.f32 %v3114_v36, %v3102_v40 }
 0x212   :  { %v3127_v52 = vpop.f32.mrf.mxu2 }
 0x213   :  { %v3103_v41 = vpop.f32.mrf.mxu0  ;;  %v3128_v47 = vadd.f32 %v3127_v52, %v3115_v45 }
 0x215   :  { %v3116_v26 = vpop.f32.mrf.mxu1 }
 0x217   :  { %v3140_v43 = vpop.f32.mrf.mxu3 }
 0x218   :  { %v3141_v48 = vadd.f32 %v3140_v43, %v3128_v47 }
 0x21a   :  { %v3129_v44 = vpop.f32.mrf.mxu2 }
 0x21f   :  { %v3142_v61 = vpop.f32.mrf.mxu3 }
 0x22b   :  { %v3153_v49 = vpop.f32.mrf.mxu0 }
 0x22c   :  { %v3154_v21 = vadd.f32 %v3153_v49, %v3141_v48 }
 0x22e   :  { %3163 = vst [vmem:[#allocation7 + $0x30] sm:$0xff] %v3154_v21 }
 0x22f   :  { %3174 = dma.vmem_to_hbm [thread:$0]  %s3170_s1, 896, %s3172_s23, [#allocation4]  }
 0x233   :  { %v3155_v50 = vpop.f32.mrf.mxu0 }
 0x234   :  { %5223 = dma.done.wait [#allocation4], 896  }
 0x235   :  { %5224 = vsyncadd [#allocation4], 4294966400 }
 0x236   :  { %3179 = vsyncpa [#allocation3], 1 }
 0x237   :  { %3180 = vsyncpa [#allocation6], 1 }
 0x238   :  { %3181 = vsyncpa [#allocation4], 1 }

// kernel: tpu_custom_call.1
= control target key start
LH: loop header
LB: loop body
LE: loop exit
PB: predicated region body
PF: predicated region fallthrough
CT: control target
= control target key end

     0   :  { %7 = vsyncpa [#allocation3], 0  ;;  %s5365_s0 = inlined_call_operand.hbm [shape: bf16[896,896], index: 0, kind: input, shape index: {}]   ;;  %s5366_s1 = inlined_call_operand.hbm [shape: f32[8,896], index: 1, kind: input, shape index: {}]   ;;  %s5367_s2 = inlined_call_operand.hbm [shape: f32[8,896], index: 2, kind: output, shape index: {}]  }
   0x1   :  { %8 = vsyncpa [#allocation6], 0 }
   0x2   :  { %9 = vsyncpa [#allocation4], 0  ;;  %s14_s11 = sshll.u32 %s5365_s0, 4  ;;  %s5225_s12 = smov [#allocation2]   ;;  %s15_s11 = int_to_ptr.hbm [resolvable:$true] %s14_s11 }
   0x3   :  { %s16_s13 = sshll.u32 %s5225_s12, 4  ;;  %s28_s16 = sshll.u32 %s5366_s1, 4  ;;  %s17_s13 = int_to_ptr.vmem [resolvable:$true] %s16_s13  ;;  %s29_s16 = int_to_ptr.hbm [resolvable:$true] %s28_s16 }
   0x4   :  { %s5226_s17 = smov 448   ;;  %s5227_s18 = smov 28  }
   0x5   :  { %22 = dma.hbm_to_vmem [thread:$0]  %s15_s11, 50176, %s17_s13, [#allocation3], %s5226_s17, %s5226_s17, %s5227_s18  }
   0x6   :  { %s5228_s19 = smov [#allocation5]  }
   0x7   :  { %s30_s20 = sshll.u32 %s5228_s19, 4  ;;  %s31_s20 = int_to_ptr.vmem [resolvable:$true] %s30_s20 }
   0x8   :  { %33 = dma.hbm_to_vmem [thread:$0]  %s29_s16, 896, %s31_s20, [#allocation6]  }
   0x9   :  { %5219 = dma.done.wait [#allocation3], 50176  }
   0xa   :  { %5220 = vsyncadd [#allocation3], 4294917120 }
   0xb   :  { %5221 = dma.done.wait [#allocation6], 896  }
   0xc   :  { %5222 = vsyncadd [#allocation6], 4294966400  ;;  %v3380_v0 = vld [vmem:[#allocation2 + $0x188] sm:$0xf]  ;;  %v4802_v1 = vld [vmem:[#allocation2 + $0x1a0] sm:$0xf0] }
   0xd   :  { %v3828_v2 = vld [vmem:[#allocation2 + $0x508] sm:$0xf]  ;;  %v3381_v3 = vor.u32 %v4802_v1, %v3380_v0  ;;  %v4914_v4 = vld [vmem:[#allocation2 + $0x520] sm:$0xf0]  ;;  %v3352_v5 = vld [vmem:[#allocation2 + $0x150] sm:$0xf] }
   0xe   :  { %v4795_v6 = vld [vmem:[#allocation2 + $0x168] sm:$0xf0]  ;;  %v3829_v7 = vor.u32 %v4914_v4, %v3828_v2  ;;  %v3604_v8 = vld [vmem:[#allocation2 + $0x348] sm:$0xf]  ;;  %v4858_v9 = vld [vmem:[#allocation2 + $0x360] sm:$0xf0] }
   0xf   :  { %v3800_v10 = vld [vmem:[#allocation2 + $0x4d0] sm:$0xf]  ;;  %2520 = vmatpush.bf16.msra.mxu0 %v3381_v3  ;;  %v3353_v11 = vor.u32 %v4795_v6, %v3352_v5  ;;  %v3605_v12 = vor.u32 %v4858_v9, %v3604_v8  ;;  %v4907_v13 = vld [vmem:[#allocation2 + $0x4e8] sm:$0xf0]  ;;  %v3324_v14 = vld [vmem:[#allocation2 + $0x118] sm:$0xf] }
  0x10   :  { %2546 = vmatpush.bf16.msra.mxu2 %v3829_v7  ;;  %v3801_v15 = vor.u32 %v4907_v13, %v3800_v10  ;;  %v4788_v16 = vld [vmem:[#allocation2 + $0x130] sm:$0xf0]  ;;  %v3576_v17 = vld [vmem:[#allocation2 + $0x310] sm:$0xf]  ;;  %v4851_v18 = vld [vmem:[#allocation2 + $0x328] sm:$0xf0] }
  0x11   :  { %2533 = vmatpush.bf16.msra.mxu1 %v3605_v12  ;;  %v3577_v19 = vor.u32 %v4851_v18, %v3576_v17  ;;  %v3772_v20 = vld [vmem:[#allocation2 + $0x498] sm:$0xf]  ;;  %v4900_v21 = vld [vmem:[#allocation2 + $0x4b0] sm:$0xf0]  ;;  %v4052_v22 = vld [vmem:[#allocation2 + $0x6c8] sm:$0xf]  ;;  %v3325_v25 = vor.u32 %v4788_v16, %v3324_v14 }
  0x12   :  { %v4970_v23 = vld [vmem:[#allocation2 + $0x6e0] sm:$0xf0]  ;;  %v3548_v24 = vld [vmem:[#allocation2 + $0x2d8] sm:$0xf]  ;;  %v4844_v27 = vld [vmem:[#allocation2 + $0x2f0] sm:$0xf0]  ;;  %v3773_v28 = vor.u32 %v4900_v21, %v3772_v20 }
  0x13   :  { %2521 = vmatpush.bf16.msra.mxu0 %v3353_v11  ;;  %v4053_v26 = vor.u32 %v4970_v23, %v4052_v22  ;;  %v3296_v29 = vld [vmem:[#allocation2 + $0xe0] sm:$0xf]  ;;  %v4781_v30 = vld [vmem:[#allocation2 + $0xf8] sm:$0xf0]  ;;  %v4024_v31 = vld [vmem:[#allocation2 + $0x690] sm:$0xf]  ;;  %v3549_v32 = vor.u32 %v4844_v27, %v3548_v24 }
  0x14   :  { %2547 = vmatpush.bf16.msra.mxu2 %v3801_v15  ;;  %v3744_v33 = vld [vmem:[#allocation2 + $0x460] sm:$0xf]  ;;  %v4893_v34 = vld [vmem:[#allocation2 + $0x478] sm:$0xf0]  ;;  %v4963_v35 = vld [vmem:[#allocation2 + $0x6a8] sm:$0xf0]  ;;  %v3297_v39 = vor.u32 %v4781_v30, %v3296_v29 }
  0x15   :  { %2534 = vmatpush.bf16.msra.mxu1 %v3577_v19  ;;  %2559 = vmatpush.bf16.msra.mxu3 %v4053_v26  ;;  %v4025_v36 = vor.u32 %v4963_v35, %v4024_v31  ;;  %v3520_v37 = vld [vmem:[#allocation2 + $0x2a0] sm:$0xf]  ;;  %v4837_v38 = vld [vmem:[#allocation2 + $0x2b8] sm:$0xf0]  ;;  %v3996_v40 = vld [vmem:[#allocation2 + $0x658] sm:$0xf]  ;;  %v3745_v42 = vor.u32 %v4893_v34, %v3744_v33 }
  0x16   :  { %v4956_v41 = vld [vmem:[#allocation2 + $0x670] sm:$0xf0]  ;;  %v3268_v43 = vld [vmem:[#allocation2 + $0xa8] sm:$0xf]  ;;  %v4774_v44 = vld [vmem:[#allocation2 + $0xc0] sm:$0xf0]  ;;  %v3521_v45 = vor.u32 %v4837_v38, %v3520_v37 }
  0x17   :  { %2522 = vmatpush.bf16.msra.mxu0 %v3325_v25  ;;  %v3716_v46 = vld [vmem:[#allocation2 + $0x428] sm:$0xf]  ;;  %v4886_v47 = vld [vmem:[#allocation2 + $0x440] sm:$0xf0]  ;;  %v3997_v48 = vor.u32 %v4956_v41, %v3996_v40  ;;  %v3968_v51 = vld [vmem:[#allocation2 + $0x620] sm:$0xf]  ;;  %v3269_v53 = vor.u32 %v4774_v44, %v3268_v43 }
  0x18   :  { %2548 = vmatpush.bf16.msra.mxu2 %v3773_v28  ;;  %v3492_v49 = vld [vmem:[#allocation2 + $0x268] sm:$0xf]  ;;  %v4830_v50 = vld [vmem:[#allocation2 + $0x280] sm:$0xf0]  ;;  %v4949_v52 = vld [vmem:[#allocation2 + $0x638] sm:$0xf0]  ;;  %v3717_v54 = vor.u32 %v4886_v47, %v3716_v46 }
  0x19   :  { %2535 = vmatpush.bf16.msra.mxu1 %v3549_v32  ;;  %2560 = vmatpush.bf16.msra.mxu3 %v4025_v36  ;;  %v3240_v55 = vld [vmem:[#allocation2 + $0x70] sm:$0xf]  ;;  %v4767_v56 = vld [vmem:[#allocation2 + $0x88] sm:$0xf0]  ;;  %v3493_v57 = vor.u32 %v4830_v50, %v3492_v49  ;;  %v3969_v60 = vor.u32 %v4949_v52, %v3968_v51  ;;  %v3940_v63 = vld [vmem:[#allocation2 + $0x5e8] sm:$0xf] }
  0x1a   :  { %v3688_v58 = vld [vmem:[#allocation2 + $0x3f0] sm:$0xf]  ;;  %v4879_v59 = vld [vmem:[#allocation2 + $0x408] sm:$0xf0]  ;;  %v4942_v0 = vld [vmem:[#allocation2 + $0x600] sm:$0xf0]  ;;  %v3241_v1 = vor.u32 %v4767_v56, %v3240_v55 }
  0x1b   :  { %2523 = vmatpush.bf16.msra.mxu0 %v3297_v39  ;;  %v3464_v61 = vld [vmem:[#allocation2 + $0x230] sm:$0xf]  ;;  %v4823_v62 = vld [vmem:[#allocation2 + $0x248] sm:$0xf0]  ;;  %v3689_v2 = vor.u32 %v4879_v59, %v3688_v58  ;;  %v3212_v3 = vld [vmem:[#allocation2 + $0x38] sm:$0xf]  ;;  %v3941_v8 = vor.u32 %v4942_v0, %v3940_v63 }
  0x1c   :  { %2549 = vmatpush.bf16.msra.mxu2 %v3745_v42  ;;  %v4760_v4 = vld [vmem:[#allocation2 + $0x50] sm:$0xf0]  ;;  %v3465_v5 = vor.u32 %v4823_v62, %v3464_v61  ;;  %v3660_v6 = vld [vmem:[#allocation2 + $0x3b8] sm:$0xf]  ;;  %v3912_v11 = vld [vmem:[#allocation2 + $0x5b0] sm:$0xf] }
  0x1d   :  { %2536 = vmatpush.bf16.msra.mxu1 %v3521_v45  ;;  %2561 = vmatpush.bf16.msra.mxu3 %v3997_v48  ;;  %v4872_v7 = vld [vmem:[#allocation2 + $0x3d0] sm:$0xf0]  ;;  %v3436_v9 = vld [vmem:[#allocation2 + $0x1f8] sm:$0xf]  ;;  %v4935_v12 = vld [vmem:[#allocation2 + $0x5c8] sm:$0xf0]  ;;  %v3213_v13 = vor.u32 %v4760_v4, %v3212_v3 }
  0x1e   :  { %v4816_v10 = vld [vmem:[#allocation2 + $0x210] sm:$0xf0]  ;;  %v3184_v14 = vld [vmem:[#allocation2] sm:$0xf]  ;;  %v4753_v15 = vld [vmem:[#allocation2 + $0x18] sm:$0xf0]  ;;  %v3661_v16 = vor.u32 %v4872_v7, %v3660_v6  ;;  %v3913_v24 = vor.u32 %v4935_v12, %v3912_v11 }
  0x1f   :  { %2524 = vmatpush.bf16.msra.mxu0 %v3269_v53  ;;  %v4276_v17 = vld [vmem:[#allocation2 + $0x888] sm:$0xf]  ;;  %v5026_v18 = vld [vmem:[#allocation2 + $0x8a0] sm:$0xf0]  ;;  %v3632_v19 = vld [vmem:[#allocation2 + $0x380] sm:$0xf]  ;;  %v3437_v20 = vor.u32 %v4816_v10, %v3436_v9  ;;  %v3185_v28 = vor.u32 %v4753_v15, %v3184_v14 }
  0x20   :  { %2550 = vmatpush.bf16.msra.mxu2 %v3717_v54  ;;  %v4865_v21 = vld [vmem:[#allocation2 + $0x398] sm:$0xf0]  ;;  %v4724_v22 = vld [vmem:[#allocation2 + $0xc08] sm:$0xf]  ;;  %v5138_v23 = vld [vmem:[#allocation2 + $0xc20] sm:$0xf0]  ;;  %v4277_v32 = vor.u32 %v5026_v18, %v4276_v17 }
  0x21   :  { %2537 = vmatpush.bf16.msra.mxu1 %v3493_v57  ;;  %2562 = vmatpush.bf16.msra.mxu3 %v3969_v60  ;;  %v3408_v25 = vld [vmem:[#allocation2 + $0x1c0] sm:$0xf]  ;;  %v4809_v26 = vld [vmem:[#allocation2 + $0x1d8] sm:$0xf0]  ;;  %v4500_v27 = vld [vmem:[#allocation2 + $0xa48] sm:$0xf]  ;;  %v3633_v33 = vor.u32 %v4865_v21, %v3632_v19  ;;  %v4725_v34 = vor.u32 %v5138_v23, %v4724_v22 }
  0x22   :  { %v5082_v29 = vld [vmem:[#allocation2 + $0xa60] sm:$0xf0]  ;;  %v3884_v30 = vld [vmem:[#allocation2 + $0x578] sm:$0xf]  ;;  %v4928_v31 = vld [vmem:[#allocation2 + $0x590] sm:$0xf0]  ;;  %v3409_v37 = vor.u32 %v4809_v26, %v3408_v25 }
  0x23   :  { %2525 = vmatpush.bf16.msra.mxu0 %v3241_v1  ;;  %v4248_v35 = vld [vmem:[#allocation2 + $0x850] sm:$0xf]  ;;  %v5019_v36 = vld [vmem:[#allocation2 + $0x868] sm:$0xf0]  ;;  %v4501_v39 = vor.u32 %v5082_v29, %v4500_v27  ;;  %v3885_v41 = vor.u32 %v4928_v31, %v3884_v30  ;;  %v3856_v45 = vld [vmem:[#allocation2 + $0x540] sm:$0xf] }
  0x24   :  { %2551 = vmatpush.bf16.msra.mxu2 %v3689_v2  ;;  %v4696_v38 = vld [vmem:[#allocation2 + $0xbd0] sm:$0xf]  ;;  %v5131_v40 = vld [vmem:[#allocation2 + $0xbe8] sm:$0xf0]  ;;  %v4921_v46 = vld [vmem:[#allocation2 + $0x558] sm:$0xf0]  ;;  %v4249_v48 = vor.u32 %v5019_v36, %v4248_v35 }
  0x25   :  { %2538 = vmatpush.bf16.msra.mxu1 %v3465_v5  ;;  %2563 = vmatpush.bf16.msra.mxu3 %v3941_v8  ;;  %v4472_v42 = vld [vmem:[#allocation2 + $0xa10] sm:$0xf]  ;;  %v5075_v44 = vld [vmem:[#allocation2 + $0xa28] sm:$0xf0]  ;;  %v3382_v50 = vld [vmem:[#allocation2 + $0x1a4] sm:$0xf0]  ;;  %v4697_v52 = vor.u32 %v5131_v40, %v4696_v38  ;;  %v3857_v60 = vor.u32 %v4921_v46, %v3856_v45 }
  0x26   :  { %v44_v43 = vld [vmem:[#allocation5 + $0x10] sm:$0xff]  ;;  %v4799_v49 = vld [vmem:[#allocation2 + $0x18c] sm:$0xf]  ;;  %v42_v51 = vld [vmem:[#allocation5] sm:$0xff]  ;;  %v4473_v57 = vor.u32 %v5075_v44, %v4472_v42  ;;  %s5229_s0 = smov [#allocation7]   ;;  %s3171_s23 = sshll.u32 %s5367_s2, 4  ;;  %s3172_s23 = int_to_ptr.hbm [resolvable:$true] %s3171_s23 }
  0x27   :  { %2526 = vmatpush.bf16.msra.mxu0 %v3213_v13  ;;  %v5251_v47 = vpack.c.bf16 %v44_v43, %v44_v43  ;;  %v4220_v53 = vld [vmem:[#allocation2 + $0x818] sm:$0xf]  ;;  %v5012_v54 = vld [vmem:[#allocation2 + $0x830] sm:$0xf0]  ;;  %v5253_v55 = vpack.c.bf16 %v42_v51, %v42_v51  ;;  %v43_v56 = vld [vmem:[#allocation5 + $0x8] sm:$0xff]  ;;  %v3385_v62 = vor.u32 %v4799_v49, %v3382_v50  ;;  %s3169_s1 = sshll.u32 %s5229_s0, 4  ;;  %s3170_s1 = int_to_ptr.vmem [resolvable:$true] %s3169_s1 }
  0x28   :  { %2552 = vmatpush.bf16.msra.mxu2 %v3661_v16  ;;  %v4668_v58 = vld [vmem:[#allocation2 + $0xb98] sm:$0xf]  ;;  %v5124_v59 = vld [vmem:[#allocation2 + $0xbb0] sm:$0xf0]  ;;  %v5255_v61 = vpack.c.bf16 %v43_v56, %v43_v56  ;;  %v4221_v1 = vor.u32 %v5012_v54, %v4220_v53  ;;  %v3354_v3 = vld [vmem:[#allocation2 + $0x16c] sm:$0xf0] }
  0x29   :  { %2539 = vmatpush.bf16.msra.mxu1 %v3437_v20  ;;  %2564 = vmatpush.bf16.msra.mxu3 %v3913_v24  ;;  %v4444_v63 = vld [vmem:[#allocation2 + $0x9d8] sm:$0xf]  ;;  %v5068_v0 = vld [vmem:[#allocation2 + $0x9f0] sm:$0xf0]  ;;  %v4669_v4 = vor.u32 %v5124_v59, %v4668_v58  ;;  %v4192_v5 = vld [vmem:[#allocation2 + $0x7e0] sm:$0xf] }
  0x2a   :  { %v4792_v2 = vld [vmem:[#allocation2 + $0x154] sm:$0xf]  ;;  %v5005_v6 = vld [vmem:[#allocation2 + $0x7f8] sm:$0xf0]  ;;  %v4445_v7 = vor.u32 %v5068_v0, %v4444_v63  ;;  %v4640_v8 = vld [vmem:[#allocation2 + $0xb60] sm:$0xf] }
  0x2b   :  { %2527 = vmatpush.bf16.msra.mxu0 %v3185_v28  ;;  %v5117_v9 = vld [vmem:[#allocation2 + $0xb78] sm:$0xf0]  ;;  %v3357_v11 = vor.u32 %v4792_v2, %v3354_v3  ;;  %v4416_v12 = vld [vmem:[#allocation2 + $0x9a0] sm:$0xf]  ;;  %v4193_v15 = vor.u32 %v5005_v6, %v4192_v5  ;;  %v3326_v17 = vld [vmem:[#allocation2 + $0x134] sm:$0xf0] }
  0x2c   :  { %2553 = vmatpush.bf16.msra.mxu2 %v3633_v33  ;;  %v45_v10 = vld [vmem:[#allocation5 + $0x18] sm:$0xff]  ;;  %v4641_v18 = vor.u32 %v5117_v9, %v4640_v8  ;;  %v4164_v19 = vld [vmem:[#allocation2 + $0x7a8] sm:$0xf]  ;;  %v4998_v20 = vld [vmem:[#allocation2 + $0x7c0] sm:$0xf0] }
  0x2d   :  { %2540 = vmatpush.bf16.msra.mxu1 %v3409_v37  ;;  %2565 = vmatpush.bf16.msra.mxu3 %v3885_v41  ;;  %v5061_v13 = vld [vmem:[#allocation2 + $0x9b8] sm:$0xf0]  ;;  %v5260_v14 = vpack.c.bf16 %v45_v10, %v45_v10  ;;  %v4612_v22 = vld [vmem:[#allocation2 + $0xb28] sm:$0xf]  ;;  %v5110_v23 = vld [vmem:[#allocation2 + $0xb40] sm:$0xf0]  ;;  %v4165_v27 = vor.u32 %v4998_v20, %v4164_v19 }
  0x2e   :  { %2528 = vmatmul.bf16.vlgmr.msra.gmra.mxu0 %v5253_v55  ;;  %v4785_v16 = vld [vmem:[#allocation2 + $0x11c] sm:$0xf]  ;;  %v4417_v21 = vor.u32 %v5061_v13, %v4416_v12  ;;  %v4388_v25 = vld [vmem:[#allocation2 + $0x968] sm:$0xf]  ;;  %v5054_v26 = vld [vmem:[#allocation2 + $0x980] sm:$0xf0]  ;;  %v4613_v30 = vor.u32 %v5110_v23, %v4612_v22 }
  0x2f   :  { %2572 = vmatpush.bf16.msrb.mxu0 %v4277_v32  ;;  %2554 = vmatmul.bf16.vlgmr.msra.gmra.mxu2 %v5251_v47  ;;  %v3329_v24 = vor.u32 %v4785_v16, %v3326_v17  ;;  %v4778_v28 = vld [vmem:[#allocation2 + $0xe4] sm:$0xf]  ;;  %v3298_v29 = vld [vmem:[#allocation2 + $0xfc] sm:$0xf0]  ;;  %v4136_v31 = vld [vmem:[#allocation2 + $0x770] sm:$0xf]  ;;  %v4389_v33 = vor.u32 %v5054_v26, %v4388_v25 }
  0x30   :  { %2598 = vmatpush.bf16.msrb.mxu2 %v4725_v34  ;;  %2541 = vmatmul.bf16.vlgmr.msra.gmra.mxu1 %v5255_v61  ;;  %v4991_v32 = vld [vmem:[#allocation2 + $0x788] sm:$0xf0]  ;;  %v4584_v34 = vld [vmem:[#allocation2 + $0xaf0] sm:$0xf]  ;;  %v3301_v36 = vor.u32 %v4778_v28, %v3298_v29  ;;  %v3270_v41 = vld [vmem:[#allocation2 + $0xc4] sm:$0xf0] }
  0x31   :  { %2585 = vmatpush.bf16.msrb.mxu1 %v4501_v39  ;;  %2566 = vmatpush.bf16.msra.mxu3 %v3857_v60  ;;  %v5103_v35 = vld [vmem:[#allocation2 + $0xb08] sm:$0xf0]  ;;  %v4360_v37 = vld [vmem:[#allocation2 + $0x930] sm:$0xf]  ;;  %v4137_v39 = vor.u32 %v4991_v32, %v4136_v31  ;;  %v4108_v43 = vld [vmem:[#allocation2 + $0x738] sm:$0xf] }
  0x32   :  { %v5047_v38 = vld [vmem:[#allocation2 + $0x948] sm:$0xf0]  ;;  %v4585_v42 = vor.u32 %v5103_v35, %v4584_v34  ;;  %v4984_v44 = vld [vmem:[#allocation2 + $0x750] sm:$0xf0]  ;;  %v4556_v46 = vld [vmem:[#allocation2 + $0xab8] sm:$0xf] }
  0x33   :  { %2573 = vmatpush.bf16.msrb.mxu0 %v4249_v48  ;;  %v4771_v40 = vld [vmem:[#allocation2 + $0xac] sm:$0xf]  ;;  %v4361_v45 = vor.u32 %v5047_v38, %v4360_v37  ;;  %v5096_v48 = vld [vmem:[#allocation2 + $0xad0] sm:$0xf0]  ;;  %v4332_v50 = vld [vmem:[#allocation2 + $0x8f8] sm:$0xf] }
  0x34   :  { %2599 = vmatpush.bf16.msrb.mxu2 %v4697_v52  ;;  %2567 = vmatmul.bf16.vlgmr.msra.gmra.mxu3 %v5260_v14  ;;  %v3273_v49 = vor.u32 %v4771_v40, %v3270_v41  ;;  %v5040_v51 = vld [vmem:[#allocation2 + $0x910] sm:$0xf0]  ;;  %v4109_v52 = vor.u32 %v4984_v44, %v4108_v43  ;;  %v4080_v53 = vld [vmem:[#allocation2 + $0x700] sm:$0xf]  ;;  %v3242_v56 = vld [vmem:[#allocation2 + $0x8c] sm:$0xf0] }
  0x35   :  { %2586 = vmatpush.bf16.msrb.mxu1 %v4473_v57  ;;  %2611 = vmatpush.bf16.msrb.mxu3 %v3385_v62  ;;  %v4764_v54 = vld [vmem:[#allocation2 + $0x74] sm:$0xf]  ;;  %v4557_v57 = vor.u32 %v5096_v48, %v4556_v46  ;;  %v4977_v58 = vld [vmem:[#allocation2 + $0x718] sm:$0xf0]  ;;  %v4855_v59 = vld [vmem:[#allocation2 + $0x34c] sm:$0xf]  ;;  %v4333_v62 = vor.u32 %v5040_v51, %v4332_v50 }
  0x36   :  { %v3606_v60 = vld [vmem:[#allocation2 + $0x364] sm:$0xf0]  ;;  %v4528_v63 = vld [vmem:[#allocation2 + $0xa80] sm:$0xf]  ;;  %v5089_v0 = vld [vmem:[#allocation2 + $0xa98] sm:$0xf0]  ;;  %v3245_v3 = vor.u32 %v4764_v54, %v3242_v56  ;;  %v4081_v6 = vor.u32 %v4977_v58, %v4080_v53 }
  0x37   :  { %2574 = vmatpush.bf16.msrb.mxu0 %v4221_v1  ;;  %v4967_v1 = vld [vmem:[#allocation2 + $0x6cc] sm:$0xf]  ;;  %v4054_v2 = vld [vmem:[#allocation2 + $0x6e4] sm:$0xf0]  ;;  %v5033_v5 = vld [vmem:[#allocation2 + $0x8d8] sm:$0xf0]  ;;  %v3609_v10 = vor.u32 %v4855_v59, %v3606_v60 }
  0x38   :  { %2600 = vmatpush.bf16.msrb.mxu2 %v4669_v4  ;;  %v4304_v4 = vld [vmem:[#allocation2 + $0x8c0] sm:$0xf]  ;;  %v4911_v8 = vld [vmem:[#allocation2 + $0x50c] sm:$0xf]  ;;  %v3830_v9 = vld [vmem:[#allocation2 + $0x524] sm:$0xf0]  ;;  %v4057_v16 = vor.u32 %v4967_v1, %v4054_v2 }
  0x39   :  { %2587 = vmatpush.bf16.msrb.mxu1 %v4445_v7  ;;  %2612 = vmatpush.bf16.msrb.mxu3 %v3357_v11  ;;  %v46_v7 = vld [vmem:[#allocation5 + $0x20] sm:$0xff]  ;;  %v4529_v11 = vor.u32 %v5089_v0, %v4528_v63  ;;  %v48_v12 = vld [vmem:[#allocation5 + $0x30] sm:$0xff]  ;;  %v4757_v13 = vld [vmem:[#allocation2 + $0x3c] sm:$0xf]  ;;  %v4305_v19 = vor.u32 %v5033_v5, %v4304_v4  ;;  %v3833_v22 = vor.u32 %v4911_v8, %v3830_v9 }
  0x3a   :  { %v4848_v17 = vld [vmem:[#allocation2 + $0x314] sm:$0xf]  ;;  %v47_v20 = vld [vmem:[#allocation5 + $0x28] sm:$0xff]  ;;  %v5265_v25 = vpack.c.bf16 %v48_v12, %v48_v12  ;;  %v3802_v28 = vld [vmem:[#allocation2 + $0x4ec] sm:$0xf0] }
  0x3b   :  { %2575 = vmatpush.bf16.msrb.mxu0 %v4193_v15  ;;  %v3214_v15 = vld [vmem:[#allocation2 + $0x54] sm:$0xf0]  ;;  %v4960_v23 = vld [vmem:[#allocation2 + $0x694] sm:$0xf]  ;;  %v4841_v31 = vld [vmem:[#allocation2 + $0x2dc] sm:$0xf] }
  0x3c   :  { %2601 = vmatpush.bf16.msrb.mxu2 %v4641_v18  ;;  %v3578_v18 = vld [vmem:[#allocation2 + $0x32c] sm:$0xf0]  ;;  %v3217_v26 = vor.u32 %v4757_v13, %v3214_v15  ;;  %v4750_v32 = vld [vmem:[#allocation2 + $0x4] sm:$0xf]  ;;  %v3550_v35 = vld [vmem:[#allocation2 + $0x2f4] sm:$0xf0] }
  0x3d   :  { %2588 = vmatpush.bf16.msrb.mxu1 %v4417_v21  ;;  %2613 = vmatpush.bf16.msrb.mxu3 %v3329_v24  ;;  %v5263_v21 = vpack.c.bf16 %v46_v7, %v46_v7  ;;  %v4026_v24 = vld [vmem:[#allocation2 + $0x6ac] sm:$0xf0]  ;;  %v3581_v29 = vor.u32 %v4848_v17, %v3578_v18  ;;  %v4278_v37 = vld [vmem:[#allocation2 + $0x8a4] sm:$0xf0]  ;;  %v3998_v40 = vld [vmem:[#allocation2 + $0x674] sm:$0xf0]  ;;  %v3553_v44 = vor.u32 %v4841_v31, %v3550_v35 }
  0x3e   :  { %v4029_v34 = vor.u32 %v4960_v23, %v4026_v24  ;;  %v3774_v43 = vld [vmem:[#allocation2 + $0x4b4] sm:$0xf0]  ;;  %v5016_v50 = vld [vmem:[#allocation2 + $0x854] sm:$0xf]  ;;  %v4250_v51 = vld [vmem:[#allocation2 + $0x86c] sm:$0xf0] }
  0x3f   :  { %2576 = vmatpush.bf16.msrb.mxu0 %v4165_v27  ;;  %v4904_v27 = vld [vmem:[#allocation2 + $0x4d4] sm:$0xf]  ;;  %v4946_v53 = vld [vmem:[#allocation2 + $0x624] sm:$0xf]  ;;  %v3970_v54 = vld [vmem:[#allocation2 + $0x63c] sm:$0xf0]  ;;  %v4253_v60 = vor.u32 %v5016_v50, %v4250_v51 }
  0x40   :  { %2602 = vmatpush.bf16.msrb.mxu2 %v4613_v30  ;;  %v5267_v30 = vpack.c.bf16 %v47_v20, %v47_v20  ;;  %v3805_v38 = vor.u32 %v4904_v27, %v3802_v28  ;;  %v4890_v56 = vld [vmem:[#allocation2 + $0x464] sm:$0xf]  ;;  %v4827_v59 = vld [vmem:[#allocation2 + $0x26c] sm:$0xf]  ;;  %v3494_v63 = vld [vmem:[#allocation2 + $0x284] sm:$0xf0] }
  0x41   :  { %2589 = vmatpush.bf16.msrb.mxu1 %v4389_v33  ;;  %2614 = vmatpush.bf16.msrb.mxu3 %v3301_v36  ;;  %v3186_v33 = vld [vmem:[#allocation2 + $0x1c] sm:$0xf0]  ;;  %v5023_v36 = vld [vmem:[#allocation2 + $0x88c] sm:$0xf]  ;;  %v5009_v0 = vld [vmem:[#allocation2 + $0x81c] sm:$0xf]  ;;  %v3497_v7 = vor.u32 %v4827_v59, %v3494_v63 }
  0x42   :  { %v3189_v41 = vor.u32 %v4750_v32, %v3186_v33  ;;  %v4281_v46 = vor.u32 %v5023_v36, %v4278_v37  ;;  %v4222_v1 = vld [vmem:[#allocation2 + $0x834] sm:$0xf0]  ;;  %v3942_v4 = vld [vmem:[#allocation2 + $0x604] sm:$0xf0]  ;;  %v4883_v5 = vld [vmem:[#allocation2 + $0x42c] sm:$0xf] }
  0x43   :  { %2577 = vmatpush.bf16.msrb.mxu0 %v4137_v39  ;;  %v4953_v39 = vld [vmem:[#allocation2 + $0x65c] sm:$0xf]  ;;  %v4820_v8 = vld [vmem:[#allocation2 + $0x234] sm:$0xf]  ;;  %v4225_v9 = vor.u32 %v5009_v0, %v4222_v1  ;;  %v5002_v12 = vld [vmem:[#allocation2 + $0x7e4] sm:$0xf] }
  0x44   :  { %2603 = vmatpush.bf16.msrb.mxu2 %v4585_v42  ;;  %v4897_v42 = vld [vmem:[#allocation2 + $0x49c] sm:$0xf]  ;;  %v4001_v48 = vor.u32 %v4953_v39, %v3998_v40  ;;  %v4194_v13 = vld [vmem:[#allocation2 + $0x7fc] sm:$0xf0]  ;;  %v3914_v17 = vld [vmem:[#allocation2 + $0x5cc] sm:$0xf0] }
  0x45   :  { %2590 = vmatpush.bf16.msrb.mxu1 %v4361_v45  ;;  %2615 = vmatpush.bf16.msrb.mxu3 %v3273_v49  ;;  %v4834_v45 = vld [vmem:[#allocation2 + $0x2a4] sm:$0xf]  ;;  %v3522_v49 = vld [vmem:[#allocation2 + $0x2bc] sm:$0xf0]  ;;  %v4876_v18 = vld [vmem:[#allocation2 + $0x3f4] sm:$0xf]  ;;  %v4197_v23 = vor.u32 %v5002_v12, %v4194_v13 }
  0x46   :  { %v3525_v58 = vor.u32 %v4834_v45, %v3522_v49  ;;  %v4995_v27 = vld [vmem:[#allocation2 + $0x7ac] sm:$0xf]  ;;  %v4166_v28 = vld [vmem:[#allocation2 + $0x7c4] sm:$0xf0]  ;;  %v4925_v31 = vld [vmem:[#allocation2 + $0x57c] sm:$0xf] }
  0x47   :  { %2578 = vmatpush.bf16.msrb.mxu0 %v4109_v52  ;;  %v3777_v52 = vor.u32 %v4897_v42, %v3774_v43  ;;  %v3886_v32 = vld [vmem:[#allocation2 + $0x594] sm:$0xf0]  ;;  %v4869_v33 = vld [vmem:[#allocation2 + $0x3bc] sm:$0xf]  ;;  %v4806_v36 = vld [vmem:[#allocation2 + $0x1c4] sm:$0xf] }
  0x48   :  { %2604 = vmatpush.bf16.msrb.mxu2 %v4557_v57  ;;  %v3746_v57 = vld [vmem:[#allocation2 + $0x47c] sm:$0xf0]  ;;  %v5079_v39 = vld [vmem:[#allocation2 + $0xa4c] sm:$0xf]  ;;  %v3889_v40 = vor.u32 %v4925_v31, %v3886_v32  ;;  %v4988_v42 = vld [vmem:[#allocation2 + $0x774] sm:$0xf] }
  0x49   :  { %2591 = vmatpush.bf16.msrb.mxu1 %v4333_v62  ;;  %2616 = vmatpush.bf16.msrb.mxu3 %v3245_v3  ;;  %v3973_v62 = vor.u32 %v4946_v53, %v3970_v54  ;;  %v3749_v2 = vor.u32 %v4890_v56, %v3746_v57  ;;  %v4939_v3 = vld [vmem:[#allocation2 + $0x5ec] sm:$0xf]  ;;  %v3410_v37 = vld [vmem:[#allocation2 + $0x1dc] sm:$0xf0]  ;;  %v4138_v43 = vld [vmem:[#allocation2 + $0x78c] sm:$0xf0] }
  0x4a   :  { %v4918_v45 = vld [vmem:[#allocation2 + $0x544] sm:$0xf]  ;;  %v4803_v49 = vld [vmem:[#allocation2 + $0x1a8] sm:$0xf0]  ;;  %v3634_v51 = vld [vmem:[#allocation2 + $0x39c] sm:$0xf0]  ;;  %v4141_v53 = vor.u32 %v4988_v42, %v4138_v43 }
  0x4b   :  { %2579 = vmatpush.bf16.msrb.mxu0 %v4081_v6  ;;  %v3718_v6 = vld [vmem:[#allocation2 + $0x444] sm:$0xf0]  ;;  %v4862_v50 = vld [vmem:[#allocation2 + $0x384] sm:$0xf]  ;;  %v5135_v54 = vld [vmem:[#allocation2 + $0xc0c] sm:$0xf] }
  0x4c   :  { %2605 = vmatpush.bf16.msrb.mxu2 %v4529_v11  ;;  %v3466_v11 = vld [vmem:[#allocation2 + $0x24c] sm:$0xf0]  ;;  %v3721_v15 = vor.u32 %v4883_v5, %v3718_v6  ;;  %v4726_v56 = vld [vmem:[#allocation2 + $0xc24] sm:$0xf0]  ;;  %v4981_v59 = vld [vmem:[#allocation2 + $0x73c] sm:$0xf]  ;;  %v3637_v1 = vor.u32 %v4862_v50, %v3634_v51 }
  0x4d   :  { %2592 = vmatpush.bf16.msrb.mxu1 %v4305_v19  ;;  %2617 = vmatpush.bf16.msrb.mxu3 %v3217_v26  ;;  %v3690_v19 = vld [vmem:[#allocation2 + $0x40c] sm:$0xf0]  ;;  %v3469_v20 = vor.u32 %v4820_v8, %v3466_v11  ;;  %v3438_v26 = vld [vmem:[#allocation2 + $0x214] sm:$0xf0]  ;;  %v5072_v63 = vld [vmem:[#allocation2 + $0xa14] sm:$0xf] }
  0x4e   :  { %2580 = vmatmul.bf16.vlgmr.msrb.gmra.mxu0 %v5263_v21  ;;  %v4474_v0 = vld [vmem:[#allocation2 + $0xa2c] sm:$0xf0]  ;;  %v5128_v6 = vld [vmem:[#allocation2 + $0xbd4] sm:$0xf]  ;;  %v4082_v11 = vld [vmem:[#allocation2 + $0x71c] sm:$0xf0] }
  0x4f   :  { %2624 = vmatpush.bf16.msra.mxu0 %v3609_v10  ;;  %2606 = vmatmul.bf16.vlgmr.msrb.gmra.mxu2 %v5265_v25  ;;  %v3945_v10 = vor.u32 %v4939_v3, %v3942_v4  ;;  %v3360_v3 = vld [vmem:[#allocation2 + $0x158] sm:$0xf]  ;;  %v4796_v4 = vld [vmem:[#allocation2 + $0x170] sm:$0xf0]  ;;  %v4477_v8 = vor.u32 %v5072_v63, %v4474_v0  ;;  %v4390_v42 = vld [vmem:[#allocation2 + $0x984] sm:$0xf0] }
  0x50   :  { %2650 = vmatpush.bf16.msra.mxu2 %v4057_v16  ;;  %2593 = vmatmul.bf16.vlgmr.msrb.gmra.mxu1 %v5267_v30  ;;  %v4932_v16 = vld [vmem:[#allocation2 + $0x5b4] sm:$0xf]  ;;  %v3361_v12 = vor.u32 %v4796_v4, %v3360_v3  ;;  %v4446_v13 = vld [vmem:[#allocation2 + $0x9f4] sm:$0xf0]  ;;  %v3556_v43 = vld [vmem:[#allocation2 + $0x2e0] sm:$0xf] }
  0x51   :  { %2637 = vmatpush.bf16.msra.mxu1 %v3833_v22  ;;  %2618 = vmatpush.bf16.msrb.mxu3 %v3189_v41  ;;  %v4813_v22 = vld [vmem:[#allocation2 + $0x1fc] sm:$0xf]  ;;  %v3917_v24 = vor.u32 %v4932_v16, %v3914_v17  ;;  %v4502_v41 = vld [vmem:[#allocation2 + $0xa64] sm:$0xf0]  ;;  %v4859_v16 = vld [vmem:[#allocation2 + $0x368] sm:$0xf0] }
  0x52   :  { %v3441_v35 = vor.u32 %v4813_v22, %v3438_v26  ;;  %v4505_v57 = vor.u32 %v5079_v39, %v4502_v41  ;;  %v5121_v22 = vld [vmem:[#allocation2 + $0xb9c] sm:$0xf]  ;;  %v5058_v26 = vld [vmem:[#allocation2 + $0x9a4] sm:$0xf]  ;;  %v3584_v31 = vld [vmem:[#allocation2 + $0x318] sm:$0xf] }
  0x53   :  { %2625 = vmatpush.bf16.msra.mxu0 %v3581_v29  ;;  %v3693_v29 = vor.u32 %v4876_v18, %v3690_v19  ;;  %v3332_v18 = vld [vmem:[#allocation2 + $0x120] sm:$0xf]  ;;  %v4789_v19 = vld [vmem:[#allocation2 + $0x138] sm:$0xf0]  ;;  %v4852_v32 = vld [vmem:[#allocation2 + $0x330] sm:$0xf0] }
  0x54   :  { %2651 = vmatpush.bf16.msra.mxu2 %v4029_v34  ;;  %2619 = vmatmul.bf16.vlgmr.msrb.gmra.mxu3 %v5253_v55  ;;  %v3662_v34 = vld [vmem:[#allocation2 + $0x3d4] sm:$0xf0]  ;;  %v5051_v39 = vld [vmem:[#allocation2 + $0x96c] sm:$0xf]  ;;  %v4614_v50 = vld [vmem:[#allocation2 + $0xb44] sm:$0xf0] }
  0x55   :  { %2638 = vmatpush.bf16.msra.mxu1 %v3805_v38  ;;  %2663 = vmatpush.bf16.msra.mxu3 %v4281_v46  ;;  %v4169_v38 = vor.u32 %v4995_v27, %v4166_v28  ;;  %v3858_v46 = vld [vmem:[#allocation2 + $0x55c] sm:$0xf0]  ;;  %v3333_v28 = vor.u32 %v4789_v19, %v3332_v18  ;;  %v4393_v51 = vor.u32 %v5051_v39, %v4390_v42  ;;  %v5100_v63 = vld [vmem:[#allocation2 + $0xaf4] sm:$0xf]  ;;  %v4586_v0 = vld [vmem:[#allocation2 + $0xb0c] sm:$0xf0] }
  0x56   :  { %v3836_v18 = vld [vmem:[#allocation2 + $0x510] sm:$0xf]  ;;  %v3444_v39 = vld [vmem:[#allocation2 + $0x200] sm:$0xf]  ;;  %v3808_v42 = vld [vmem:[#allocation2 + $0x4d8] sm:$0xf] }
  0x57   :  { %2626 = vmatpush.bf16.msra.mxu0 %v3553_v44  ;;  %v3665_v44 = vor.u32 %v4869_v33, %v3662_v34  ;;  %v3304_v34 = vld [vmem:[#allocation2 + $0xe8] sm:$0xf] }
  0x58   :  { %2652 = vmatpush.bf16.msra.mxu2 %v4001_v48  ;;  %v3388_v48 = vld [vmem:[#allocation2 + $0x190] sm:$0xf] }
  0x59   :  { %2639 = vmatpush.bf16.msra.mxu1 %v3777_v52  ;;  %2664 = vmatpush.bf16.msra.mxu3 %v4253_v60  ;;  %v3413_v52 = vor.u32 %v4806_v36, %v3410_v37  ;;  %v4110_v60 = vld [vmem:[#allocation2 + $0x754] sm:$0xf0]  ;;  %v5114_v36 = vld [vmem:[#allocation2 + $0xb64] sm:$0xf]  ;;  %v4642_v37 = vld [vmem:[#allocation2 + $0xb7c] sm:$0xf0] }
  0x5a   :  { %v4113_v5 = vor.u32 %v4981_v59, %v4110_v60  ;;  %v3248_v60 = vld [vmem:[#allocation2 + $0x78] sm:$0xf] }
  0x5b   :  { %2627 = vmatpush.bf16.msra.mxu0 %v3525_v58  ;;  %v3861_v58 = vor.u32 %v4918_v45, %v3858_v46  ;;  %v4645_v45 = vor.u32 %v5114_v36, %v4642_v37  ;;  %v3276_v46 = vld [vmem:[#allocation2 + $0xb0] sm:$0xf]  ;;  %v4971_v36 = vld [vmem:[#allocation2 + $0x6e8] sm:$0xf0] }
  0x5c   :  { %2653 = vmatpush.bf16.msra.mxu2 %v3973_v62  ;;  %v3389_v62 = vor.u32 %v4803_v49, %v3388_v48  ;;  %v4775_v48 = vld [vmem:[#allocation2 + $0xc8] sm:$0xf0] }
  0x5d   :  { %2640 = vmatpush.bf16.msra.mxu1 %v3749_v2  ;;  %2665 = vmatpush.bf16.msra.mxu3 %v4225_v9  ;;  %v4729_v2 = vor.u32 %v5135_v54, %v4726_v56  ;;  %v5065_v9 = vld [vmem:[#allocation2 + $0x9dc] sm:$0xf]  ;;  %v5107_v49 = vld [vmem:[#allocation2 + $0xb2c] sm:$0xf]  ;;  %v3277_v54 = vor.u32 %v4775_v48, %v3276_v46  ;;  %v4362_v56 = vld [vmem:[#allocation2 + $0x94c] sm:$0xf0] }
  0x5e   :  { %v4617_v59 = vor.u32 %v5107_v49, %v4614_v50  ;;  %v4256_v46 = vld [vmem:[#allocation2 + $0x858] sm:$0xf]  ;;  %v5020_v48 = vld [vmem:[#allocation2 + $0x870] sm:$0xf0] }
  0x5f   :  { %2628 = vmatpush.bf16.msra.mxu0 %v3497_v7  ;;  %v4698_v7 = vld [vmem:[#allocation2 + $0xbec] sm:$0xf0]  ;;  %v4032_v50 = vld [vmem:[#allocation2 + $0x698] sm:$0xf] }
  0x60   :  { %2654 = vmatpush.bf16.msra.mxu2 %v3945_v10  ;;  %v4974_v10 = vld [vmem:[#allocation2 + $0x704] sm:$0xf]  ;;  %v4701_v17 = vor.u32 %v5128_v6, %v4698_v7  ;;  %v3500_v6 = vld [vmem:[#allocation2 + $0x270] sm:$0xf]  ;;  %v4831_v7 = vld [vmem:[#allocation2 + $0x288] sm:$0xf0] }
  0x61   :  { %2641 = vmatpush.bf16.msra.mxu1 %v3721_v15  ;;  %2666 = vmatpush.bf16.msra.mxu3 %v4197_v23  ;;  %v3612_v15 = vld [vmem:[#allocation2 + $0x350] sm:$0xf]  ;;  %v4670_v23 = vld [vmem:[#allocation2 + $0xbb4] sm:$0xf0] }
  0x62   :  { %v3613_v27 = vor.u32 %v4859_v16, %v3612_v15  ;;  %v4673_v33 = vor.u32 %v5121_v22, %v4670_v23  ;;  %v5030_v15 = vld [vmem:[#allocation2 + $0x8c4] sm:$0xf]  ;;  %v4306_v16 = vld [vmem:[#allocation2 + $0x8dc] sm:$0xf0]  ;;  %v3472_v22 = vld [vmem:[#allocation2 + $0x238] sm:$0xf] }
  0x63   :  { %2629 = vmatpush.bf16.msra.mxu0 %v3469_v20  ;;  %v4085_v20 = vor.u32 %v4974_v10, %v4082_v11  ;;  %v4761_v10 = vld [vmem:[#allocation2 + $0x58] sm:$0xf0]  ;;  %v4824_v23 = vld [vmem:[#allocation2 + $0x250] sm:$0xf0] }
  0x64   :  { %2655 = vmatpush.bf16.msra.mxu2 %v3917_v24  ;;  %v4449_v24 = vor.u32 %v5065_v9, %v4446_v13  ;;  %v3220_v9 = vld [vmem:[#allocation2 + $0x40] sm:$0xf]  ;;  %v5093_v11 = vld [vmem:[#allocation2 + $0xabc] sm:$0xf] }
  0x65   :  { %2642 = vmatpush.bf16.msra.mxu1 %v3693_v29  ;;  %2667 = vmatpush.bf16.msra.mxu3 %v4169_v38  ;;  %v4418_v29 = vld [vmem:[#allocation2 + $0x9bc] sm:$0xf0]  ;;  %v3221_v19 = vor.u32 %v4761_v10, %v3220_v9  ;;  %v4480_v9 = vld [vmem:[#allocation2 + $0xa18] sm:$0xf]  ;;  %v5076_v10 = vld [vmem:[#allocation2 + $0xa30] sm:$0xf0] }
  0x66   :  { %v4421_v38 = vor.u32 %v5058_v26, %v4418_v29  ;;  %v3192_v26 = vld [vmem:[#allocation2 + $0x8] sm:$0xf]  ;;  %v5027_v29 = vld [vmem:[#allocation2 + $0x8a8] sm:$0xf0] }
  0x67   :  { %2630 = vmatpush.bf16.msra.mxu0 %v3441_v35  ;;  %v4782_v35 = vld [vmem:[#allocation2 + $0x100] sm:$0xf0] }
  0x68   :  { %2656 = vmatpush.bf16.msra.mxu2 %v3889_v40  ;;  %v3585_v40 = vor.u32 %v4852_v32, %v3584_v31  ;;  %v3305_v41 = vor.u32 %v4782_v35, %v3304_v34  ;;  %v5086_v31 = vld [vmem:[#allocation2 + $0xa84] sm:$0xf]  ;;  %v4530_v32 = vld [vmem:[#allocation2 + $0xa9c] sm:$0xf0]  ;;  %v3473_v34 = vor.u32 %v4824_v23, %v3472_v22  ;;  %v4060_v35 = vld [vmem:[#allocation2 + $0x6d0] sm:$0xf] }
  0x69   :  { %2643 = vmatpush.bf16.msra.mxu1 %v3665_v44  ;;  %2668 = vmatpush.bf16.msra.mxu3 %v4141_v53  ;;  %v4845_v44 = vld [vmem:[#allocation2 + $0x2f8] sm:$0xf0]  ;;  %v4887_v22 = vld [vmem:[#allocation2 + $0x448] sm:$0xf0]  ;;  %v4452_v23 = vld [vmem:[#allocation2 + $0x9e0] sm:$0xf] }
  0x6a   :  { %v3557_v53 = vor.u32 %v4845_v44, %v3556_v43  ;;  %v4908_v43 = vld [vmem:[#allocation2 + $0x4f0] sm:$0xf0]  ;;  %v4533_v44 = vor.u32 %v5086_v31, %v4530_v32  ;;  %v4943_v31 = vld [vmem:[#allocation2 + $0x608] sm:$0xf0] }
  0x6b   :  { %2631 = vmatpush.bf16.msra.mxu0 %v3413_v52  ;;  %v5044_v52 = vld [vmem:[#allocation2 + $0x934] sm:$0xf] }
  0x6c   :  { %2657 = vmatpush.bf16.msra.mxu2 %v3861_v58  ;;  %v4838_v58 = vld [vmem:[#allocation2 + $0x2c0] sm:$0xf0] }
  0x6d   :  { %2644 = vmatpush.bf16.msra.mxu1 %v3637_v1  ;;  %2669 = vmatpush.bf16.msra.mxu3 %v4113_v5  ;;  %v4365_v1 = vor.u32 %v5044_v52, %v4362_v56  ;;  %v4334_v5 = vld [vmem:[#allocation2 + $0x914] sm:$0xf0]  ;;  %v3809_v52 = vor.u32 %v4908_v43, %v3808_v42  ;;  %v4810_v56 = vld [vmem:[#allocation2 + $0x1e0] sm:$0xf0]  ;;  %v4936_v43 = vld [vmem:[#allocation2 + $0x5d0] sm:$0xf0] }
  0x6e   :  { %2632 = vmatmul.bf16.vlgmr.msra.gmra.mxu0 %v5255_v61  ;;  %v3920_v42 = vld [vmem:[#allocation2 + $0x5b8] sm:$0xf] }
  0x6f   :  { %2676 = vmatpush.bf16.msrb.mxu0 %v4505_v57  ;;  %2658 = vmatmul.bf16.vlgmr.msra.gmra.mxu2 %v5260_v14  ;;  %v3528_v57 = vld [vmem:[#allocation2 + $0x2a8] sm:$0xf] }
  0x70   :  { %2702 = vmatpush.bf16.msrb.mxu2 %v3389_v62  ;;  %2645 = vmatmul.bf16.vlgmr.msra.gmra.mxu1 %v5251_v47  ;;  %v4768_v62 = vld [vmem:[#allocation2 + $0x90] sm:$0xf0]  ;;  %v3529_v3 = vor.u32 %v4838_v58, %v3528_v57  ;;  %v4257_v57 = vor.u32 %v5020_v48, %v4256_v46  ;;  %v4901_v58 = vld [vmem:[#allocation2 + $0x4b8] sm:$0xf0] }
  0x71   :  { %2689 = vmatpush.bf16.msrb.mxu1 %v4729_v2  ;;  %2670 = vmatpush.bf16.msra.mxu3 %v4085_v20  ;;  %v5037_v2 = vld [vmem:[#allocation2 + $0x8fc] sm:$0xf]  ;;  %v3249_v4 = vor.u32 %v4768_v62, %v3248_v60  ;;  %v4915_v20 = vld [vmem:[#allocation2 + $0x528] sm:$0xf0] }
  0x72   :  { %v4337_v13 = vor.u32 %v5037_v2, %v4334_v5  ;;  %v3837_v37 = vor.u32 %v4915_v20, %v3836_v18  ;;  %v5083_v60 = vld [vmem:[#allocation2 + $0xa68] sm:$0xf0]  ;;  %v4004_v2 = vld [vmem:[#allocation2 + $0x660] sm:$0xf]  ;;  %v3752_v5 = vld [vmem:[#allocation2 + $0x468] sm:$0xf] }
  0x73   :  { %2677 = vmatpush.bf16.msrb.mxu0 %v4477_v8  ;;  %v4589_v8 = vor.u32 %v5100_v63, %v4586_v0  ;;  %v4228_v63 = vld [vmem:[#allocation2 + $0x820] sm:$0xf]  ;;  %v5013_v0 = vld [vmem:[#allocation2 + $0x838] sm:$0xf0]  ;;  %v3724_v18 = vld [vmem:[#allocation2 + $0x430] sm:$0xf] }
  0x74   :  { %2703 = vmatpush.bf16.msrb.mxu2 %v3361_v12  ;;  %2671 = vmatmul.bf16.vlgmr.msra.gmra.mxu3 %v5263_v21  ;;  %v4558_v12 = vld [vmem:[#allocation2 + $0xad4] sm:$0xf0]  ;;  %v3725_v32 = vor.u32 %v4887_v22, %v3724_v18  ;;  %v4340_v18 = vld [vmem:[#allocation2 + $0x900] sm:$0xf] }
  0x75   :  { %2690 = vmatpush.bf16.msrb.mxu1 %v4701_v17  ;;  %2715 = vmatpush.bf16.msrb.mxu3 %v3613_v27  ;;  %v3501_v17 = vor.u32 %v4831_v7, %v3500_v6  ;;  %v4754_v27 = vld [vmem:[#allocation2 + $0x20] sm:$0xf0]  ;;  %v4229_v7 = vor.u32 %v5013_v0, %v4228_v63  ;;  %v4732_v63 = vld [vmem:[#allocation2 + $0xc10] sm:$0xf]  ;;  %v4704_v22 = vld [vmem:[#allocation2 + $0xbd8] sm:$0xf] }
  0x77   :  { %2678 = vmatpush.bf16.msrb.mxu0 %v4449_v24  ;;  %v4561_v24 = vor.u32 %v5093_v11, %v4558_v12  ;;  %v4200_v12 = vld [vmem:[#allocation2 + $0x7e8] sm:$0xf] }
  0x78   :  { %2704 = vmatpush.bf16.msrb.mxu2 %v3333_v28  ;;  %v4284_v28 = vld [vmem:[#allocation2 + $0x890] sm:$0xf] }
  0x79   :  { %2691 = vmatpush.bf16.msrb.mxu1 %v4673_v33  ;;  %2716 = vmatpush.bf16.msrb.mxu3 %v3585_v40  ;;  %v4309_v33 = vor.u32 %v5030_v15, %v4306_v16  ;;  %v4817_v40 = vld [vmem:[#allocation2 + $0x218] sm:$0xf0]  ;;  %v3976_v15 = vld [vmem:[#allocation2 + $0x628] sm:$0xf]  ;;  %v4950_v16 = vld [vmem:[#allocation2 + $0x640] sm:$0xf0] }
  0x7a   :  { %v3445_v49 = vor.u32 %v4817_v40, %v3444_v39  ;;  %v4144_v40 = vld [vmem:[#allocation2 + $0x778] sm:$0xf] }
  0x7b   :  { %2679 = vmatpush.bf16.msrb.mxu0 %v4421_v38  ;;  %v3193_v38 = vor.u32 %v4754_v27, %v3192_v26  ;;  %v3977_v26 = vor.u32 %v4950_v16, %v3976_v15  ;;  %v4172_v27 = vld [vmem:[#allocation2 + $0x7b0] sm:$0xf] }
  0x7c   :  { %2705 = vmatpush.bf16.msrb.mxu2 %v3305_v41  ;;  %v4285_v41 = vor.u32 %v5027_v29, %v4284_v28  ;;  %v4999_v28 = vld [vmem:[#allocation2 + $0x7c8] sm:$0xf0]  ;;  %v3948_v29 = vld [vmem:[#allocation2 + $0x5f0] sm:$0xf] }
  0x7d   :  { %2692 = vmatpush.bf16.msrb.mxu1 %v4645_v45  ;;  %2717 = vmatpush.bf16.msrb.mxu3 %v3557_v53  ;;  %v4061_v45 = vor.u32 %v4971_v36, %v4060_v35  ;;  %v3780_v53 = vld [vmem:[#allocation2 + $0x4a0] sm:$0xf]  ;;  %v4173_v35 = vor.u32 %v4999_v28, %v4172_v27  ;;  %v4880_v36 = vld [vmem:[#allocation2 + $0x410] sm:$0xf0]  ;;  %v3949_v39 = vor.u32 %v4943_v31, %v3948_v29  ;;  %v3390_v15 = vld [vmem:[#allocation2 + $0x1ac] sm:$0xf0] }
  0x7e   :  { %v4849_v27 = vld [vmem:[#allocation2 + $0x31c] sm:$0xf]  ;;  %v3586_v28 = vld [vmem:[#allocation2 + $0x334] sm:$0xf0] }
  0x7f   :  { %2680 = vmatpush.bf16.msrb.mxu0 %v4393_v51  ;;  %v4964_v51 = vld [vmem:[#allocation2 + $0x6b0] sm:$0xf0]  ;;  %v4793_v31 = vld [vmem:[#allocation2 + $0x15c] sm:$0xf] }
  0x80   :  { %2706 = vmatpush.bf16.msrb.mxu2 %v3277_v54  ;;  %v3416_v54 = vld [vmem:[#allocation2 + $0x1c8] sm:$0xf]  ;;  %v4033_v62 = vor.u32 %v4964_v51, %v4032_v50  ;;  %v4396_v50 = vld [vmem:[#allocation2 + $0x970] sm:$0xf]  ;;  %v5055_v51 = vld [vmem:[#allocation2 + $0x988] sm:$0xf0] }
  0x81   :  { %2693 = vmatpush.bf16.msrb.mxu1 %v4617_v59  ;;  %2718 = vmatpush.bf16.msrb.mxu3 %v3529_v3  ;;  %v4508_v59 = vld [vmem:[#allocation2 + $0xa50] sm:$0xf]  ;;  %v4957_v3 = vld [vmem:[#allocation2 + $0x678] sm:$0xf0] }
  0x82   :  { %v4509_v6 = vor.u32 %v5083_v60, %v4508_v59  ;;  %v4005_v11 = vor.u32 %v4957_v3, %v4004_v2  ;;  %v3640_v59 = vld [vmem:[#allocation2 + $0x388] sm:$0xf]  ;;  %v4866_v60 = vld [vmem:[#allocation2 + $0x3a0] sm:$0xf0]  ;;  %v4368_v2 = vld [vmem:[#allocation2 + $0x938] sm:$0xf] }
  0x83   :  { %2681 = vmatpush.bf16.msrb.mxu0 %v4365_v1  ;;  %v3417_v1 = vor.u32 %v4810_v56, %v3416_v54  ;;  %v4985_v54 = vld [vmem:[#allocation2 + $0x758] sm:$0xf0]  ;;  %v3892_v56 = vld [vmem:[#allocation2 + $0x580] sm:$0xf]  ;;  %v5048_v3 = vld [vmem:[#allocation2 + $0x950] sm:$0xf0] }
  0x84   :  { %2707 = vmatpush.bf16.msrb.mxu2 %v3249_v4  ;;  %v3781_v4 = vor.u32 %v4901_v58, %v3780_v53  ;;  %v4116_v53 = vld [vmem:[#allocation2 + $0x740] sm:$0xf] }
  0x85   :  { %2694 = vmatpush.bf16.msrb.mxu1 %v4589_v8  ;;  %2719 = vmatpush.bf16.msrb.mxu3 %v3501_v17  ;;  %v4894_v8 = vld [vmem:[#allocation2 + $0x480] sm:$0xf0]  ;;  %v4117_v0 = vor.u32 %v4985_v54, %v4116_v53  ;;  %v4905_v53 = vld [vmem:[#allocation2 + $0x4dc] sm:$0xf]  ;;  %v3810_v54 = vld [vmem:[#allocation2 + $0x4f4] sm:$0xf0] }
  0x86   :  { %v3753_v17 = vor.u32 %v4894_v8, %v3752_v5  ;;  %v4088_v5 = vld [vmem:[#allocation2 + $0x708] sm:$0xf]  ;;  %v3614_v8 = vld [vmem:[#allocation2 + $0x36c] sm:$0xf0] }
  0x87   :  { %2682 = vmatpush.bf16.msrb.mxu0 %v4337_v13  ;;  %v5006_v13 = vld [vmem:[#allocation2 + $0x800] sm:$0xf0] }
  0x88   :  { %2708 = vmatpush.bf16.msrb.mxu2 %v3221_v19  ;;  %v4481_v19 = vor.u32 %v5076_v10, %v4480_v9  ;;  %v4201_v20 = vor.u32 %v5006_v13, %v4200_v12  ;;  %v3864_v9 = vld [vmem:[#allocation2 + $0x548] sm:$0xf]  ;;  %v4922_v10 = vld [vmem:[#allocation2 + $0x560] sm:$0xf0]  ;;  %v4369_v12 = vor.u32 %v5048_v3, %v4368_v2  ;;  %v4800_v13 = vld [vmem:[#allocation2 + $0x194] sm:$0xf] }
  0x89   :  { %2695 = vmatpush.bf16.msrb.mxu1 %v4561_v24  ;;  %2720 = vmatpush.bf16.msrb.mxu3 %v3473_v34  ;;  %v5069_v24 = vld [vmem:[#allocation2 + $0x9f8] sm:$0xf0]  ;;  %v5111_v2 = vld [vmem:[#allocation2 + $0xb48] sm:$0xf0]  ;;  %v4898_v3 = vld [vmem:[#allocation2 + $0x4a4] sm:$0xf] }
  0x8a   :  { %v4453_v34 = vor.u32 %v5069_v24, %v4452_v23  ;;  %v5132_v23 = vld [vmem:[#allocation2 + $0xbf0] sm:$0xf0]  ;;  %v3865_v24 = vor.u32 %v4922_v10, %v3864_v9  ;;  %v3278_v9 = vld [vmem:[#allocation2 + $0xcc] sm:$0xf0] }
  0x8b   :  { %2683 = vmatpush.bf16.msrb.mxu0 %v4309_v33  ;;  %v3696_v33 = vld [vmem:[#allocation2 + $0x3f8] sm:$0xf] }
  0x8c   :  { %2709 = vmatpush.bf16.msrb.mxu2 %v3193_v38  ;;  %v5062_v38 = vld [vmem:[#allocation2 + $0x9c0] sm:$0xf0] }
  0x8d   :  { %2696 = vmatpush.bf16.msrb.mxu1 %v4533_v44  ;;  %2721 = vmatpush.bf16.msrb.mxu3 %v3445_v49  ;;  %v3697_v44 = vor.u32 %v4880_v36, %v3696_v33  ;;  %v4873_v49 = vld [vmem:[#allocation2 + $0x3d8] sm:$0xf0]  ;;  %v4705_v33 = vor.u32 %v5132_v23, %v4704_v22  ;;  %v5034_v36 = vld [vmem:[#allocation2 + $0x8e0] sm:$0xf0]  ;;  %v3474_v23 = vld [vmem:[#allocation2 + $0x254] sm:$0xf0] }
  0x8e   :  { %2684 = vmatmul.bf16.vlgmr.msrb.gmra.mxu0 %v5267_v30  ;;  %v4821_v22 = vld [vmem:[#allocation2 + $0x23c] sm:$0xf] }
  0x8f   :  { %2728 = vmatpush.bf16.msra.mxu0 %v3837_v37  ;;  %2710 = vmatmul.bf16.vlgmr.msrb.gmra.mxu2 %v5253_v55  ;;  %v4424_v37 = vld [vmem:[#allocation2 + $0x9a8] sm:$0xf] }
  0x90   :  { %2754 = vmatpush.bf16.msra.mxu2 %v4285_v41  ;;  %2697 = vmatmul.bf16.vlgmr.msrb.gmra.mxu1 %v5265_v25  ;;  %v4992_v41 = vld [vmem:[#allocation2 + $0x790] sm:$0xf0]  ;;  %v4425_v46 = vor.u32 %v5062_v38, %v4424_v37  ;;  %v3589_v37 = vor.u32 %v4849_v27, %v3586_v28  ;;  %v5125_v38 = vld [vmem:[#allocation2 + $0xbb8] sm:$0xf0]  ;;  %v4564_v28 = vld [vmem:[#allocation2 + $0xac0] sm:$0xf] }
  0x91   :  { %2741 = vmatpush.bf16.msra.mxu1 %v4061_v45  ;;  %2722 = vmatpush.bf16.msrb.mxu3 %v3417_v1  ;;  %v3668_v45 = vld [vmem:[#allocation2 + $0x3c0] sm:$0xf]  ;;  %v4145_v48 = vor.u32 %v4992_v41, %v4144_v40  ;;  %v5139_v1 = vld [vmem:[#allocation2 + $0xc28] sm:$0xf0]  ;;  %v3838_v40 = vld [vmem:[#allocation2 + $0x52c] sm:$0xf0] }
  0x92   :  { %v3669_v58 = vor.u32 %v4873_v49, %v3668_v45  ;;  %v4733_v16 = vor.u32 %v5139_v1, %v4732_v63  ;;  %v4786_v45 = vld [vmem:[#allocation2 + $0x124] sm:$0xf]  ;;  %v4648_v49 = vld [vmem:[#allocation2 + $0xb68] sm:$0xf]  ;;  %v4620_v63 = vld [vmem:[#allocation2 + $0xb30] sm:$0xf] }
  0x93   :  { %2729 = vmatpush.bf16.msra.mxu0 %v3809_v52  ;;  %v3921_v52 = vor.u32 %v4936_v43, %v3920_v42  ;;  %v4842_v42 = vld [vmem:[#allocation2 + $0x2e4] sm:$0xf]  ;;  %v3558_v43 = vld [vmem:[#allocation2 + $0x2fc] sm:$0xf0]  ;;  %v4621_v10 = vor.u32 %v5111_v2, %v4620_v63 }
  0x94   :  { %2755 = vmatpush.bf16.msra.mxu2 %v4257_v57  ;;  %2723 = vmatmul.bf16.vlgmr.msrb.gmra.mxu3 %v5255_v61  ;;  %v4929_v57 = vld [vmem:[#allocation2 + $0x598] sm:$0xf0] }
  0x95   :  { %2742 = vmatpush.bf16.msra.mxu1 %v4033_v62  ;;  %2767 = vmatpush.bf16.msra.mxu3 %v4509_v6  ;;  %v4397_v62 = vor.u32 %v5055_v51, %v4396_v50  ;;  %v4978_v6 = vld [vmem:[#allocation2 + $0x720] sm:$0xf0]  ;;  %v3561_v51 = vor.u32 %v4842_v42, %v3558_v43  ;;  %v4536_v42 = vld [vmem:[#allocation2 + $0xa88] sm:$0xf] }
  0x96   :  { %v5090_v43 = vld [vmem:[#allocation2 + $0xaa0] sm:$0xf0] }
  0x97   :  { %2730 = vmatpush.bf16.msra.mxu0 %v3781_v4  ;;  %v3893_v4 = vor.u32 %v4929_v57, %v3892_v56  ;;  %v4835_v57 = vld [vmem:[#allocation2 + $0x2ac] sm:$0xf] }
  0x98   :  { %2756 = vmatpush.bf16.msra.mxu2 %v4229_v7  ;;  %v4856_v7 = vld [vmem:[#allocation2 + $0x354] sm:$0xf] }
  0x99   :  { %2743 = vmatpush.bf16.msra.mxu1 %v4005_v11  ;;  %2768 = vmatpush.bf16.msra.mxu3 %v4481_v19  ;;  %v3641_v11 = vor.u32 %v4866_v60, %v3640_v59  ;;  %v5041_v19 = vld [vmem:[#allocation2 + $0x918] sm:$0xf0]  ;;  %v4779_v59 = vld [vmem:[#allocation2 + $0xec] sm:$0xf]  ;;  %v3306_v60 = vld [vmem:[#allocation2 + $0x104] sm:$0xf0] }
  0x9a   :  { %v4341_v29 = vor.u32 %v5041_v19, %v4340_v18  ;;  %v3754_v18 = vld [vmem:[#allocation2 + $0x484] sm:$0xf0] }
  0x9b   :  { %2731 = vmatpush.bf16.msra.mxu0 %v3753_v17  ;;  %v4089_v17 = vor.u32 %v4978_v6, %v4088_v5  ;;  %v3309_v5 = vor.u32 %v4779_v59, %v3306_v60  ;;  %v4828_v6 = vld [vmem:[#allocation2 + $0x274] sm:$0xf]  ;;  %v4751_v59 = vld [vmem:[#allocation2 + $0xc] sm:$0xf]  ;;  %v3194_v60 = vld [vmem:[#allocation2 + $0x24] sm:$0xf0] }
  0x9c   :  { %2757 = vmatpush.bf16.msra.mxu2 %v4201_v20  ;;  %v3617_v20 = vor.u32 %v4856_v7, %v3614_v8  ;;  %v3502_v7 = vld [vmem:[#allocation2 + $0x28c] sm:$0xf0]  ;;  %v4772_v8 = vld [vmem:[#allocation2 + $0xb4] sm:$0xf] }
  0x9d   :  { %2744 = vmatpush.bf16.msra.mxu1 %v3977_v26  ;;  %2769 = vmatpush.bf16.msra.mxu3 %v4453_v34  ;;  %v3393_v26 = vor.u32 %v4800_v13, %v3390_v15  ;;  %v4676_v34 = vld [vmem:[#allocation2 + $0xba0] sm:$0xf]  ;;  %v3505_v15 = vor.u32 %v4828_v6, %v3502_v7 }
  0x9e   :  { %v3670_v6 = vld [vmem:[#allocation2 + $0x3dc] sm:$0xf0] }
  0x9f   :  { %2732 = vmatpush.bf16.msra.mxu0 %v3725_v32  ;;  %v3362_v32 = vld [vmem:[#allocation2 + $0x174] sm:$0xf0] }
  0xa0   :  { %2758 = vmatpush.bf16.msra.mxu2 %v4173_v35  ;;  %v4312_v35 = vld [vmem:[#allocation2 + $0x8c8] sm:$0xf]  ;;  %v3365_v41 = vor.u32 %v4793_v31, %v3362_v32  ;;  %v3477_v31 = vor.u32 %v4821_v22, %v3474_v23  ;;  %v5097_v32 = vld [vmem:[#allocation2 + $0xad8] sm:$0xf0] }
  0xa1   :  { %2745 = vmatpush.bf16.msra.mxu1 %v3949_v39  ;;  %2770 = vmatpush.bf16.msra.mxu3 %v4425_v46  ;;  %v4912_v39 = vld [vmem:[#allocation2 + $0x514] sm:$0xf]  ;;  %v3334_v46 = vld [vmem:[#allocation2 + $0x13c] sm:$0xf0] }
  0xa2   :  { %v3841_v50 = vor.u32 %v4912_v39, %v3838_v40  ;;  %v3337_v56 = vor.u32 %v4786_v45, %v3334_v46  ;;  %v4758_v39 = vld [vmem:[#allocation2 + $0x44] sm:$0xf]  ;;  %v3222_v40 = vld [vmem:[#allocation2 + $0x5c] sm:$0xf0]  ;;  %v4968_v45 = vld [vmem:[#allocation2 + $0x6d4] sm:$0xf] }
  0xa3   :  { %2733 = vmatpush.bf16.msra.mxu0 %v3697_v44  ;;  %v4313_v44 = vor.u32 %v5034_v36, %v4312_v35  ;;  %v4814_v36 = vld [vmem:[#allocation2 + $0x204] sm:$0xf] }
  0xa4   :  { %2759 = vmatpush.bf16.msra.mxu2 %v4145_v48  ;;  %v4677_v48 = vor.u32 %v5125_v38, %v4676_v34  ;;  %v3726_v34 = vld [vmem:[#allocation2 + $0x44c] sm:$0xf0] }
  0xa5   :  { %2746 = vmatpush.bf16.msra.mxu1 %v3921_v52  ;;  %2771 = vmatpush.bf16.msra.mxu3 %v4397_v62  ;;  %v5118_v52 = vld [vmem:[#allocation2 + $0xb80] sm:$0xf0] }
  0xa6   :  { %v4649_v62 = vor.u32 %v5118_v52, %v4648_v49  ;;  %v4062_v49 = vld [vmem:[#allocation2 + $0x6ec] sm:$0xf0] }
  0xa7   :  { %2734 = vmatpush.bf16.msra.mxu0 %v3669_v58  ;;  %v3530_v58 = vld [vmem:[#allocation2 + $0x2c4] sm:$0xf0] }
  0xa8   :  { %2760 = vmatpush.bf16.msra.mxu2 %v4117_v0  ;;  %v3813_v0 = vor.u32 %v4905_v53, %v3810_v54  ;;  %v3533_v1 = vor.u32 %v4835_v57, %v3530_v58  ;;  %v3225_v53 = vor.u32 %v4758_v39, %v3222_v40  ;;  %v4807_v54 = vld [vmem:[#allocation2 + $0x1cc] sm:$0xf]  ;;  %v5080_v57 = vld [vmem:[#allocation2 + $0xa54] sm:$0xf]  ;;  %v4510_v58 = vld [vmem:[#allocation2 + $0xa6c] sm:$0xf0] }
  0xa9   :  { %2747 = vmatpush.bf16.msra.mxu1 %v3893_v4  ;;  %2772 = vmatpush.bf16.msra.mxu3 %v4369_v12  ;;  %v3782_v4 = vld [vmem:[#allocation2 + $0x4bc] sm:$0xf0]  ;;  %v4513_v7 = vor.u32 %v5080_v57, %v4510_v58  ;;  %v3950_v58 = vld [vmem:[#allocation2 + $0x60c] sm:$0xf0] }
  0xaa   :  { %v3785_v12 = vor.u32 %v4898_v3, %v3782_v4  ;;  %v4065_v3 = vor.u32 %v4968_v45, %v4062_v49  ;;  %v5129_v45 = vld [vmem:[#allocation2 + $0xbdc] sm:$0xf]  ;;  %v5059_v49 = vld [vmem:[#allocation2 + $0x9ac] sm:$0xf] }
  0xab   :  { %2735 = vmatpush.bf16.msra.mxu0 %v3641_v11  ;;  %v4592_v11 = vld [vmem:[#allocation2 + $0xaf8] sm:$0xf]  ;;  %v5285_v13 = vpop.f32.mrf.mxu0 }
  0xac   :  { %2761 = vmatpush.bf16.msra.mxu2 %v4089_v17  ;;  %v4891_v17 = vld [vmem:[#allocation2 + $0x46c] sm:$0xf] }
  0xad   :  { %2748 = vmatpush.bf16.msra.mxu1 %v3865_v24  ;;  %2773 = vmatpush.bf16.msra.mxu3 %v4341_v29  ;;  %v5287_v19 = vpop.f32.mrf.mxu1  ;;  %v4765_v24 = vld [vmem:[#allocation2 + $0x7c] sm:$0xf]  ;;  %v3757_v29 = vor.u32 %v4891_v17, %v3754_v18 }
  0xae   :  { %2736 = vmatmul.bf16.vlgmr.msra.gmra.mxu0 %v5251_v47  ;;  %v5017_v18 = vld [vmem:[#allocation2 + $0x85c] sm:$0xf]  ;;  %v2543_v22 = vadd.f32 %v5287_v19, %v5285_v13  ;;  %v5010_v13 = vld [vmem:[#allocation2 + $0x824] sm:$0xf]  ;;  %v4230_v19 = vld [vmem:[#allocation2 + $0x83c] sm:$0xf0] }
  0xaf   :  { %2780 = vmatpush.bf16.msrb.mxu0 %v4733_v16  ;;  %2762 = vmatmul.bf16.vlgmr.msra.gmra.mxu2 %v5263_v21  ;;  %v5104_v16 = vld [vmem:[#allocation2 + $0xb10] sm:$0xf0] }
  0xb0   :  { %2806 = vmatpush.bf16.msrb.mxu2 %v3617_v20  ;;  %2749 = vmatmul.bf16.vlgmr.msra.gmra.mxu1 %v5260_v14  ;;  %v3281_v20 = vor.u32 %v4772_v8, %v3278_v9  ;;  %v4593_v27 = vor.u32 %v5104_v16, %v4592_v11  ;;  %v4961_v8 = vld [vmem:[#allocation2 + $0x69c] sm:$0xf]  ;;  %v4034_v9 = vld [vmem:[#allocation2 + $0x6b4] sm:$0xf0] }
  0xb1   :  { %2793 = vmatpush.bf16.msrb.mxu1 %v3393_v26  ;;  %2774 = vmatpush.bf16.msra.mxu3 %v4313_v44  ;;  %v3250_v26 = vld [vmem:[#allocation2 + $0x94] sm:$0xf0]  ;;  %v4037_v23 = vor.u32 %v4961_v8, %v4034_v9 }
  0xb2   :  { %v3253_v35 = vor.u32 %v4765_v24, %v3250_v26  ;;  %v5289_v38 = vpop.f32.mrf.mxu2  ;;  %v4482_v16 = vld [vmem:[#allocation2 + $0xa34] sm:$0xf0]  ;;  %v4954_v24 = vld [vmem:[#allocation2 + $0x664] sm:$0xf]  ;;  %v4863_v26 = vld [vmem:[#allocation2 + $0x38c] sm:$0xf] }
  0xb3   :  { %2781 = vmatpush.bf16.msrb.mxu0 %v4705_v33  ;;  %v4884_v33 = vld [vmem:[#allocation2 + $0x434] sm:$0xf]  ;;  %v2531_v46 = vpop.f32.mrf.mxu0  ;;  %v2556_v39 = vadd.f32 %v5289_v38, %v2543_v22  ;;  %v4146_v22 = vld [vmem:[#allocation2 + $0x794] sm:$0xf0] }
  0xb4   :  { %2807 = vmatpush.bf16.msrb.mxu2 %v3589_v37  ;;  %2775 = vmatmul.bf16.vlgmr.msra.gmra.mxu3 %v5267_v30  ;;  %v3446_v37 = vld [vmem:[#allocation2 + $0x21c] sm:$0xf0]  ;;  %v3729_v44 = vor.u32 %v4884_v33, %v3726_v34  ;;  %v5066_v34 = vld [vmem:[#allocation2 + $0x9e4] sm:$0xf]  ;;  %v4706_v46 = vld [vmem:[#allocation2 + $0xbf4] sm:$0xf0] }
  0xb5   :  { %2794 = vmatpush.bf16.msrb.mxu1 %v3365_v41  ;;  %2819 = vmatpush.bf16.msrb.mxu3 %v3841_v50  ;;  %v4565_v41 = vor.u32 %v5097_v32, %v4564_v28  ;;  %v4877_v50 = vld [vmem:[#allocation2 + $0x3fc] sm:$0xf]  ;;  %v2544_v52 = vpop.f32.mrf.mxu1  ;;  %v4734_v32 = vld [vmem:[#allocation2 + $0xc2c] sm:$0xf0] }
  0xb6   :  { %v4202_v52 = vld [vmem:[#allocation2 + $0x804] sm:$0xf0] }
  0xb7   :  { %2782 = vmatpush.bf16.msrb.mxu0 %v4677_v48  ;;  %v3449_v48 = vor.u32 %v4814_v36, %v3446_v37  ;;  %v5291_v2 = vpop.f32.mrf.mxu3 }
  0xb8   :  { %2808 = vmatpush.bf16.msrb.mxu2 %v3561_v51  ;;  %v3698_v51 = vld [vmem:[#allocation2 + $0x414] sm:$0xf0] }
  0xb9   :  { %2795 = vmatpush.bf16.msrb.mxu1 %v3337_v56  ;;  %2820 = vmatpush.bf16.msrb.mxu3 %v3813_v0  ;;  %v3418_v56 = vld [vmem:[#allocation2 + $0x1e4] sm:$0xf0]  ;;  %v3701_v63 = vor.u32 %v4877_v50, %v3698_v51  ;;  %v5024_v0 = vld [vmem:[#allocation2 + $0x894] sm:$0xf]  ;;  %v5003_v51 = vld [vmem:[#allocation2 + $0x7ec] sm:$0xf] }
  0xba   :  { %v3421_v4 = vor.u32 %v4807_v54, %v3418_v56  ;;  %v2557_v11 = vpop.f32.mrf.mxu2  ;;  %v4426_v50 = vld [vmem:[#allocation2 + $0x9c4] sm:$0xf0]  ;;  %v4940_v54 = vld [vmem:[#allocation2 + $0x5f4] sm:$0xf]  ;;  %v4709_v56 = vor.u32 %v5129_v45, %v4706_v46  ;;  %v5101_v46 = vld [vmem:[#allocation2 + $0xafc] sm:$0xf] }
  0xbb   :  { %2783 = vmatpush.bf16.msrb.mxu0 %v4649_v62  ;;  %v4537_v62 = vor.u32 %v5090_v43, %v4536_v42  ;;  %v4429_v57 = vor.u32 %v5059_v49, %v4426_v50  ;;  %v5115_v11 = vld [vmem:[#allocation2 + $0xb6c] sm:$0xf] }
  0xbc   :  { %2809 = vmatpush.bf16.msrb.mxu2 %v3533_v1  ;;  %v4286_v1 = vld [vmem:[#allocation2 + $0x8ac] sm:$0xf0] }
  0xbd   :  { %2796 = vmatpush.bf16.msrb.mxu1 %v3309_v5  ;;  %2821 = vmatpush.bf16.msrb.mxu3 %v3785_v12  ;;  %v4870_v5 = vld [vmem:[#allocation2 + $0x3c4] sm:$0xf]  ;;  %v4289_v12 = vor.u32 %v5024_v0, %v4286_v1  ;;  %v4398_v0 = vld [vmem:[#allocation2 + $0x98c] sm:$0xf0] }
  0xbe   :  { %v3673_v17 = vor.u32 %v4870_v5, %v3670_v6  ;;  %v4933_v6 = vld [vmem:[#allocation2 + $0x5bc] sm:$0xf] }
  0xbf   :  { %2784 = vmatpush.bf16.msrb.mxu0 %v4621_v10  ;;  %v3197_v10 = vor.u32 %v4751_v59, %v3194_v60  ;;  %v2570_v37 = vpop.f32.mrf.mxu3  ;;  %v5122_v59 = vld [vmem:[#allocation2 + $0xba4] sm:$0xf]  ;;  %v4678_v60 = vld [vmem:[#allocation2 + $0xbbc] sm:$0xf0] }
  0xc0   :  { %2810 = vmatpush.bf16.msrb.mxu2 %v3505_v15  ;;  %v5073_v15 = vld [vmem:[#allocation2 + $0xa1c] sm:$0xf]  ;;  %v4118_v37 = vld [vmem:[#allocation2 + $0x75c] sm:$0xf0] }
  0xc1   :  { %2797 = vmatpush.bf16.msrb.mxu1 %v3281_v20  ;;  %2822 = vmatpush.bf16.msrb.mxu3 %v3757_v29  ;;  %v4258_v20 = vld [vmem:[#allocation2 + $0x874] sm:$0xf0]  ;;  %v4485_v28 = vor.u32 %v5073_v15, %v4482_v16  ;;  %v4006_v29 = vld [vmem:[#allocation2 + $0x67c] sm:$0xf0]  ;;  %v5045_v16 = vld [vmem:[#allocation2 + $0x93c] sm:$0xf] }
  0xc2   :  { %v4261_v33 = vor.u32 %v5017_v18, %v4258_v20  ;;  %v4009_v40 = vor.u32 %v4954_v24, %v4006_v29  ;;  %v4989_v20 = vld [vmem:[#allocation2 + $0x77c] sm:$0xf]  ;;  %v4926_v24 = vld [vmem:[#allocation2 + $0x584] sm:$0xf]  ;;  %v5108_v29 = vld [vmem:[#allocation2 + $0xb34] sm:$0xf] }
  0xc3   :  { %2785 = vmatpush.bf16.msrb.mxu0 %v4593_v27  ;;  %v3642_v27 = vld [vmem:[#allocation2 + $0x3a4] sm:$0xf0] }
  0xc4   :  { %2811 = vmatpush.bf16.msrb.mxu2 %v3477_v31  ;;  %v5136_v31 = vld [vmem:[#allocation2 + $0xc14] sm:$0xf]  ;;  %v3645_v36 = vor.u32 %v4863_v26, %v3642_v27 }
  0xc5   :  { %2798 = vmatpush.bf16.msrb.mxu1 %v3253_v35  ;;  %2823 = vmatpush.bf16.msrb.mxu3 %v3729_v44  ;;  %v4454_v35 = vld [vmem:[#allocation2 + $0x9fc] sm:$0xf0]  ;;  %v4737_v42 = vor.u32 %v5136_v31, %v4734_v32  ;;  %v3978_v44 = vld [vmem:[#allocation2 + $0x644] sm:$0xf0]  ;;  %v4622_v31 = vld [vmem:[#allocation2 + $0xb4c] sm:$0xf0] }
  0xc6   :  { %v4457_v43 = vor.u32 %v5066_v34, %v4454_v35  ;;  %v5038_v34 = vld [vmem:[#allocation2 + $0x904] sm:$0xf]  ;;  %v4342_v35 = vld [vmem:[#allocation2 + $0x91c] sm:$0xf0] }
  0xc7   :  { %2786 = vmatpush.bf16.msrb.mxu0 %v4565_v41  ;;  %v4947_v41 = vld [vmem:[#allocation2 + $0x62c] sm:$0xf]  ;;  %v4345_v45 = vor.u32 %v5038_v34, %v4342_v35  ;;  %v3312_v35 = vld [vmem:[#allocation2 + $0xf0] sm:$0xf] }
  0xc8   :  { %2812 = vmatpush.bf16.msrb.mxu2 %v3449_v48  ;;  %v4233_v48 = vor.u32 %v5010_v13, %v4230_v19  ;;  %v3981_v38 = vor.u32 %v4947_v41, %v3978_v44  ;;  %v4919_v13 = vld [vmem:[#allocation2 + $0x54c] sm:$0xf]  ;;  %v4982_v19 = vld [vmem:[#allocation2 + $0x744] sm:$0xf]  ;;  %v3866_v41 = vld [vmem:[#allocation2 + $0x564] sm:$0xf0] }
  0xc9   :  { %2799 = vmatpush.bf16.msrb.mxu1 %v3225_v53  ;;  %2824 = vmatpush.bf16.msrb.mxu3 %v3701_v63  ;;  %v2569_v53 = vadd.f32 %v5291_v2, %v2556_v39  ;;  %v5052_v63 = vld [vmem:[#allocation2 + $0x974] sm:$0xf]  ;;  %v3953_v2 = vor.u32 %v4940_v54, %v3950_v58  ;;  %v4121_v50 = vor.u32 %v4982_v19, %v4118_v37  ;;  %v4975_v54 = vld [vmem:[#allocation2 + $0x70c] sm:$0xf] }
  0xca   :  { %v4401_v9 = vor.u32 %v5052_v63, %v4398_v0  ;;  %v4804_v44 = vld [vmem:[#allocation2 + $0x1b0] sm:$0xf0]  ;;  %v5094_v0 = vld [vmem:[#allocation2 + $0xac4] sm:$0xf]  ;;  %v4783_v37 = vld [vmem:[#allocation2 + $0x108] sm:$0xf0] }
  0xcb   :  { %2787 = vmatpush.bf16.msrb.mxu0 %v4537_v62  ;;  %v4205_v62 = vor.u32 %v5003_v51, %v4202_v52  ;;  %v2581_v1 = vpop.f32.mrf.mxu0  ;;  %v5031_v51 = vld [vmem:[#allocation2 + $0x8cc] sm:$0xf]  ;;  %v4314_v52 = vld [vmem:[#allocation2 + $0x8e4] sm:$0xf0] }
  0xcc   :  { %2813 = vmatpush.bf16.msrb.mxu2 %v3421_v4  ;;  %v4174_v4 = vld [vmem:[#allocation2 + $0x7cc] sm:$0xf0]  ;;  %v2582_v5 = vadd.f32 %v2581_v1, %v2569_v53  ;;  %v4916_v53 = vld [vmem:[#allocation2 + $0x530] sm:$0xf0]  ;;  %v4317_v63 = vor.u32 %v5031_v51, %v4314_v52  ;;  %v4566_v1 = vld [vmem:[#allocation2 + $0xadc] sm:$0xf0] }
  0xcd   :  { %2800 = vmatpush.bf16.msrb.mxu1 %v3197_v10  ;;  %2825 = vmatpush.bf16.msrb.mxu3 %v3673_v17  ;;  %v2594_v8 = vpop.f32.mrf.mxu1  ;;  %v3922_v10 = vld [vmem:[#allocation2 + $0x5d4] sm:$0xf0]  ;;  %v4776_v51 = vld [vmem:[#allocation2 + $0xd0] sm:$0xf0]  ;;  %v4012_v52 = vld [vmem:[#allocation2 + $0x668] sm:$0xf] }
  0xce   :  { %2788 = vmatmul.bf16.vlgmr.msrb.gmra.mxu0 %v5265_v25  ;;  %v4370_v17 = vld [vmem:[#allocation2 + $0x954] sm:$0xf0]  ;;  %v2595_v18 = vadd.f32 %v2594_v8, %v2582_v5  ;;  %v3368_v5 = vld [vmem:[#allocation2 + $0x160] sm:$0xf] }
  0xcf   :  { %2832 = vmatpush.bf16.msra.mxu0 %v4065_v3  ;;  %2814 = vmatmul.bf16.vlgmr.msrb.gmra.mxu2 %v5255_v61  ;;  %v4996_v3 = vld [vmem:[#allocation2 + $0x7b4] sm:$0xf]  ;;  %v4373_v27 = vor.u32 %v5045_v16, %v4370_v17  ;;  %v3340_v17 = vld [vmem:[#allocation2 + $0x128] sm:$0xf] }
  0xd0   :  { %2858 = vmatpush.bf16.msra.mxu2 %v4513_v7  ;;  %2801 = vmatmul.bf16.vlgmr.msrb.gmra.mxu1 %v5253_v55  ;;  %v4681_v7 = vor.u32 %v5122_v59, %v4678_v60  ;;  %v4177_v15 = vor.u32 %v4996_v3, %v4174_v4  ;;  %v3620_v59 = vld [vmem:[#allocation2 + $0x358] sm:$0xf]  ;;  %v4860_v60 = vld [vmem:[#allocation2 + $0x370] sm:$0xf0] }
  0xd1   :  { %2845 = vmatpush.bf16.msra.mxu1 %v4289_v12  ;;  %2826 = vmatpush.bf16.msrb.mxu3 %v3645_v36  ;;  %v4650_v12 = vld [vmem:[#allocation2 + $0xb84] sm:$0xf0]  ;;  %v3621_v8 = vor.u32 %v4860_v60, %v3620_v59 }
  0xd2   :  { %v4653_v26 = vor.u32 %v5115_v11, %v4650_v12  ;;  %v2607_v32 = vpop.f32.mrf.mxu2  ;;  %v4569_v11 = vor.u32 %v5094_v0, %v4566_v1  ;;  %v3592_v12 = vld [vmem:[#allocation2 + $0x320] sm:$0xf]  ;;  %v4769_v1 = vld [vmem:[#allocation2 + $0x98] sm:$0xf0] }
  0xd3   :  { %2833 = vmatpush.bf16.msra.mxu0 %v4037_v23  ;;  %v3925_v23 = vor.u32 %v4933_v6, %v3922_v10  ;;  %v2608_v36 = vadd.f32 %v2607_v32, %v2595_v18  ;;  %v2583_v39 = vpop.f32.mrf.mxu0  ;;  %v4909_v10 = vld [vmem:[#allocation2 + $0x4f8] sm:$0xf0]  ;;  %v5087_v18 = vld [vmem:[#allocation2 + $0xa8c] sm:$0xf]  ;;  %v3564_v32 = vld [vmem:[#allocation2 + $0x2e8] sm:$0xf] }
  0xd4   :  { %2859 = vmatpush.bf16.msra.mxu2 %v4485_v28  ;;  %2827 = vmatmul.bf16.vlgmr.msrb.gmra.mxu3 %v5251_v47  ;;  %v3894_v28 = vld [vmem:[#allocation2 + $0x59c] sm:$0xf0] }
  0xd5   :  { %2846 = vmatpush.bf16.msra.mxu1 %v4261_v33  ;;  %2871 = vmatpush.bf16.msra.mxu3 %v4737_v42  ;;  %v4149_v33 = vor.u32 %v4989_v20, %v4146_v22  ;;  %v4625_v42 = vor.u32 %v5108_v29, %v4622_v31  ;;  %3157 = vst [vmem:[#allocation7] sm:$0xff] %v2608_v36  ;;  %v2596_v49 = vpop.f32.mrf.mxu1  ;;  %v4538_v20 = vld [vmem:[#allocation2 + $0xaa4] sm:$0xf0]  ;;  %v4902_v29 = vld [vmem:[#allocation2 + $0x4c0] sm:$0xf0] }
  0xd6   :  { %v4541_v31 = vor.u32 %v5087_v18, %v4538_v20  ;;  %v4040_v39 = vld [vmem:[#allocation2 + $0x6a0] sm:$0xf]  ;;  %v3956_v18 = vld [vmem:[#allocation2 + $0x5f8] sm:$0xf]  ;;  %v4944_v20 = vld [vmem:[#allocation2 + $0x610] sm:$0xf0] }
  0xd7   :  { %2834 = vmatpush.bf16.msra.mxu0 %v4009_v40  ;;  %v3897_v40 = vor.u32 %v4926_v24, %v3894_v28  ;;  %v5301_v3 = vpop.f32.mrf.mxu3  ;;  %v4068_v24 = vld [vmem:[#allocation2 + $0x6d8] sm:$0xf]  ;;  %v3788_v28 = vld [vmem:[#allocation2 + $0x4a8] sm:$0xf] }
  0xd8   :  { %2860 = vmatpush.bf16.msra.mxu2 %v4457_v43  ;;  %v3396_v43 = vld [vmem:[#allocation2 + $0x198] sm:$0xf]  ;;  %v3789_v19 = vor.u32 %v4902_v29, %v3788_v28  ;;  %v4818_v28 = vld [vmem:[#allocation2 + $0x220] sm:$0xf0] }
  0xd9   :  { %2847 = vmatpush.bf16.msra.mxu1 %v4233_v48  ;;  %2872 = vmatpush.bf16.msra.mxu3 %v4709_v56  ;;  %v4594_v48 = vld [vmem:[#allocation2 + $0xb14] sm:$0xf0]  ;;  %v4090_v56 = vld [vmem:[#allocation2 + $0x724] sm:$0xf0] }
  0xda   :  { %v4597_v58 = vor.u32 %v5101_v46, %v4594_v48  ;;  %v4093_v6 = vor.u32 %v4975_v54, %v4090_v56  ;;  %v3313_v46 = vor.u32 %v4783_v37, %v3312_v35  ;;  %v3284_v48 = vld [vmem:[#allocation2 + $0xb8] sm:$0xf]  ;;  %v4888_v56 = vld [vmem:[#allocation2 + $0x450] sm:$0xf0]  ;;  %v4937_v37 = vld [vmem:[#allocation2 + $0x5d8] sm:$0xf0] }
  0xdb   :  { %2835 = vmatpush.bf16.msra.mxu0 %v3981_v38  ;;  %v3844_v38 = vld [vmem:[#allocation2 + $0x518] sm:$0xf]  ;;  %v3285_v60 = vor.u32 %v4776_v51, %v3284_v48  ;;  %v5084_v51 = vld [vmem:[#allocation2 + $0xa70] sm:$0xf0] }
  0xdc   :  { %2861 = vmatpush.bf16.msra.mxu2 %v4429_v57  ;;  %v3869_v57 = vor.u32 %v4919_v13, %v3866_v41  ;;  %v3845_v4 = vor.u32 %v4916_v53, %v3844_v38  ;;  %v4958_v38 = vld [vmem:[#allocation2 + $0x680] sm:$0xf0]  ;;  %v3732_v54 = vld [vmem:[#allocation2 + $0x438] sm:$0xf] }
  0xdd   :  { %2848 = vmatpush.bf16.msra.mxu1 %v4205_v62  ;;  %2873 = vmatpush.bf16.msra.mxu3 %v4681_v7  ;;  %v3397_v62 = vor.u32 %v4804_v44, %v3396_v43  ;;  %v2609_v7 = vpop.f32.mrf.mxu2  ;;  %v4895_v43 = vld [vmem:[#allocation2 + $0x488] sm:$0xf0]  ;;  %v3536_v44 = vld [vmem:[#allocation2 + $0x2b0] sm:$0xf]  ;;  %v3733_v0 = vor.u32 %v4888_v56, %v3732_v54  ;;  %v4292_v35 = vld [vmem:[#allocation2 + $0x898] sm:$0xf] }
  0xde   :  { %v3704_v7 = vld [vmem:[#allocation2 + $0x400] sm:$0xf]  ;;  %v3900_v54 = vld [vmem:[#allocation2 + $0x588] sm:$0xf]  ;;  %v4930_v56 = vld [vmem:[#allocation2 + $0x5a0] sm:$0xf0] }
  0xdf   :  { %2836 = vmatpush.bf16.msra.mxu0 %v3953_v2  ;;  %v4797_v2 = vld [vmem:[#allocation2 + $0x178] sm:$0xf0]  ;;  %v2622_v13 = vpop.f32.mrf.mxu3 }
  0xe0   :  { %2862 = vmatpush.bf16.msra.mxu2 %v4401_v9  ;;  %v3816_v9 = vld [vmem:[#allocation2 + $0x4e0] sm:$0xf]  ;;  %v3369_v16 = vor.u32 %v4797_v2, %v3368_v5  ;;  %v4951_v5 = vld [vmem:[#allocation2 + $0x648] sm:$0xf0]  ;;  %v5028_v13 = vld [vmem:[#allocation2 + $0x8b0] sm:$0xf0] }
  0xe1   :  { %2849 = vmatpush.bf16.msra.mxu1 %v4177_v15  ;;  %2874 = vmatpush.bf16.msra.mxu3 %v4653_v26  ;;  %v4853_v15 = vld [vmem:[#allocation2 + $0x338] sm:$0xf0]  ;;  %v3817_v22 = vor.u32 %v4909_v10, %v3816_v9  ;;  %v4972_v26 = vld [vmem:[#allocation2 + $0x6f0] sm:$0xf0]  ;;  %v3480_v9 = vld [vmem:[#allocation2 + $0x240] sm:$0xf] }
  0xe2   :  { %v4069_v36 = vor.u32 %v4972_v26, %v4068_v24  ;;  %v4825_v10 = vld [vmem:[#allocation2 + $0x258] sm:$0xf0]  ;;  %v4874_v24 = vld [vmem:[#allocation2 + $0x3e0] sm:$0xf0] }
  0xe3   :  { %2837 = vmatpush.bf16.msra.mxu0 %v3925_v23  ;;  %v4790_v23 = vld [vmem:[#allocation2 + $0x140] sm:$0xf0] }
  0xe4   :  { %2863 = vmatpush.bf16.msra.mxu2 %v4373_v27  ;;  %v3593_v27 = vor.u32 %v4853_v15, %v3592_v12  ;;  %v3341_v34 = vor.u32 %v4790_v23, %v3340_v17  ;;  %v3228_v12 = vld [vmem:[#allocation2 + $0x48] sm:$0xf]  ;;  %v4762_v17 = vld [vmem:[#allocation2 + $0x60] sm:$0xf0] }
  0xe5   :  { %2850 = vmatpush.bf16.msra.mxu1 %v4149_v33  ;;  %2875 = vmatpush.bf16.msra.mxu3 %v4625_v42  ;;  %v4846_v33 = vld [vmem:[#allocation2 + $0x300] sm:$0xf0]  ;;  %v3760_v42 = vld [vmem:[#allocation2 + $0x470] sm:$0xf]  ;;  %v3676_v23 = vld [vmem:[#allocation2 + $0x3c8] sm:$0xf] }
  0xe6   :  { %v3565_v41 = vor.u32 %v4846_v33, %v3564_v32  ;;  %v3200_v32 = vld [vmem:[#allocation2 + $0x10] sm:$0xf]  ;;  %v4755_v33 = vld [vmem:[#allocation2 + $0x28] sm:$0xf0] }
  0xe7   :  { %2838 = vmatpush.bf16.msra.mxu0 %v3897_v40  ;;  %v4965_v40 = vld [vmem:[#allocation2 + $0x6b8] sm:$0xf0]  ;;  %v3201_v48 = vor.u32 %v4755_v33, %v3200_v32 }
  0xe8   :  { %2864 = vmatpush.bf16.msra.mxu2 %v4345_v45  ;;  %v4839_v45 = vld [vmem:[#allocation2 + $0x2c8] sm:$0xf0]  ;;  %v4041_v49 = vor.u32 %v4965_v40, %v4040_v39 }
  0xe9   :  { %2851 = vmatpush.bf16.msra.mxu1 %v4121_v50  ;;  %2876 = vmatpush.bf16.msra.mxu3 %v4597_v58  ;;  %v3761_v50 = vor.u32 %v4895_v43, %v3760_v42  ;;  %v3537_v53 = vor.u32 %v4839_v45, %v3536_v44  ;;  %v4832_v58 = vld [vmem:[#allocation2 + $0x290] sm:$0xf0]  ;;  %v4867_v42 = vld [vmem:[#allocation2 + $0x3a8] sm:$0xf0]  ;;  %v4740_v43 = vld [vmem:[#allocation2 + $0xc18] sm:$0xf] }
  0xea   :  { %v5140_v44 = vld [vmem:[#allocation2 + $0xc30] sm:$0xf0]  ;;  %v3424_v45 = vld [vmem:[#allocation2 + $0x1d0] sm:$0xf] }
  0xeb   :  { %2839 = vmatpush.bf16.msra.mxu0 %v3869_v57  ;;  %v3508_v57 = vld [vmem:[#allocation2 + $0x278] sm:$0xf]  ;;  %v5307_v59 = vpop.f32.mrf.mxu0 }
  0xec   :  { %2865 = vmatpush.bf16.msra.mxu2 %v4317_v63  ;;  %v4013_v63 = vor.u32 %v4958_v38, %v4012_v52  ;;  %v4293_v52 = vor.u32 %v5028_v13, %v4292_v35  ;;  %v2634_v38 = vadd.f32 %v5307_v59, %v5301_v3  ;;  %v4794_v35 = vld [vmem:[#allocation2 + $0x164] sm:$0xf] }
  0xed   :  { %2852 = vmatpush.bf16.msra.mxu1 %v4093_v6  ;;  %2877 = vmatpush.bf16.msra.mxu3 %v4569_v11  ;;  %v5309_v2 = vpop.f32.mrf.mxu1  ;;  %v3509_v6 = vor.u32 %v4832_v58, %v3508_v57  ;;  %v4741_v58 = vor.u32 %v5140_v44, %v4740_v43 }
  0xee   :  { %2840 = vmatmul.bf16.vlgmr.msra.gmra.mxu0 %v5260_v14  ;;  %v2647_v3 = vadd.f32 %v5309_v2, %v2634_v38  ;;  %v5070_v2 = vld [vmem:[#allocation2 + $0xa00] sm:$0xf0]  ;;  %v4404_v38 = vld [vmem:[#allocation2 + $0x978] sm:$0xf] }
  0xef   :  { %2884 = vmatpush.bf16.msrb.mxu0 %v3397_v62  ;;  %2866 = vmatmul.bf16.vlgmr.msra.gmra.mxu2 %v5267_v30  ;;  %v3256_v62 = vld [vmem:[#allocation2 + $0x80] sm:$0xf] }
  0xf0   :  { %2910 = vmatpush.bf16.msrb.mxu2 %v3845_v4  ;;  %2853 = vmatmul.bf16.vlgmr.msra.gmra.mxu1 %v5263_v21  ;;  %v3984_v4 = vld [vmem:[#allocation2 + $0x630] sm:$0xf]  ;;  %v3257_v11 = vor.u32 %v4769_v1, %v3256_v62  ;;  %v5021_v62 = vld [vmem:[#allocation2 + $0x878] sm:$0xf0] }
  0xf1   :  { %2897 = vmatpush.bf16.msrb.mxu1 %v3621_v8  ;;  %2878 = vmatpush.bf16.msra.mxu3 %v4541_v31  ;;  %v4881_v8 = vld [vmem:[#allocation2 + $0x418] sm:$0xf0]  ;;  %v3985_v15 = vor.u32 %v4951_v5, %v3984_v4  ;;  %v3229_v31 = vor.u32 %v4762_v17, %v3228_v12  ;;  %v4712_v4 = vld [vmem:[#allocation2 + $0xbe0] sm:$0xf]  ;;  %v3398_v17 = vld [vmem:[#allocation2 + $0x1b4] sm:$0xf0] }
  0xf2   :  { %v5311_v26 = vpop.f32.mrf.mxu2  ;;  %v5133_v5 = vld [vmem:[#allocation2 + $0xbf8] sm:$0xf0] }
  0xf3   :  { %2885 = vmatpush.bf16.msrb.mxu0 %v3369_v16  ;;  %v3705_v16 = vor.u32 %v4881_v8, %v3704_v7  ;;  %v2635_v29 = vpop.f32.mrf.mxu0  ;;  %v4488_v7 = vld [vmem:[#allocation2 + $0xa20] sm:$0xf]  ;;  %v5077_v8 = vld [vmem:[#allocation2 + $0xa38] sm:$0xf0]  ;;  %v4713_v12 = vor.u32 %v5133_v5, %v4712_v4 }
  0xf4   :  { %2911 = vmatpush.bf16.msrb.mxu2 %v3817_v22  ;;  %2879 = vmatmul.bf16.vlgmr.msra.gmra.mxu3 %v5265_v25  ;;  %v3481_v22 = vor.u32 %v4825_v10, %v3480_v9  ;;  %v4236_v9 = vld [vmem:[#allocation2 + $0x828] sm:$0xf]  ;;  %v3872_v10 = vld [vmem:[#allocation2 + $0x550] sm:$0xf]  ;;  %v2660_v29 = vadd.f32 %v5311_v26, %v2647_v3  ;;  %v5049_v3 = vld [vmem:[#allocation2 + $0x958] sm:$0xf0] }
  0xf5   :  { %2898 = vmatpush.bf16.msrb.mxu1 %v3593_v27  ;;  %2923 = vmatpush.bf16.msrb.mxu3 %v4069_v36  ;;  %v3452_v27 = vld [vmem:[#allocation2 + $0x208] sm:$0xf]  ;;  %v3677_v36 = vor.u32 %v4874_v24, %v3676_v23  ;;  %v2648_v39 = vpop.f32.mrf.mxu1 }
  0xf6   :  { %v3453_v40 = vor.u32 %v4818_v28, %v3452_v27  ;;  %v4460_v24 = vld [vmem:[#allocation2 + $0x9e8] sm:$0xf]  ;;  %v4208_v28 = vld [vmem:[#allocation2 + $0x7f0] sm:$0xf] }
  0xf7   :  { %2886 = vmatpush.bf16.msrb.mxu0 %v3341_v34  ;;  %v3957_v34 = vor.u32 %v4944_v20, %v3956_v18  ;;  %v2672_v57 = vpop.f32.mrf.mxu3  ;;  %v4489_v18 = vor.u32 %v5077_v8, %v4488_v7  ;;  %v4684_v20 = vld [vmem:[#allocation2 + $0xba8] sm:$0xf]  ;;  %v4461_v13 = vor.u32 %v5070_v2, %v4460_v24  ;;  %v4432_v39 = vld [vmem:[#allocation2 + $0x9b0] sm:$0xf]  ;;  %v5105_v7 = vld [vmem:[#allocation2 + $0xb18] sm:$0xf0] }
  0xf8   :  { %2912 = vmatpush.bf16.msrb.mxu2 %v3789_v19  ;;  %v3928_v19 = vld [vmem:[#allocation2 + $0x5c0] sm:$0xf]  ;;  %v2673_v26 = vadd.f32 %v2672_v57, %v2660_v29 }
  0xf9   :  { %2899 = vmatpush.bf16.msrb.mxu1 %v3565_v41  ;;  %2924 = vmatpush.bf16.msrb.mxu3 %v4041_v49  ;;  %v3648_v41 = vld [vmem:[#allocation2 + $0x390] sm:$0xf]  ;;  %v3929_v49 = vor.u32 %v4937_v37, %v3928_v19  ;;  %v5119_v37 = vld [vmem:[#allocation2 + $0xb88] sm:$0xf0]  ;;  %v4152_v57 = vld [vmem:[#allocation2 + $0x780] sm:$0xf] }
  0xfa   :  { %v4656_v19 = vld [vmem:[#allocation2 + $0xb70] sm:$0xf]  ;;  %v4376_v8 = vld [vmem:[#allocation2 + $0x940] sm:$0xf] }
  0xfb   :  { %2887 = vmatpush.bf16.msrb.mxu0 %v3313_v46  ;;  %v4811_v46 = vld [vmem:[#allocation2 + $0x1e8] sm:$0xf0]  ;;  %v4657_v44 = vor.u32 %v5119_v37, %v4656_v19  ;;  %v4544_v37 = vld [vmem:[#allocation2 + $0xa90] sm:$0xf] }
  0xfc   :  { %2913 = vmatpush.bf16.msrb.mxu2 %v3761_v50  ;;  %v4516_v50 = vld [vmem:[#allocation2 + $0xa58] sm:$0xf] }
  0xfd   :  { %2900 = vmatpush.bf16.msrb.mxu1 %v3537_v53  ;;  %2925 = vmatpush.bf16.msrb.mxu3 %v4013_v63  ;;  %v3649_v53 = vor.u32 %v4867_v42, %v3648_v41  ;;  %v3425_v63 = vor.u32 %v4811_v46, %v3424_v45  ;;  %v4517_v1 = vor.u32 %v5084_v51, %v4516_v50  ;;  %v4180_v42 = vld [vmem:[#allocation2 + $0x7b8] sm:$0xf]  ;;  %v5000_v45 = vld [vmem:[#allocation2 + $0x7d0] sm:$0xf0]  ;;  %v4787_v46 = vld [vmem:[#allocation2 + $0x12c] sm:$0xf] }
  0xfe   :  { %v4628_v50 = vld [vmem:[#allocation2 + $0xb38] sm:$0xf]  ;;  %v5112_v51 = vld [vmem:[#allocation2 + $0xb50] sm:$0xf0] }
  0xff   :  { %2888 = vmatpush.bf16.msrb.mxu0 %v3285_v60  ;;  %v4264_v60 = vld [vmem:[#allocation2 + $0x860] sm:$0xf]  ;;  %v2674_v32 = vpop.f32.mrf.mxu3 }
 0x100   :  { %2914 = vmatpush.bf16.msrb.mxu2 %v3733_v0  ;;  %v2661_v0 = vpop.f32.mrf.mxu2  ;;  %v4265_v59 = vor.u32 %v5021_v62, %v4264_v60  ;;  %v4629_v60 = vor.u32 %v5112_v51, %v4628_v50  ;;  %v4759_v50 = vld [vmem:[#allocation2 + $0x4c] sm:$0xf]  ;;  %v3230_v51 = vld [vmem:[#allocation2 + $0x64] sm:$0xf0] }
 0x101   :  { %2901 = vmatpush.bf16.msrb.mxu1 %v3509_v6  ;;  %2926 = vmatpush.bf16.msrb.mxu3 %v3985_v15  ;;  %v3901_v6 = vor.u32 %v4930_v56, %v3900_v54  ;;  %v5014_v15 = vld [vmem:[#allocation2 + $0x840] sm:$0xf0]  ;;  %v4181_v54 = vor.u32 %v5000_v45, %v4180_v42  ;;  %v4780_v0 = vld [vmem:[#allocation2 + $0xf4] sm:$0xf]  ;;  %v4070_v42 = vld [vmem:[#allocation2 + $0x6f4] sm:$0xf0] }
 0x102   :  { %v4237_v27 = vor.u32 %v5014_v15, %v4236_v9  ;;  %v4124_v9 = vld [vmem:[#allocation2 + $0x748] sm:$0xf]  ;;  %v4773_v15 = vld [vmem:[#allocation2 + $0xbc] sm:$0xf] }
 0x103   :  { %2889 = vmatpush.bf16.msrb.mxu0 %v3257_v11  ;;  %v4923_v11 = vld [vmem:[#allocation2 + $0x568] sm:$0xf0]  ;;  %v4913_v45 = vld [vmem:[#allocation2 + $0x51c] sm:$0xf] }
 0x104   :  { %2915 = vmatpush.bf16.msrb.mxu2 %v3705_v16  ;;  %v4801_v16 = vld [vmem:[#allocation2 + $0x19c] sm:$0xf]  ;;  %v3873_v23 = vor.u32 %v4923_v11, %v3872_v10 }
 0x105   :  { %2902 = vmatpush.bf16.msrb.mxu1 %v3481_v22  ;;  %2927 = vmatpush.bf16.msrb.mxu3 %v3957_v34  ;;  %v5126_v22 = vld [vmem:[#allocation2 + $0xbc0] sm:$0xf0]  ;;  %v5007_v34 = vld [vmem:[#allocation2 + $0x808] sm:$0xf0] }
 0x106   :  { %v4685_v33 = vor.u32 %v5126_v22, %v4684_v20  ;;  %v4209_v41 = vor.u32 %v5007_v34, %v4208_v28  ;;  %v5098_v20 = vld [vmem:[#allocation2 + $0xae0] sm:$0xf0]  ;;  %v4348_v22 = vld [vmem:[#allocation2 + $0x908] sm:$0xf]  ;;  %v4979_v28 = vld [vmem:[#allocation2 + $0x728] sm:$0xf0] }
 0x107   :  { %2890 = vmatpush.bf16.msrb.mxu0 %v3229_v31  ;;  %v3401_v31 = vor.u32 %v4801_v16, %v3398_v17  ;;  %v3286_v16 = vld [vmem:[#allocation2 + $0xd4] sm:$0xf0]  ;;  %v4377_v17 = vor.u32 %v5049_v3, %v4376_v8  ;;  %v4766_v34 = vld [vmem:[#allocation2 + $0x84] sm:$0xf]  ;;  %v3566_v8 = vld [vmem:[#allocation2 + $0x304] sm:$0xf0] }
 0x108   :  { %2916 = vmatpush.bf16.msrb.mxu2 %v3677_v36  ;;  %v3370_v36 = vld [vmem:[#allocation2 + $0x17c] sm:$0xf0]  ;;  %v3289_v29 = vor.u32 %v4773_v15, %v3286_v16  ;;  %v5025_v3 = vld [vmem:[#allocation2 + $0x89c] sm:$0xf]  ;;  %v4899_v16 = vld [vmem:[#allocation2 + $0x4ac] sm:$0xf] }
 0x109   :  { %2903 = vmatpush.bf16.msrb.mxu1 %v3453_v40  ;;  %2928 = vmatpush.bf16.msrb.mxu3 %v3929_v49  ;;  %v5063_v40 = vld [vmem:[#allocation2 + $0x9c8] sm:$0xf0]  ;;  %v3373_v43 = vor.u32 %v4794_v35, %v3370_v36  ;;  %v3258_v35 = vld [vmem:[#allocation2 + $0x9c] sm:$0xf0] }
 0x10a   :  { %v4433_v49 = vor.u32 %v5063_v40, %v4432_v39  ;;  %v5091_v39 = vld [vmem:[#allocation2 + $0xaa8] sm:$0xf0]  ;;  %v4320_v40 = vld [vmem:[#allocation2 + $0x8d0] sm:$0xf] }
 0x10b   :  { %2891 = vmatpush.bf16.msrb.mxu0 %v3201_v48  ;;  %v3342_v48 = vld [vmem:[#allocation2 + $0x144] sm:$0xf0] }
 0x10c   :  { %2917 = vmatpush.bf16.msrb.mxu2 %v3649_v53  ;;  %v5056_v53 = vld [vmem:[#allocation2 + $0x990] sm:$0xf0] }
 0x10d   :  { %2904 = vmatpush.bf16.msrb.mxu1 %v3425_v63  ;;  %2929 = vmatpush.bf16.msrb.mxu3 %v3901_v6  ;;  %v2698_v62 = vpop.f32.mrf.mxu1  ;;  %v4993_v63 = vld [vmem:[#allocation2 + $0x798] sm:$0xf0]  ;;  %v4405_v5 = vor.u32 %v5056_v53, %v4404_v38  ;;  %v4600_v6 = vld [vmem:[#allocation2 + $0xb00] sm:$0xf]  ;;  %v4850_v38 = vld [vmem:[#allocation2 + $0x324] sm:$0xf] }
 0x10e   :  { %2892 = vmatmul.bf16.vlgmr.msrb.gmra.mxu0 %v5253_v55  ;;  %v4601_v11 = vor.u32 %v5105_v7, %v4600_v6  ;;  %v3594_v53 = vld [vmem:[#allocation2 + $0x33c] sm:$0xf0]  ;;  %v3202_v6 = vld [vmem:[#allocation2 + $0x2c] sm:$0xf0] }
 0x10f   :  { %2936 = vmatpush.bf16.msra.mxu0 %v4293_v52  ;;  %2918 = vmatmul.bf16.vlgmr.msrb.gmra.mxu2 %v5251_v47  ;;  %v2685_v52 = vpop.f32.mrf.mxu0 }
 0x110   :  { %2962 = vmatpush.bf16.msra.mxu2 %v4741_v58  ;;  %2905 = vmatmul.bf16.vlgmr.msrb.gmra.mxu1 %v5255_v61  ;;  %v2686_v56 = vadd.f32 %v2685_v52, %v2673_v26  ;;  %v3345_v58 = vor.u32 %v4787_v46, %v3342_v48  ;;  %v4969_v26 = vld [vmem:[#allocation2 + $0x6dc] sm:$0xf]  ;;  %v3846_v46 = vld [vmem:[#allocation2 + $0x534] sm:$0xf0] }
 0x111   :  { %2949 = vmatpush.bf16.msra.mxu1 %v4517_v1  ;;  %2930 = vmatpush.bf16.msrb.mxu3 %v3873_v23  ;;  %v3314_v1 = vld [vmem:[#allocation2 + $0x10c] sm:$0xf0]  ;;  %v5042_v23 = vld [vmem:[#allocation2 + $0x920] sm:$0xf0] }
 0x112   :  { %v2699_v4 = vadd.f32 %v2698_v62, %v2686_v56  ;;  %v3317_v10 = vor.u32 %v4780_v0, %v3314_v1  ;;  %v5321_v36 = vpop.f32.mrf.mxu2  ;;  %v4349_v19 = vor.u32 %v5042_v23, %v4348_v22  ;;  %v4073_v56 = vor.u32 %v4969_v26, %v4070_v42  ;;  %v3818_v0 = vld [vmem:[#allocation2 + $0x4fc] sm:$0xf0]  ;;  %v4941_v42 = vld [vmem:[#allocation2 + $0x5fc] sm:$0xf] }
 0x113   :  { %2937 = vmatpush.bf16.msra.mxu0 %v4265_v59  ;;  %v4153_v59 = vor.u32 %v4993_v63, %v4152_v57  ;;  %v3849_v57 = vor.u32 %v4913_v45, %v3846_v46  ;;  %v3233_v62 = vor.u32 %v4759_v50, %v3230_v51  ;;  %v4906_v63 = vld [vmem:[#allocation2 + $0x4e4] sm:$0xf]  ;;  %v3597_v1 = vor.u32 %v4850_v38, %v3594_v53  ;;  %v3734_v45 = vld [vmem:[#allocation2 + $0x454] sm:$0xf0]  ;;  %v3482_v51 = vld [vmem:[#allocation2 + $0x25c] sm:$0xf0] }
 0x114   :  { %2963 = vmatpush.bf16.msra.mxu2 %v4713_v12  ;;  %2931 = vmatmul.bf16.vlgmr.msrb.gmra.mxu3 %v5260_v14  ;;  %3158 = vst [vmem:[#allocation7 + $0x8] sm:$0xff] %v2699_v4  ;;  %v4986_v12 = vld [vmem:[#allocation2 + $0x760] sm:$0xf0]  ;;  %v4843_v4 = vld [vmem:[#allocation2 + $0x2ec] sm:$0xf] }
 0x115   :  { %2950 = vmatpush.bf16.msra.mxu1 %v4489_v18  ;;  %2975 = vmatpush.bf16.msra.mxu3 %v3401_v31  ;;  %v4572_v18 = vld [vmem:[#allocation2 + $0xac8] sm:$0xf]  ;;  %v4125_v2 = vor.u32 %v4986_v12, %v4124_v9  ;;  %v4857_v31 = vld [vmem:[#allocation2 + $0x35c] sm:$0xf]  ;;  %v5004_v38 = vld [vmem:[#allocation2 + $0x7f4] sm:$0xf] }
 0x116   :  { %v4573_v32 = vor.u32 %v5098_v20, %v4572_v18  ;;  %v4014_v12 = vld [vmem:[#allocation2 + $0x684] sm:$0xf0]  ;;  %v3569_v18 = vor.u32 %v4843_v4, %v3566_v8  ;;  %v4836_v20 = vld [vmem:[#allocation2 + $0x2b4] sm:$0xf]  ;;  %v4210_v53 = vld [vmem:[#allocation2 + $0x80c] sm:$0xf0] }
 0x117   :  { %2938 = vmatpush.bf16.msra.mxu0 %v4237_v27  ;;  %v2687_v24 = vpop.f32.mrf.mxu0  ;;  %v4096_v27 = vld [vmem:[#allocation2 + $0x710] sm:$0xf]  ;;  %v5323_v52 = vpop.f32.mrf.mxu3  ;;  %v4213_v4 = vor.u32 %v5004_v38, %v4210_v53  ;;  %v3376_v53 = vld [vmem:[#allocation2 + $0x168] sm:$0xf] }
 0x118   :  { %2964 = vmatpush.bf16.msra.mxu2 %v4685_v33  ;;  %v3622_v33 = vld [vmem:[#allocation2 + $0x374] sm:$0xf0]  ;;  %v3538_v24 = vld [vmem:[#allocation2 + $0x2cc] sm:$0xf0] }
 0x119   :  { %2951 = vmatpush.bf16.msra.mxu1 %v4461_v13  ;;  %2976 = vmatpush.bf16.msra.mxu3 %v3373_v43  ;;  %v2700_v13 = vpop.f32.mrf.mxu1  ;;  %v4097_v43 = vor.u32 %v4979_v28, %v4096_v27  ;;  %v3625_v48 = vor.u32 %v4857_v31, %v3622_v33  ;;  %v4266_v27 = vld [vmem:[#allocation2 + $0x87c] sm:$0xf0]  ;;  %v4948_v31 = vld [vmem:[#allocation2 + $0x634] sm:$0xf] }
 0x11a   :  { %v2713_v7 = vpop.f32.mrf.mxu2  ;;  %v4892_v33 = vld [vmem:[#allocation2 + $0x474] sm:$0xf]  ;;  %v4829_v13 = vld [vmem:[#allocation2 + $0x27c] sm:$0xf] }
 0x11b   :  { %2939 = vmatpush.bf16.msra.mxu0 %v4209_v41  ;;  %v5035_v41 = vld [vmem:[#allocation2 + $0x8e8] sm:$0xf0]  ;;  %v4182_v7 = vld [vmem:[#allocation2 + $0x7d4] sm:$0xf0] }
 0x11c   :  { %2965 = vmatpush.bf16.msra.mxu2 %v4657_v44  ;;  %v3261_v44 = vor.u32 %v4766_v34, %v3258_v35  ;;  %v3762_v34 = vld [vmem:[#allocation2 + $0x48c] sm:$0xf0]  ;;  %v3541_v35 = vor.u32 %v4836_v20, %v3538_v24  ;;  %v4518_v24 = vld [vmem:[#allocation2 + $0xa74] sm:$0xf0] }
 0x11d   :  { %2952 = vmatpush.bf16.msra.mxu1 %v4433_v49  ;;  %2977 = vmatpush.bf16.msra.mxu3 %v3345_v58  ;;  %v4545_v49 = vor.u32 %v5091_v39, %v4544_v37  ;;  %v4962_v58 = vld [vmem:[#allocation2 + $0x6a4] sm:$0xf]  ;;  %v3510_v37 = vld [vmem:[#allocation2 + $0x294] sm:$0xf0]  ;;  %v5011_v39 = vld [vmem:[#allocation2 + $0x82c] sm:$0xf]  ;;  %v3765_v26 = vor.u32 %v4892_v33, %v3762_v34 }
 0x11e   :  { %v4920_v33 = vld [vmem:[#allocation2 + $0x554] sm:$0xf]  ;;  %v3874_v34 = vld [vmem:[#allocation2 + $0x56c] sm:$0xf0] }
 0x11f   :  { %2940 = vmatpush.bf16.msra.mxu0 %v4181_v54  ;;  %v4321_v54 = vor.u32 %v5035_v41, %v4320_v40  ;;  %v2726_v23 = vpop.f32.mrf.mxu3  ;;  %v4238_v40 = vld [vmem:[#allocation2 + $0x844] sm:$0xf0] }
 0x120   :  { %2966 = vmatpush.bf16.msra.mxu2 %v4629_v60  ;;  %v4042_v60 = vld [vmem:[#allocation2 + $0x6bc] sm:$0xf0]  ;;  %v4241_v50 = vor.u32 %v5011_v39, %v4238_v40  ;;  %v2725_v23 = vadd.f32 %v5323_v52, %v5321_v36  ;;  %v5137_v40 = vld [vmem:[#allocation2 + $0xc1c] sm:$0xf]  ;;  %v4742_v36 = vld [vmem:[#allocation2 + $0xc34] sm:$0xf0] }
 0x121   :  { %2953 = vmatpush.bf16.msra.mxu1 %v4405_v5  ;;  %2978 = vmatpush.bf16.msra.mxu3 %v3317_v10  ;;  %v4752_v5 = vld [vmem:[#allocation2 + $0x14] sm:$0xf]  ;;  %v4045_v9 = vor.u32 %v4962_v58, %v4042_v60  ;;  %v3821_v10 = vor.u32 %v4906_v63, %v3818_v0  ;;  %v4934_v58 = vld [vmem:[#allocation2 + $0x5c4] sm:$0xf]  ;;  %v3930_v60 = vld [vmem:[#allocation2 + $0x5dc] sm:$0xf0]  ;;  %v4745_v38 = vor.u32 %v5137_v40, %v4742_v36 }
 0x122   :  { %v3205_v15 = vor.u32 %v4752_v5, %v3202_v6  ;;  %v3706_v63 = vld [vmem:[#allocation2 + $0x41c] sm:$0xf0]  ;;  %v3454_v5 = vld [vmem:[#allocation2 + $0x224] sm:$0xf0]  ;;  %v4997_v6 = vld [vmem:[#allocation2 + $0x7bc] sm:$0xf]  ;;  %v3933_v8 = vor.u32 %v4934_v58, %v3930_v60 }
 0x123   :  { %2941 = vmatpush.bf16.msra.mxu0 %v4153_v59  ;;  %v4294_v59 = vld [vmem:[#allocation2 + $0x8b4] sm:$0xf0]  ;;  %v4185_v20 = vor.u32 %v4997_v6, %v4182_v7  ;;  %v5130_v58 = vld [vmem:[#allocation2 + $0xbe4] sm:$0xf]  ;;  %v4714_v60 = vld [vmem:[#allocation2 + $0xbfc] sm:$0xf0] }
 0x124   :  { %2967 = vmatpush.bf16.msra.mxu2 %v4601_v11  ;;  %v4955_v11 = vld [vmem:[#allocation2 + $0x66c] sm:$0xf]  ;;  %v4297_v22 = vor.u32 %v5025_v3, %v4294_v59  ;;  %v4861_v6 = vld [vmem:[#allocation2 + $0x378] sm:$0xf0]  ;;  %v3292_v40 = vld [vmem:[#allocation2 + $0xc0] sm:$0xf] }
 0x125   :  { %2954 = vmatpush.bf16.msra.mxu1 %v4377_v17  ;;  %2979 = vmatpush.bf16.msra.mxu3 %v3289_v29  ;;  %v3790_v17 = vld [vmem:[#allocation2 + $0x4c4] sm:$0xf0]  ;;  %v4017_v28 = vor.u32 %v4955_v11, %v4014_v12  ;;  %v4927_v59 = vld [vmem:[#allocation2 + $0x58c] sm:$0xf]  ;;  %v4777_v36 = vld [vmem:[#allocation2 + $0xd8] sm:$0xf0] }
 0x126   :  { %v3793_v29 = vor.u32 %v4899_v16, %v3790_v17  ;;  %v4871_v11 = vld [vmem:[#allocation2 + $0x3cc] sm:$0xf]  ;;  %v3678_v12 = vld [vmem:[#allocation2 + $0x3e4] sm:$0xf0]  ;;  %v4808_v17 = vld [vmem:[#allocation2 + $0x1d4] sm:$0xf] }
 0x127   :  { %2942 = vmatpush.bf16.msra.mxu0 %v4125_v2  ;;  %v5018_v2 = vld [vmem:[#allocation2 + $0x864] sm:$0xf] }
 0x128   :  { %2968 = vmatpush.bf16.msra.mxu2 %v4573_v32  ;;  %v3986_v32 = vld [vmem:[#allocation2 + $0x64c] sm:$0xf0] }
 0x129   :  { %2955 = vmatpush.bf16.msra.mxu1 %v4349_v19  ;;  %2980 = vmatpush.bf16.msra.mxu3 %v3261_v44  ;;  %v4269_v19 = vor.u32 %v5018_v2, %v4266_v27  ;;  %v3989_v41 = vor.u32 %v4948_v31, %v3986_v32  ;;  %v4885_v44 = vld [vmem:[#allocation2 + $0x43c] sm:$0xf]  ;;  %v4990_v2 = vld [vmem:[#allocation2 + $0x784] sm:$0xf]  ;;  %v4154_v27 = vld [vmem:[#allocation2 + $0x79c] sm:$0xf0]  ;;  %v3681_v31 = vor.u32 %v4871_v11, %v3678_v12 }
 0x12a   :  { %v4864_v32 = vld [vmem:[#allocation2 + $0x394] sm:$0xf]  ;;  %v4157_v39 = vor.u32 %v4990_v2, %v4154_v27  ;;  %v5123_v11 = vld [vmem:[#allocation2 + $0xbac] sm:$0xf]  ;;  %v4686_v12 = vld [vmem:[#allocation2 + $0xbc4] sm:$0xf0] }
 0x12b   :  { %2943 = vmatpush.bf16.msra.mxu0 %v4097_v43  ;;  %v3958_v43 = vld [vmem:[#allocation2 + $0x614] sm:$0xf0]  ;;  %v5329_v46 = vpop.f32.mrf.mxu0  ;;  %v4689_v2 = vor.u32 %v5123_v11, %v4686_v12  ;;  %v5032_v12 = vld [vmem:[#allocation2 + $0x8d4] sm:$0xf] }
 0x12c   :  { %2969 = vmatpush.bf16.msra.mxu2 %v4545_v49  ;;  %v4822_v49 = vld [vmem:[#allocation2 + $0x244] sm:$0xf]  ;;  %v3320_v27 = vld [vmem:[#allocation2 + $0xf8] sm:$0xf] }
 0x12d   :  { %2956 = vmatpush.bf16.msra.mxu1 %v4321_v54  ;;  %2981 = vmatpush.bf16.msra.mxu3 %v3233_v62  ;;  %v3961_v54 = vor.u32 %v4941_v42, %v3958_v43  ;;  %v4878_v62 = vld [vmem:[#allocation2 + $0x404] sm:$0xf]  ;;  %v3485_v0 = vor.u32 %v4822_v49, %v3482_v51  ;;  %v4126_v42 = vld [vmem:[#allocation2 + $0x764] sm:$0xf0]  ;;  %v3877_v43 = vor.u32 %v4920_v33, %v3874_v34  ;;  %v5053_v33 = vld [vmem:[#allocation2 + $0x97c] sm:$0xf] }
 0x12e   :  { %2944 = vmatmul.bf16.vlgmr.msra.gmra.mxu0 %v5263_v21  ;;  %v3709_v3 = vor.u32 %v4878_v62, %v3706_v63  ;;  %v5067_v62 = vld [vmem:[#allocation2 + $0x9ec] sm:$0xf] }
 0x12f   :  { %2988 = vmatpush.bf16.msrb.mxu0 %v3625_v48  ;;  %2970 = vmatmul.bf16.vlgmr.msra.gmra.mxu2 %v5265_v25  ;;  %v3513_v48 = vor.u32 %v4829_v13, %v3510_v37  ;;  %v3404_v13 = vld [vmem:[#allocation2 + $0x1a0] sm:$0xf] }
 0x130   :  { %3014 = vmatpush.bf16.msrb.mxu2 %v4073_v56  ;;  %2957 = vmatmul.bf16.vlgmr.msra.gmra.mxu1 %v5267_v30  ;;  %v5331_v56 = vpop.f32.mrf.mxu1 }
 0x131   :  { %3001 = vmatpush.bf16.msrb.mxu1 %v3849_v57  ;;  %2982 = vmatpush.bf16.msra.mxu3 %v3205_v15  ;;  %v3737_v57 = vor.u32 %v4885_v44, %v3734_v45  ;;  %v5074_v45 = vld [vmem:[#allocation2 + $0xa24] sm:$0xf] }
 0x133   :  { %2989 = vmatpush.bf16.msrb.mxu0 %v3597_v1  ;;  %v4815_v1 = vld [vmem:[#allocation2 + $0x20c] sm:$0xf]  ;;  %v2739_v15 = vpop.f32.mrf.mxu0 }
 0x134   :  { %3015 = vmatpush.bf16.msrb.mxu2 %v4045_v9  ;;  %2983 = vmatmul.bf16.vlgmr.msra.gmra.mxu3 %v5253_v55  ;;  %v3902_v9 = vld [vmem:[#allocation2 + $0x5a4] sm:$0xf0]  ;;  %v3457_v16 = vor.u32 %v4815_v1, %v3454_v5  ;;  %v4098_v1 = vld [vmem:[#allocation2 + $0x72c] sm:$0xf0]  ;;  %v3628_v5 = vld [vmem:[#allocation2 + $0x360] sm:$0xf] }
 0x135   :  { %3002 = vmatpush.bf16.msrb.mxu1 %v3821_v10  ;;  %3027 = vmatpush.bf16.msrb.mxu3 %v4297_v22  ;;  %v5333_v10 = vpop.f32.mrf.mxu2  ;;  %v5081_v22 = vld [vmem:[#allocation2 + $0xa5c] sm:$0xf]  ;;  %v5060_v15 = vld [vmem:[#allocation2 + $0x9b4] sm:$0xf] }
 0x136   :  { %v4521_v52 = vor.u32 %v5081_v22, %v4518_v24  ;;  %v3600_v22 = vld [vmem:[#allocation2 + $0x328] sm:$0xf] }
 0x137   :  { %2990 = vmatpush.bf16.msrb.mxu0 %v3569_v18  ;;  %v3426_v18 = vld [vmem:[#allocation2 + $0x1ec] sm:$0xf0]  ;;  %v2776_v44 = vpop.f32.mrf.mxu3 }
 0x138   :  { %3016 = vmatpush.bf16.msrb.mxu2 %v4017_v28  ;;  %v3905_v28 = vor.u32 %v4927_v59, %v3902_v9  ;;  %v3429_v37 = vor.u32 %v4808_v17, %v3426_v18  ;;  %v4791_v59 = vld [vmem:[#allocation2 + $0x148] sm:$0xf0]  ;;  %v3629_v17 = vor.u32 %v4861_v6, %v3628_v5 }
 0x139   :  { %3003 = vmatpush.bf16.msrb.mxu1 %v3793_v29  ;;  %3028 = vmatpush.bf16.msrb.mxu3 %v4269_v19  ;;  %v2752_v29 = vpop.f32.mrf.mxu1  ;;  %v4805_v19 = vld [vmem:[#allocation2 + $0x1b8] sm:$0xf0] }
 0x13a   :  { %v5116_v29 = vld [vmem:[#allocation2 + $0xb74] sm:$0xf] }
 0x13b   :  { %2991 = vmatpush.bf16.msrb.mxu0 %v3541_v35  ;;  %v3650_v35 = vld [vmem:[#allocation2 + $0x3ac] sm:$0xf0] }
 0x13c   :  { %3017 = vmatpush.bf16.msrb.mxu2 %v3989_v41  ;;  %v2738_v41 = vadd.f32 %v5329_v46, %v2725_v23  ;;  %v3653_v49 = vor.u32 %v4864_v32, %v3650_v35  ;;  %v4854_v23 = vld [vmem:[#allocation2 + $0x340] sm:$0xf0]  ;;  %v4406_v35 = vld [vmem:[#allocation2 + $0x994] sm:$0xf0] }
 0x13d   :  { %3004 = vmatpush.bf16.msrb.mxu1 %v3765_v26  ;;  %3029 = vmatpush.bf16.msrb.mxu3 %v4241_v50  ;;  %v4983_v26 = vld [vmem:[#allocation2 + $0x74c] sm:$0xf]  ;;  %v3405_v50 = vor.u32 %v4805_v19, %v3404_v13  ;;  %v2765_v51 = vpop.f32.mrf.mxu2  ;;  %v3601_v34 = vor.u32 %v4854_v23, %v3600_v22  ;;  %v3572_v13 = vld [vmem:[#allocation2 + $0x2f0] sm:$0xf] }
 0x13e   :  { %v2751_v63 = vadd.f32 %v5331_v56, %v2738_v41  ;;  %v4847_v19 = vld [vmem:[#allocation2 + $0x308] sm:$0xf0]  ;;  %v5109_v41 = vld [vmem:[#allocation2 + $0xb3c] sm:$0xf]  ;;  %v3293_v51 = vor.u32 %v4777_v36, %v3292_v40 }
 0x13f   :  { %2992 = vmatpush.bf16.msrb.mxu0 %v3513_v48  ;;  %v4490_v48 = vld [vmem:[#allocation2 + $0xa3c] sm:$0xf0]  ;;  %v2778_v18 = vpop.f32.mrf.mxu3 }
 0x140   :  { %3018 = vmatpush.bf16.msrb.mxu2 %v3961_v54  ;;  %v4798_v54 = vld [vmem:[#allocation2 + $0x180] sm:$0xf0]  ;;  %v4493_v46 = vor.u32 %v5074_v45, %v4490_v48  ;;  %v3573_v45 = vor.u32 %v4847_v19, %v3572_v13  ;;  %v4378_v48 = vld [vmem:[#allocation2 + $0x95c] sm:$0xf0]  ;;  %v3488_v18 = vld [vmem:[#allocation2 + $0x248] sm:$0xf] }
 0x141   :  { %3005 = vmatpush.bf16.msrb.mxu1 %v3737_v57  ;;  %3030 = vmatpush.bf16.msrb.mxu3 %v4213_v4  ;;  %v4129_v57 = vor.u32 %v4983_v26, %v4126_v42  ;;  %v4462_v4 = vld [vmem:[#allocation2 + $0xa04] sm:$0xf0]  ;;  %v3377_v7 = vor.u32 %v4798_v54, %v3376_v53  ;;  %v4630_v26 = vld [vmem:[#allocation2 + $0xb54] sm:$0xf0]  ;;  %v4409_v42 = vor.u32 %v5053_v33, %v4406_v35  ;;  %v4770_v54 = vld [vmem:[#allocation2 + $0xa0] sm:$0xf0] }
 0x142   :  { %v4465_v56 = vor.u32 %v5067_v62, %v4462_v4  ;;  %v3264_v53 = vld [vmem:[#allocation2 + $0x88] sm:$0xf]  ;;  %v4973_v35 = vld [vmem:[#allocation2 + $0x6f8] sm:$0xf0]  ;;  %v3460_v19 = vld [vmem:[#allocation2 + $0x210] sm:$0xf] }
 0x143   :  { %2993 = vmatpush.bf16.msrb.mxu0 %v3485_v0  ;;  %v4976_v0 = vld [vmem:[#allocation2 + $0x714] sm:$0xf]  ;;  %v3265_v4 = vor.u32 %v4770_v54, %v3264_v53  ;;  %v3432_v53 = vld [vmem:[#allocation2 + $0x1d8] sm:$0xf] }
 0x144   :  { %3019 = vmatpush.bf16.msrb.mxu2 %v3933_v8  ;;  %v4717_v8 = vor.u32 %v5130_v58, %v4714_v60  ;;  %v4101_v9 = vor.u32 %v4976_v0, %v4098_v1  ;;  %v4602_v58 = vld [vmem:[#allocation2 + $0xb1c] sm:$0xf0]  ;;  %v4833_v1 = vld [vmem:[#allocation2 + $0x298] sm:$0xf0]  ;;  %v4812_v54 = vld [vmem:[#allocation2 + $0x1f0] sm:$0xf0] }
 0x145   :  { %3006 = vmatpush.bf16.msrb.mxu1 %v3709_v3  ;;  %3031 = vmatpush.bf16.msrb.mxu3 %v4185_v20  ;;  %v3348_v3 = vld [vmem:[#allocation2 + $0x130] sm:$0xf]  ;;  %v3516_v0 = vld [vmem:[#allocation2 + $0x280] sm:$0xf] }
 0x146   :  { %v4434_v20 = vld [vmem:[#allocation2 + $0x9cc] sm:$0xf0]  ;;  %v3349_v24 = vor.u32 %v4791_v59, %v3348_v3  ;;  %v5095_v3 = vld [vmem:[#allocation2 + $0xacc] sm:$0xf]  ;;  %v4574_v59 = vld [vmem:[#allocation2 + $0xae4] sm:$0xf0] }
 0x147   :  { %2994 = vmatpush.bf16.msrb.mxu0 %v3457_v16  ;;  %v2764_v16 = vadd.f32 %v5333_v10, %v2751_v63  ;;  %v4437_v32 = vor.u32 %v5060_v15, %v4434_v20  ;;  %v4350_v63 = vld [vmem:[#allocation2 + $0x924] sm:$0xf0]  ;;  %v3517_v15 = vor.u32 %v4833_v1, %v3516_v0  ;;  %v4826_v20 = vld [vmem:[#allocation2 + $0x260] sm:$0xf0]  ;;  %v4244_v0 = vld [vmem:[#allocation2 + $0x830] sm:$0xf] }
 0x148   :  { %3020 = vmatpush.bf16.msrb.mxu2 %v3905_v28  ;;  %v4784_v28 = vld [vmem:[#allocation2 + $0x110] sm:$0xf0]  ;;  %v3489_v33 = vor.u32 %v4826_v20, %v3488_v18  ;;  %v5015_v1 = vld [vmem:[#allocation2 + $0x848] sm:$0xf0] }
 0x149   :  { %3007 = vmatpush.bf16.msrb.mxu1 %v3681_v31  ;;  %3032 = vmatpush.bf16.msrb.mxu3 %v4157_v39  ;;  %v4658_v31 = vld [vmem:[#allocation2 + $0xb8c] sm:$0xf0]  ;;  %v2777_v10 = vadd.f32 %v2776_v44, %v2764_v16  ;;  %v5046_v44 = vld [vmem:[#allocation2 + $0x944] sm:$0xf]  ;;  %v3852_v16 = vld [vmem:[#allocation2 + $0x520] sm:$0xf] }
 0x14a   :  { %v4661_v39 = vor.u32 %v5116_v29, %v4658_v31  ;;  %v4381_v60 = vor.u32 %v5046_v44, %v4378_v48  ;;  %v4546_v29 = vld [vmem:[#allocation2 + $0xaac] sm:$0xf0]  ;;  %v4300_v31 = vld [vmem:[#allocation2 + $0x8a0] sm:$0xf]  ;;  %v4272_v44 = vld [vmem:[#allocation2 + $0x868] sm:$0xf] }
 0x14b   :  { %2995 = vmatpush.bf16.msrb.mxu0 %v3429_v37  ;;  %v3321_v37 = vor.u32 %v4784_v28, %v3320_v27  ;;  %v3208_v27 = vld [vmem:[#allocation2 + $0x18] sm:$0xf]  ;;  %v4756_v28 = vld [vmem:[#allocation2 + $0x30] sm:$0xf0] }
 0x14c   :  { %3021 = vmatpush.bf16.msrb.mxu2 %v3877_v43  ;;  %v5008_v18 = vld [vmem:[#allocation2 + $0x810] sm:$0xf0] }
 0x14d   :  { %3008 = vmatpush.bf16.msrb.mxu1 %v3653_v49  ;;  %3033 = vmatpush.bf16.msrb.mxu3 %v4129_v57  ;;  %v3544_v49 = vld [vmem:[#allocation2 + $0x2b8] sm:$0xf]  ;;  %v5102_v57 = vld [vmem:[#allocation2 + $0xb04] sm:$0xf]  ;;  %v5344_v5 = vpop.f32.mrf.mxu1 }
 0x14e   :  { %2996 = vmatmul.bf16.vlgmr.msrb.gmra.mxu0 %v5255_v61  ;;  %v4605_v6 = vor.u32 %v5102_v57, %v4602_v58  ;;  %v4903_v58 = vld [vmem:[#allocation2 + $0x4c8] sm:$0xf0] }
 0x14f   :  { %3040 = vmatpush.bf16.msra.mxu0 %v4521_v52  ;;  %3022 = vmatmul.bf16.vlgmr.msrb.gmra.mxu2 %v5260_v14  ;;  %v2789_v52 = vpop.f32.mrf.mxu0 }
 0x150   :  { %3066 = vmatpush.bf16.msra.mxu2 %v3405_v50  ;;  %3009 = vmatmul.bf16.vlgmr.msrb.gmra.mxu1 %v5251_v47  ;;  %v2790_v43 = vadd.f32 %v2789_v52, %v2777_v10  ;;  %v4840_v50 = vld [vmem:[#allocation2 + $0x2d0] sm:$0xf0]  ;;  %v3824_v52 = vld [vmem:[#allocation2 + $0x4e8] sm:$0xf] }
 0x151   :  { %3053 = vmatpush.bf16.msra.mxu1 %v4745_v38  ;;  %3034 = vmatpush.bf16.msrb.mxu3 %v4101_v9  ;;  %v4633_v38 = vor.u32 %v5109_v41, %v4630_v26  ;;  %v3545_v62 = vor.u32 %v4840_v50, %v3544_v49  ;;  %v4910_v41 = vld [vmem:[#allocation2 + $0x500] sm:$0xf0]  ;;  %v4048_v49 = vld [vmem:[#allocation2 + $0x6a8] sm:$0xf] }
 0x152   :  { %3159 = vst [vmem:[#allocation7 + $0x10] sm:$0xff] %v2790_v43  ;;  %v5346_v23 = vpop.f32.mrf.mxu2  ;;  %v4966_v50 = vld [vmem:[#allocation2 + $0x6c0] sm:$0xf0] }
 0x153   :  { %3041 = vmatpush.bf16.msra.mxu0 %v4493_v46  ;;  %v5039_v46 = vld [vmem:[#allocation2 + $0x90c] sm:$0xf]  ;;  %v2816_v20 = vadd.f32 %v5346_v23, %v5344_v5  ;;  %v3964_v23 = vld [vmem:[#allocation2 + $0x600] sm:$0xf] }
 0x154   :  { %3067 = vmatpush.bf16.msra.mxu2 %v3377_v7  ;;  %3035 = vmatmul.bf16.vlgmr.msrb.gmra.mxu3 %v5263_v21  ;;  %v3236_v7 = vld [vmem:[#allocation2 + $0x50] sm:$0xf]  ;;  %v4353_v11 = vor.u32 %v5039_v46, %v4350_v63  ;;  %v5085_v46 = vld [vmem:[#allocation2 + $0xa78] sm:$0xf0]  ;;  %v4049_v63 = vor.u32 %v4966_v50, %v4048_v49 }
 0x155   :  { %3054 = vmatpush.bf16.msra.mxu1 %v4717_v8  ;;  %3079 = vmatpush.bf16.msra.mxu3 %v3629_v17  ;;  %v4763_v8 = vld [vmem:[#allocation2 + $0x68] sm:$0xf0]  ;;  %v4917_v17 = vld [vmem:[#allocation2 + $0x538] sm:$0xf0]  ;;  %v2804_v36 = vpop.f32.mrf.mxu1  ;;  %v3684_v50 = vld [vmem:[#allocation2 + $0x3d0] sm:$0xf] }
 0x156   :  { %v3237_v22 = vor.u32 %v4763_v8, %v3236_v7  ;;  %v3853_v13 = vor.u32 %v4917_v17, %v3852_v16  ;;  %v4959_v7 = vld [vmem:[#allocation2 + $0x688] sm:$0xf0]  ;;  %v4216_v17 = vld [vmem:[#allocation2 + $0x7f8] sm:$0xf]  ;;  %v4882_v36 = vld [vmem:[#allocation2 + $0x420] sm:$0xf0] }
 0x157   :  { %3042 = vmatpush.bf16.msra.mxu0 %v4465_v56  ;;  %v2791_v9 = vpop.f32.mrf.mxu0  ;;  %v4322_v56 = vld [vmem:[#allocation2 + $0x8ec] sm:$0xf0]  ;;  %v5348_v40 = vpop.f32.mrf.mxu3 }
 0x158   :  { %3068 = vmatpush.bf16.msra.mxu2 %v3349_v24  ;;  %v4577_v24 = vor.u32 %v5095_v3, %v4574_v59  ;;  %v4325_v10 = vor.u32 %v5032_v12, %v4322_v56  ;;  %v3768_v3 = vld [vmem:[#allocation2 + $0x478] sm:$0xf]  ;;  %v4496_v12 = vld [vmem:[#allocation2 + $0xa28] sm:$0xf]  ;;  %v5078_v56 = vld [vmem:[#allocation2 + $0xa40] sm:$0xf0] }
 0x159   :  { %3055 = vmatpush.bf16.msra.mxu1 %v4689_v2  ;;  %3080 = vmatpush.bf16.msra.mxu3 %v3601_v34  ;;  %v5088_v2 = vld [vmem:[#allocation2 + $0xa94] sm:$0xf]  ;;  %v4076_v34 = vld [vmem:[#allocation2 + $0x6e0] sm:$0xf] }
 0x15a   :  { %v4549_v26 = vor.u32 %v5088_v2, %v4546_v29  ;;  %v4077_v43 = vor.u32 %v4973_v35, %v4076_v34  ;;  %v2817_v57 = vpop.f32.mrf.mxu2  ;;  %v3740_v2 = vld [vmem:[#allocation2 + $0x440] sm:$0xf]  ;;  %v4468_v29 = vld [vmem:[#allocation2 + $0x9f0] sm:$0xf]  ;;  %v5001_v34 = vld [vmem:[#allocation2 + $0x7d8] sm:$0xf0]  ;;  %v2829_v35 = vadd.f32 %v5348_v40, %v2816_v20 }
 0x15b   :  { %3043 = vmatpush.bf16.msra.mxu0 %v4437_v32  ;;  %v5029_v32 = vld [vmem:[#allocation2 + $0x8b8] sm:$0xf0]  ;;  %v4160_v40 = vld [vmem:[#allocation2 + $0x788] sm:$0xf] }
 0x15c   :  { %3069 = vmatpush.bf16.msra.mxu2 %v3321_v37  ;;  %v4819_v37 = vld [vmem:[#allocation2 + $0x228] sm:$0xf0] }
 0x15d   :  { %3056 = vmatpush.bf16.msra.mxu1 %v4661_v39  ;;  %3081 = vmatpush.bf16.msra.mxu3 %v3573_v45  ;;  %v3209_v39 = vor.u32 %v4756_v28, %v3208_v27  ;;  %v5022_v45 = vld [vmem:[#allocation2 + $0x880] sm:$0xf0]  ;;  %v3461_v48 = vor.u32 %v4819_v37, %v3460_v19  ;;  %v4497_v27 = vor.u32 %v5078_v56, %v4496_v12  ;;  %v4889_v28 = vld [vmem:[#allocation2 + $0x458] sm:$0xf0]  ;;  %v3712_v37 = vld [vmem:[#allocation2 + $0x408] sm:$0xf] }
 0x15e   :  { %v3741_v19 = vor.u32 %v4889_v28, %v3740_v2  ;;  %v3713_v49 = vor.u32 %v4882_v36, %v3712_v37  ;;  %v4356_v28 = vld [vmem:[#allocation2 + $0x910] sm:$0xf]  ;;  %v5036_v37 = vld [vmem:[#allocation2 + $0x8f0] sm:$0xf0]  ;;  %v5127_v36 = vld [vmem:[#allocation2 + $0xbc8] sm:$0xf0] }
 0x15f   :  { %3044 = vmatpush.bf16.msra.mxu0 %v4409_v42  ;;  %v4301_v42 = vor.u32 %v5029_v32, %v4300_v31  ;;  %v2830_v9 = vpop.f32.mrf.mxu3  ;;  %v5071_v31 = vld [vmem:[#allocation2 + $0xa08] sm:$0xf0]  ;;  %v4217_v32 = vor.u32 %v5008_v18, %v4216_v17  ;;  %v4104_v17 = vld [vmem:[#allocation2 + $0x718] sm:$0xf]  ;;  %v4980_v18 = vld [vmem:[#allocation2 + $0x730] sm:$0xf0] }
 0x160   :  { %3070 = vmatpush.bf16.msra.mxu2 %v3293_v51  ;;  %v3825_v51 = vor.u32 %v4910_v41, %v3824_v52  ;;  %v4440_v52 = vld [vmem:[#allocation2 + $0x9b8] sm:$0xf]  ;;  %v5064_v41 = vld [vmem:[#allocation2 + $0x9d0] sm:$0xf0]  ;;  %v4384_v9 = vld [vmem:[#allocation2 + $0x948] sm:$0xf] }
 0x161   :  { %3057 = vmatpush.bf16.msra.mxu1 %v4633_v38  ;;  %3082 = vmatpush.bf16.msra.mxu3 %v3545_v62  ;;  %v3796_v38 = vld [vmem:[#allocation2 + $0x4b0] sm:$0xf]  ;;  %v4273_v62 = vor.u32 %v5022_v45, %v4272_v44  ;;  %v4994_v45 = vld [vmem:[#allocation2 + $0x7a0] sm:$0xf0] }
 0x162   :  { %v3797_v8 = vor.u32 %v4903_v58, %v3796_v38  ;;  %v4875_v38 = vld [vmem:[#allocation2 + $0x3e8] sm:$0xf0]  ;;  %v4161_v57 = vor.u32 %v4994_v45, %v4160_v40  ;;  %v4636_v40 = vld [vmem:[#allocation2 + $0xb40] sm:$0xf]  ;;  %v5113_v45 = vld [vmem:[#allocation2 + $0xb58] sm:$0xf0] }
 0x163   :  { %3045 = vmatpush.bf16.msra.mxu0 %v4381_v60  ;;  %v4524_v60 = vld [vmem:[#allocation2 + $0xa60] sm:$0xf] }
 0x164   :  { %3071 = vmatpush.bf16.msra.mxu2 %v3265_v4  ;;  %v3433_v4 = vor.u32 %v4812_v54, %v3432_v53  ;;  %v4525_v59 = vor.u32 %v5085_v46, %v4524_v60  ;;  %v4412_v53 = vld [vmem:[#allocation2 + $0x980] sm:$0xf]  ;;  %v5057_v54 = vld [vmem:[#allocation2 + $0x998] sm:$0xf0]  ;;  %v4132_v60 = vld [vmem:[#allocation2 + $0x750] sm:$0xf] }
 0x165   :  { %3058 = vmatpush.bf16.msra.mxu1 %v4605_v6  ;;  %3083 = vmatpush.bf16.msra.mxu3 %v3517_v15  ;;  %v4020_v6 = vld [vmem:[#allocation2 + $0x670] sm:$0xf]  ;;  %v4245_v15 = vor.u32 %v5015_v1, %v4244_v0  ;;  %v4987_v46 = vld [vmem:[#allocation2 + $0x768] sm:$0xf0] }
 0x166   :  { %v4021_v16 = vor.u32 %v4959_v7, %v4020_v6  ;;  %v3908_v1 = vld [vmem:[#allocation2 + $0x590] sm:$0xf]  ;;  %v3685_v6 = vor.u32 %v4875_v38, %v3684_v50  ;;  %v3656_v7 = vld [vmem:[#allocation2 + $0x398] sm:$0xf]  ;;  %v4133_v12 = vor.u32 %v4987_v46, %v4132_v60 }
 0x167   :  { %3046 = vmatpush.bf16.msra.mxu0 %v4353_v11  ;;  %v4896_v11 = vld [vmem:[#allocation2 + $0x490] sm:$0xf0] }
 0x168   :  { %3072 = vmatpush.bf16.msra.mxu2 %v3237_v22  ;;  %v4952_v22 = vld [vmem:[#allocation2 + $0x650] sm:$0xf0] }
 0x169   :  { %3059 = vmatpush.bf16.msra.mxu1 %v4577_v24  ;;  %3084 = vmatpush.bf16.msra.mxu3 %v3489_v33  ;;  %v3769_v24 = vor.u32 %v4896_v11, %v3768_v3  ;;  %v4188_v33 = vld [vmem:[#allocation2 + $0x7c0] sm:$0xf]  ;;  %v4413_v3 = vor.u32 %v5057_v54, %v4412_v53  ;;  %v5050_v11 = vld [vmem:[#allocation2 + $0x960] sm:$0xf0] }
 0x16a   :  { %v4385_v2 = vor.u32 %v5050_v11, %v4384_v9 }
 0x16b   :  { %3047 = vmatpush.bf16.msra.mxu0 %v4325_v10  ;;  %v2841_v5 = vpop.f32.mrf.mxu0 }
 0x16c   :  { %3073 = vmatpush.bf16.msra.mxu2 %v3209_v39  ;;  %v4469_v39 = vor.u32 %v5071_v31, %v4468_v29  ;;  %v5043_v29 = vld [vmem:[#allocation2 + $0x928] sm:$0xf0]  ;;  %v4105_v31 = vor.u32 %v4980_v18, %v4104_v17 }
 0x16d   :  { %3060 = vmatpush.bf16.msra.mxu1 %v4549_v26  ;;  %3085 = vmatpush.bf16.msra.mxu3 %v3461_v48  ;;  %v4189_v26 = vor.u32 %v5001_v34, %v4188_v33  ;;  %v4938_v48 = vld [vmem:[#allocation2 + $0x5e0] sm:$0xf0] }
 0x16e   :  { %3048 = vmatmul.bf16.vlgmr.msra.gmra.mxu0 %v5267_v30  ;;  %v5134_v33 = vld [vmem:[#allocation2 + $0xc00] sm:$0xf0] }
 0x16f   :  { %3092 = vmatpush.bf16.msrb.mxu0 %v3853_v13  ;;  %3074 = vmatmul.bf16.vlgmr.msra.gmra.mxu2 %v5253_v55  ;;  %v3992_v55 = vld [vmem:[#allocation2 + $0x638] sm:$0xf]  ;;  %v4945_v13 = vld [vmem:[#allocation2 + $0x618] sm:$0xf0] }
 0x170   :  { %3118 = vmatpush.bf16.msrb.mxu2 %v4301_v42  ;;  %3061 = vmatmul.bf16.vlgmr.msra.gmra.mxu1 %v5265_v25  ;;  %v3993_v10 = vor.u32 %v4952_v22, %v3992_v55  ;;  %v2854_v42 = vpop.f32.mrf.mxu1  ;;  %v3965_v44 = vor.u32 %v4945_v13, %v3964_v23  ;;  %v3880_v55 = vld [vmem:[#allocation2 + $0x558] sm:$0xf]  ;;  %v4924_v22 = vld [vmem:[#allocation2 + $0x570] sm:$0xf0]  ;;  %v4357_v23 = vor.u32 %v5043_v29, %v4356_v28 }
 0x171   :  { %3105 = vmatpush.bf16.msrb.mxu1 %v4077_v43  ;;  %3086 = vmatpush.bf16.msra.mxu3 %v3433_v4  ;;  %v2842_v43 = vadd.f32 %v2841_v5, %v2829_v35  ;;  %v4931_v4 = vld [vmem:[#allocation2 + $0x5a8] sm:$0xf0]  ;;  %v3881_v34 = vor.u32 %v4924_v22, %v3880_v55 }
 0x173   :  { %3093 = vmatpush.bf16.msrb.mxu0 %v3825_v51  ;;  %v4441_v51 = vor.u32 %v5064_v41, %v4440_v52  ;;  %v2843_v0 = vpop.f32.mrf.mxu0 }
 0x174   :  { %3119 = vmatpush.bf16.msrb.mxu2 %v4273_v62  ;;  %3087 = vmatmul.bf16.vlgmr.msra.gmra.mxu3 %v5255_v61  ;;  %v3936_v61 = vld [vmem:[#allocation2 + $0x5c8] sm:$0xf]  ;;  %v2855_v62 = vadd.f32 %v2854_v42, %v2842_v43  ;;  %v4664_v42 = vld [vmem:[#allocation2 + $0xb78] sm:$0xf]  ;;  %v5120_v43 = vld [vmem:[#allocation2 + $0xb90] sm:$0xf0] }
 0x175   :  { %3106 = vmatpush.bf16.msrb.mxu1 %v4049_v63  ;;  %3131 = vmatpush.bf16.msrb.mxu3 %v4525_v59  ;;  %v3937_v58 = vor.u32 %v4938_v48, %v3936_v61  ;;  %v2867_v63 = vpop.f32.mrf.mxu2  ;;  %v4748_v59 = vld [vmem:[#allocation2 + $0xc20] sm:$0xf]  ;;  %v4608_v48 = vld [vmem:[#allocation2 + $0xb08] sm:$0xf] }
 0x176   :  { %v2868_v20 = vadd.f32 %v2867_v63, %v2855_v62 }
 0x177   :  { %3094 = vmatpush.bf16.msrb.mxu0 %v3797_v8  ;;  %v4868_v8 = vld [vmem:[#allocation2 + $0x3b0] sm:$0xf0] }
 0x178   :  { %3120 = vmatpush.bf16.msrb.mxu2 %v4245_v15  ;;  %v2856_v56 = vpop.f32.mrf.mxu1  ;;  %v5141_v15 = vld [vmem:[#allocation2 + $0xc38] sm:$0xf0] }
 0x179   :  { %3107 = vmatpush.bf16.msrb.mxu1 %v4021_v16  ;;  %3132 = vmatpush.bf16.msrb.mxu3 %v4497_v27  ;;  %v3909_v16 = vor.u32 %v4931_v4, %v3908_v1  ;;  %v4749_v27 = vor.u32 %v5141_v15, %v4748_v59 }
 0x17b   :  { %3095 = vmatpush.bf16.msrb.mxu0 %v3769_v24  ;;  %v3657_v24 = vor.u32 %v4868_v8, %v3656_v7 }
 0x17c   :  { %3121 = vmatpush.bf16.msrb.mxu2 %v4217_v32  ;;  %v2880_v32 = vpop.f32.mrf.mxu3 }
 0x17d   :  { %3108 = vmatpush.bf16.msrb.mxu1 %v3993_v10  ;;  %3133 = vmatpush.bf16.msrb.mxu3 %v4469_v39  ;;  %v4720_v10 = vld [vmem:[#allocation2 + $0xbe8] sm:$0xf]  ;;  %v2881_v35 = vadd.f32 %v2880_v32, %v2868_v20  ;;  %v2869_v5 = vpop.f32.mrf.mxu2  ;;  %v4692_v39 = vld [vmem:[#allocation2 + $0xbb0] sm:$0xf] }
 0x17e   :  { %v4721_v13 = vor.u32 %v5134_v33, %v4720_v10  ;;  %v4693_v41 = vor.u32 %v5127_v36, %v4692_v39 }
 0x17f   :  { %3096 = vmatpush.bf16.msrb.mxu0 %v3741_v19  ;;  %3160 = vst [vmem:[#allocation7 + $0x18] sm:$0xff] %v2881_v35  ;;  %v4328_v19 = vld [vmem:[#allocation2 + $0x8d8] sm:$0xf] }
 0x180   :  { %3122 = vmatpush.bf16.msrb.mxu2 %v4189_v26  ;;  %v4329_v52 = vor.u32 %v5036_v37, %v4328_v19 }
 0x181   :  { %3109 = vmatpush.bf16.msrb.mxu1 %v3965_v44  ;;  %3134 = vmatpush.bf16.msrb.mxu3 %v4441_v51  ;;  %v4665_v44 = vor.u32 %v5120_v43, %v4664_v42  ;;  %v4580_v51 = vld [vmem:[#allocation2 + $0xad0] sm:$0xf] }
 0x183   :  { %3097 = vmatpush.bf16.msrb.mxu0 %v3713_v49  ;;  %v5106_v49 = vld [vmem:[#allocation2 + $0xb20] sm:$0xf0] }
 0x184   :  { %3123 = vmatpush.bf16.msrb.mxu2 %v4161_v57  ;;  %v2882_v26 = vpop.f32.mrf.mxu3  ;;  %v4609_v50 = vor.u32 %v5106_v49, %v4608_v48  ;;  %v4552_v57 = vld [vmem:[#allocation2 + $0xa98] sm:$0xf] }
 0x185   :  { %3110 = vmatpush.bf16.msrb.mxu1 %v3937_v58  ;;  %3135 = vmatpush.bf16.msrb.mxu3 %v4413_v3  ;;  %v5092_v58 = vld [vmem:[#allocation2 + $0xab0] sm:$0xf0] }
 0x186   :  { %v4553_v46 = vor.u32 %v5092_v58, %v4552_v57 }
 0x187   :  { %3098 = vmatpush.bf16.msrb.mxu0 %v3685_v6 }
 0x188   :  { %3124 = vmatpush.bf16.msrb.mxu2 %v4133_v12 }
 0x189   :  { %3111 = vmatpush.bf16.msrb.mxu1 %v3909_v16  ;;  %3136 = vmatpush.bf16.msrb.mxu3 %v4385_v2 }
 0x18b   :  { %3099 = vmatpush.bf16.msrb.mxu0 %v3657_v24  ;;  %v2893_v61 = vpop.f32.mrf.mxu0 }
 0x18c   :  { %3125 = vmatpush.bf16.msrb.mxu2 %v4105_v31 }
 0x18d   :  { %3112 = vmatpush.bf16.msrb.mxu1 %v3881_v34  ;;  %3137 = vmatpush.bf16.msrb.mxu3 %v4357_v23 }
 0x18e   :  { %3100 = vmatmul.bf16.vlgmr.msrb.gmra.mxu0 %v5251_v47  ;;  %v4637_v47 = vor.u32 %v5113_v45, %v4636_v40 }
 0x18f   :  { %3144 = vmatpush.bf16.msra.mxu0 %v4749_v27  ;;  %3126 = vmatmul.bf16.vlgmr.msrb.gmra.mxu2 %v5263_v21  ;;  %v2906_v21 = vpop.f32.mrf.mxu1 }
 0x190   :  { %3113 = vmatmul.bf16.vlgmr.msrb.gmra.mxu1 %v5260_v14  ;;  %v5099_v14 = vld [vmem:[#allocation2 + $0xae8] sm:$0xf0]  ;;  %v2907_v63 = vadd.f32 %v2906_v21, %v2893_v61 }
 0x191   :  { %3138 = vmatpush.bf16.msrb.mxu3 %v4329_v52  ;;  %v4581_v54 = vor.u32 %v5099_v14, %v4580_v51 }
 0x192   :  { %v2919_v38 = vpop.f32.mrf.mxu2 }
 0x193   :  { %3145 = vmatpush.bf16.msra.mxu0 %v4721_v13  ;;  %v2895_v53 = vpop.f32.mrf.mxu0  ;;  %v2920_v0 = vadd.f32 %v2919_v38, %v2907_v63 }
 0x194   :  { %3139 = vmatmul.bf16.vlgmr.msrb.gmra.mxu3 %v5267_v30 }
 0x197   :  { %3146 = vmatpush.bf16.msra.mxu0 %v4693_v41  ;;  %v2908_v60 = vpop.f32.mrf.mxu1  ;;  %v2932_v30 = vpop.f32.mrf.mxu3 }
 0x198   :  { %v2933_v4 = vadd.f32 %v2932_v30, %v2920_v0 }
 0x19a   :  { %v2921_v62 = vpop.f32.mrf.mxu2 }
 0x19b   :  { %3147 = vmatpush.bf16.msra.mxu0 %v4665_v44 }
 0x19f   :  { %3148 = vmatpush.bf16.msra.mxu0 %v4637_v47  ;;  %v2934_v1 = vpop.f32.mrf.mxu3 }
 0x1a3   :  { %3149 = vmatpush.bf16.msra.mxu0 %v4609_v50 }
 0x1a7   :  { %3150 = vmatpush.bf16.msra.mxu0 %v4581_v54 }
 0x1ab   :  { %3151 = vmatpush.bf16.msra.mxu0 %v4553_v46  ;;  %v2945_v6 = vpop.f32.mrf.mxu0 }
 0x1ac   :  { %v2946_v7 = vadd.f32 %v2945_v6, %v2933_v4 }
 0x1ad   :  { %v2958_v8 = vpop.f32.mrf.mxu1 }
 0x1ae   :  { %3152 = vmatmul.bf16.vlgmr.msra.gmra.mxu0 %v5265_v25  ;;  %v2959_v3 = vadd.f32 %v2958_v8, %v2946_v7 }
 0x1b2   :  { %v2971_v59 = vpop.f32.mrf.mxu2 }
 0x1b3   :  { %v2972_v9 = vadd.f32 %v2971_v59, %v2959_v3  ;;  %v2947_v11 = vpop.f32.mrf.mxu0 }
 0x1b5   :  { %3161 = vst [vmem:[#allocation7 + $0x20] sm:$0xff] %v2972_v9  ;;  %v2960_v12 = vpop.f32.mrf.mxu1 }
 0x1b7   :  { %v2984_v56 = vpop.f32.mrf.mxu3 }
 0x1ba   :  { %v2973_v15 = vpop.f32.mrf.mxu2 }
 0x1bf   :  { %v2986_v16 = vpop.f32.mrf.mxu3 }
 0x1cb   :  { %v2997_v17 = vpop.f32.mrf.mxu0 }
 0x1cc   :  { %v2998_v22 = vadd.f32 %v2997_v17, %v2984_v56 }
 0x1cd   :  { %v3010_v18 = vpop.f32.mrf.mxu1 }
 0x1ce   :  { %v3011_v27 = vadd.f32 %v3010_v18, %v2998_v22 }
 0x1d2   :  { %v3023_v20 = vpop.f32.mrf.mxu2 }
 0x1d3   :  { %v2999_v55 = vpop.f32.mrf.mxu0  ;;  %v3024_v28 = vadd.f32 %v3023_v20, %v3011_v27 }
 0x1d5   :  { %v3012_v25 = vpop.f32.mrf.mxu1 }
 0x1d7   :  { %v3036_v24 = vpop.f32.mrf.mxu3 }
 0x1d8   :  { %v3037_v31 = vadd.f32 %v3036_v24, %v3024_v28 }
 0x1da   :  { %v3025_v2 = vpop.f32.mrf.mxu2 }
 0x1df   :  { %v3038_v29 = vpop.f32.mrf.mxu3 }
 0x1eb   :  { %v3049_v32 = vpop.f32.mrf.mxu0 }
 0x1ec   :  { %v3050_v10 = vadd.f32 %v3049_v32, %v3037_v31 }
 0x1ed   :  { %v3062_v33 = vpop.f32.mrf.mxu1 }
 0x1ee   :  { %v3063_v34 = vadd.f32 %v3062_v33, %v3050_v10 }
 0x1f0   :  { %3162 = vst [vmem:[#allocation7 + $0x28] sm:$0xff] %v3063_v34 }
 0x1f2   :  { %v3075_v35 = vpop.f32.mrf.mxu2 }
 0x1f3   :  { %v3051_v5 = vpop.f32.mrf.mxu0 }
 0x1f5   :  { %v3064_v23 = vpop.f32.mrf.mxu1 }
 0x1f7   :  { %v3088_v13 = vpop.f32.mrf.mxu3 }
 0x1f8   :  { %v3089_v42 = vadd.f32 %v3088_v13, %v3075_v35 }
 0x1fa   :  { %v3077_v19 = vpop.f32.mrf.mxu2 }
 0x1ff   :  { %v3090_v37 = vpop.f32.mrf.mxu3 }
 0x20b   :  { %v3101_v39 = vpop.f32.mrf.mxu0 }
 0x20c   :  { %v3102_v40 = vadd.f32 %v3101_v39, %v3089_v42 }
 0x20d   :  { %v3114_v36 = vpop.f32.mrf.mxu1 }
 0x20e   :  { %v3115_v45 = vadd.f32 %v3114_v36, %v3102_v40 }
 0x212   :  { %v3127_v52 = vpop.f32.mrf.mxu2 }
 0x213   :  { %v3103_v41 = vpop.f32.mrf.mxu0  ;;  %v3128_v47 = vadd.f32 %v3127_v52, %v3115_v45 }
 0x215   :  { %v3116_v26 = vpop.f32.mrf.mxu1 }
 0x217   :  { %v3140_v43 = vpop.f32.mrf.mxu3 }
 0x218   :  { %v3141_v48 = vadd.f32 %v3140_v43, %v3128_v47 }
 0x21a   :  { %v3129_v44 = vpop.f32.mrf.mxu2 }
 0x21f   :  { %v3142_v61 = vpop.f32.mrf.mxu3 }
 0x22b   :  { %v3153_v49 = vpop.f32.mrf.mxu0 }
 0x22c   :  { %v3154_v21 = vadd.f32 %v3153_v49, %v3141_v48 }
 0x22e   :  { %3163 = vst [vmem:[#allocation7 + $0x30] sm:$0xff] %v3154_v21 }
 0x22f   :  { %3174 = dma.vmem_to_hbm [thread:$0]  %s3170_s1, 896, %s3172_s23, [#allocation4]  }
 0x233   :  { %v3155_v50 = vpop.f32.mrf.mxu0 }
 0x234   :  { %5223 = dma.done.wait [#allocation4], 896  }
 0x235   :  { %5224 = vsyncadd [#allocation4], 4294966400 }
 0x236   :  { %3179 = vsyncpa [#allocation3], 1 }
 0x237   :  { %3180 = vsyncpa [#allocation6], 1 }
 0x238   :  { %3181 = vsyncpa [#allocation4], 1 }

</bundles_post_ra>
